<compile_context>
chip_gen: v5e
topology: v5e:2x2
jax: 0.10.0
libtpu: 0.0.40
codegen_flags: <defaults>
</compile_context>

<pallas_src>
from functools import partial
import math

import jax
import jax.numpy as jnp
from jax.experimental import pallas as pl
from jax.experimental.pallas import tpu as pltpu


# ----------------------------------------------------------------------------
# Single fused kernel: ASPP (4 branches + projection) + decoder (reduce,
# upsample, 3x3 fuse, classifier) — per batch element.
# ----------------------------------------------------------------------------
def _classifier_fused_kernel(x_ref, low_ref,
                             w1_ref, b1_ref, w2_ref, b2_ref, w3_ref, b3_ref,
                             wp_ref, bp_ref, wproj_ref, bproj_ref,
                             wlow_ref, blow_ref, wfuse_ref, bfuse_ref,
                             wclsT_ref, bclsT_ref,
                             o_ref, pad_ref,
                             *, H, W, Hl, Wl, pad, dilations,
                             c_high, c_aspp, c_red, c_cat):
    f32, bf16 = jnp.float32, jnp.bfloat16
    HW, HWl = H * W, Hl * Wl
    sh, sw = Hl // H, Wl // W

    # ------------------------------- ASPP -----------------------------------
    def win3(hs, ws):                           # (H, W, c_high) f32 window
        return x_ref[0, hs:hs + H, ws:ws + W, :]

    xc3 = win3(pad, pad)                        # un-padded centre
    xc = xc3.reshape(HW, c_high)                # single reshape, stays f32
    xc_bf = xc.astype(bf16)

    # branch 1: 1x1 conv + ReLU
    b1 = jnp.maximum(
        jnp.dot(xc_bf, w1_ref[...], preferred_element_type=f32) + b1_ref[...],
        0.0)

    # branches 2/3: atrous 3x3 conv as ONE wide matmul per branch (K=9*c_high)
    def atrous(w_ref, b_ref, d):
        slab = jnp.concatenate(
            [win3(pad - d + kh * d, pad - d + kw * d)
             for kh in range(3) for kw in range(3)], axis=-1)
        slab = slab.reshape(HW, 9 * c_high).astype(bf16)
        acc = jnp.dot(slab, w_ref[...], preferred_element_type=f32) + b_ref[...]
        return jnp.maximum(acc, 0.0)

    b2 = atrous(w2_ref, b2_ref, dilations[0])
    b3 = atrous(w3_ref, b3_ref, dilations[1])

    # branch 4: global average pool + 1x1 conv
    gp = jnp.mean(xc, axis=0, keepdims=True)                      # (1, c_high)
    gp = jnp.maximum(
        jnp.dot(gp.astype(bf16), wp_ref[...], preferred_element_type=f32)
        + bp_ref[...], 0.0)                                       # (1, c_aspp)

    # projection of the channel concat as ONE matmul (K = 4*c_aspp)
    proj_slab = jnp.concatenate(
        [b1, b2, b3, jnp.broadcast_to(gp, (HW, c_aspp))], axis=-1).astype(bf16)
    proj = jnp.maximum(
        jnp.dot(proj_slab, wproj_ref[...], preferred_element_type=f32)
        + bproj_ref[...], 0.0)                            # (HW, c_aspp) f32

    # ------------------------------ decoder ----------------------------------
    # 1x1 reduction of the low-level features (+ReLU)
    low = low_ref[0].reshape(HWl, low_ref.shape[-1]).astype(bf16)
    low_red = jnp.maximum(
        jnp.dot(low, wlow_ref[...], preferred_element_type=f32)
        + blow_ref[...], 0.0)                             # (HWl, c_red) f32

    # nearest-neighbour upsample via broadcast/reshape (no 0/1 matmul, no HBM)
    p3 = proj.reshape(H, W, c_aspp)
    up = jnp.broadcast_to(p3[:, None, :, :], (H, sh, W, c_aspp)) \
            .reshape(Hl, W, c_aspp)
    up = jnp.broadcast_to(up[:, :, None, :], (Hl, W, sw, c_aspp)) \
            .reshape(Hl, Wl, c_aspp)                      # (Hl, Wl, c_aspp)

    # zero only the 1-px halo of the bf16 scratch, then one concatenated store
    zrow = jnp.zeros((1, Wl + 2, c_cat), bf16)
    zcol = jnp.zeros((Hl + 2, 1, c_cat), bf16)
    pad_ref[0:1, :, :] = zrow
    pad_ref[Hl + 1:Hl + 2, :, :] = zrow
    pad_ref[:, 0:1, :] = zcol
    pad_ref[:, Wl + 1:Wl + 2, :] = zcol
    cat3 = jnp.concatenate([low_red.reshape(Hl, Wl, c_red), up], axis=-1)
    pad_ref[1:1 + Hl, 1:1 + Wl, :] = cat3.astype(bf16)

    # 3x3 fuse conv as ONE wide matmul (K = 9*c_cat)
    slab = jnp.concatenate(
        [pad_ref[kh:kh + Hl, kw:kw + Wl, :]
         for kh in range(3) for kw in range(3)], axis=-1)
    slab = slab.reshape(HWl, 9 * c_cat)                   # already bf16
    fused = jnp.maximum(
        jnp.dot(slab, wfuse_ref[...], preferred_element_type=f32)
        + bfuse_ref[...], 0.0)                            # (HWl, c_dec) f32

    # final 1x1 classifier conv, produced channel-major so the HBM store is
    # lane-dense: (n_cls, Hl*Wl), last dim a multiple of 128.
    logits_t = jnp.dot(wclsT_ref[...], fused.astype(bf16).T,
                       preferred_element_type=f32) + bclsT_ref[...]
    o_ref[0] = logits_t.astype(o_ref.dtype)


# ----------------------------------------------------------------------------
# Wrapper
# ----------------------------------------------------------------------------
def classifier_forward(params, low_level, high_level, *, dilations=(2, 4)):
    """low_level / high_level are NCHW (PyTorch layout); returns NCHW logits."""
    f32 = jnp.float32
    low = jnp.transpose(low_level, (0, 2, 3, 1)).astype(f32)       # NHWC
    high = jnp.transpose(high_level, (0, 2, 3, 1)).astype(f32)     # NHWC
    N, H, W, c_high = high.shape
    _, Hl, Wl, c_low = low.shape
    assert Hl % H == 0 and Wl % W == 0, "integer upsample factors expected"

    pa, pd = params["aspp"], params["decoder"]
    c_aspp = pa["b1"].shape[0]
    c_red = pd["blow"].shape[0]
    c_dec = pd["bfuse"].shape[0]
    n_cls = pd["bcls"].shape[0]
    c_cat = c_red + c_aspp
    pad = max(dilations)
    Hp, Wp = H + 2 * pad, W + 2 * pad

    highp = jnp.pad(high, ((0, 0), (pad, pad), (pad, pad), (0, 0)))   # halo pad

    args = (
        highp, low,
        pa["w1"], pa["b1"].reshape(1, c_aspp),
        pa["w2"].reshape(9 * c_high, c_aspp), pa["b2"].reshape(1, c_aspp),
        pa["w3"].reshape(9 * c_high, c_aspp), pa["b3"].reshape(1, c_aspp),
        pa["wp"], pa["bp"].reshape(1, c_aspp),
        pa["wproj"], pa["bproj"].reshape(1, c_aspp),
        pd["wlow"], pd["blow"].reshape(1, c_red),
        pd["wfuse"].reshape(9 * c_cat, c_dec), pd["bfuse"].reshape(1, c_dec),
        jnp.transpose(pd["wcls"]), pd["bcls"].reshape(n_cls, 1),
    )

    def full(shape):
        nd = len(shape)
        return pl.BlockSpec(shape, lambda b, _nd=nd: (0,) * _nd)

    in_specs = [
        pl.BlockSpec((1, Hp, Wp, c_high), lambda b: (b, 0, 0, 0)),
        pl.BlockSpec((1, Hl, Wl, c_low), lambda b: (b, 0, 0, 0)),
    ] + [full(a.shape) for a in args[2:]]

    out_struct = jax.ShapeDtypeStruct((N, n_cls, Hl * Wl), f32)

    flops = N * (2 * H * W * c_high * c_aspp * 19        # 1x1 + two 3x3 branches
                 + 2 * c_high * c_aspp                   # pooled 1x1
                 + 2 * H * W * 4 * c_aspp * c_aspp       # projection
                 + 2 * Hl * Wl * c_low * c_red           # low-level reduce
                 + 2 * Hl * Wl * 9 * c_cat * c_dec       # fuse conv
                 + 2 * Hl * Wl * c_dec * n_cls)          # classifier
    nbytes = sum(int(a.size) * a.dtype.itemsize for a in args)
    nbytes += math.prod(out_struct.shape) * jnp.dtype(f32).itemsize

    out = pl.pallas_call(
        partial(_classifier_fused_kernel, H=H, W=W, Hl=Hl, Wl=Wl, pad=pad,
                dilations=dilations, c_high=c_high, c_aspp=c_aspp,
                c_red=c_red, c_cat=c_cat),
        out_shape=out_struct,
        grid=(N,),
        in_specs=in_specs,
        out_specs=pl.BlockSpec((1, n_cls, Hl * Wl), lambda b: (b, 0, 0)),
        scratch_shapes=[pltpu.VMEM((Hl + 2, Wl + 2, c_cat), jnp.bfloat16)],
        compiler_params=pltpu.CompilerParams(
            dimension_semantics=("parallel",),          # v7x: one TC per batch
            vmem_limit_bytes=32 * 1024 * 1024),
        cost_estimate=pl.CostEstimate(flops=int(flops), transcendentals=0,
                                      bytes_accessed=int(nbytes)),
    )(*args)

    # Output is already channel-major (N, n_cls, Hl*Wl) -> NCHW by reshape only.
    return out.reshape(N, n_cls, Hl, Wl)


# ----------------------------------------------------------------------------
# Pure-JAX f32 reference (same math) — used only for the correctness check
# ----------------------------------------------------------------------------
def reference_forward(params, low_level, high_level, *, dilations=(2, 4)):
    low = jnp.transpose(low_level, (0, 2, 3, 1)).astype(jnp.float32)
    high = jnp.transpose(high_level, (0, 2, 3, 1)).astype(jnp.float32)
    pa, pd = params["aspp"], params["decoder"]

    def conv1x1(x, w, b, relu=True):
        y = jnp.einsum("nhwc,cd->nhwd", x, w.astype(jnp.float32)) + b
        return jnp.maximum(y, 0.0) if relu else y

    def conv3x3(x, w, b, d, relu=True):
        n, h, wdt, _ = x.shape
        w = w.astype(jnp.float32)
        xp = jnp.pad(x, ((0, 0), (d, d), (d, d), (0, 0)))
        acc = jnp.zeros((n, h, wdt, w.shape[-1]), jnp.float32) + b
        for kh in range(3):
            for kw in range(3):
                acc = acc + jnp.einsum(
                    "nhwc,cd->nhwd",
                    xp[:, kh * d:kh * d + h, kw * d:kw * d + wdt, :], w[kh, kw])
        return jnp.maximum(acc, 0.0) if relu else acc

    n, h, w_, _ = high.shape
    b1 = conv1x1(high, pa["w1"], pa["b1"])
    b2 = conv3x3(high, pa["w2"], pa["b2"], dilations[0])
    b3 = conv3x3(high, pa["w3"], pa["b3"], dilations[1])
    gp = conv1x1(jnp.mean(high, axis=(1, 2), keepdims=True), pa["wp"], pa["bp"])
    b4 = jnp.broadcast_to(gp, (n, h, w_, gp.shape[-1]))
    x = conv1x1(jnp.concatenate([b1, b2, b3, b4], -1), pa["wproj"], pa["bproj"])

    low_red = conv1x1(low, pd["wlow"], pd["blow"])
    hl, wl = low.shape[1:3]
    hi = (jnp.arange(hl) * h) // hl
    wi = (jnp.arange(wl) * w_) // wl
    up = x[:, hi][:, :, wi]
    y = conv3x3(jnp.concatenate([low_red, up], -1), pd["wfuse"], pd["bfuse"], 1)
    y = conv1x1(y, pd["wcls"], pd["bcls"], relu=False)
    return jnp.transpose(y, (0, 3, 1, 2))


# ----------------------------------------------------------------------------
# Deterministic parameter init (weights pre-cast to bf16, biases f32)
# ----------------------------------------------------------------------------
def init_params(key, c_low, c_high, c_aspp, c_red, c_dec, n_cls):
    ks = jax.random.split(key, 16)
    f32, bf16 = jnp.float32, jnp.bfloat16
    w = lambda k, s: (0.1 * jax.random.normal(k, s, dtype=f32)).astype(bf16)
    b = lambda k, s: 0.1 * jax.random.normal(k, s, dtype=f32)
    aspp = dict(
        w1=w(ks[0], (c_high, c_aspp)),            b1=b(ks[1], (c_aspp,)),
        w2=w(ks[2], (3, 3, c_high, c_aspp)),      b2=b(ks[3], (c_aspp,)),
        w3=w(ks[4], (3, 3, c_high, c_aspp)),      b3=b(ks[5], (c_aspp,)),
        wp=w(ks[6], (c_high, c_aspp)),            bp=b(ks[7], (c_aspp,)),
        wproj=w(ks[8], (4 * c_aspp, c_aspp)),     bproj=b(ks[9], (c_aspp,)),
    )
    decoder = dict(
        wlow=w(ks[10], (c_low, c_red)),                 blow=b(ks[11], (c_red,)),
        wfuse=w(ks[12], (3, 3, c_red + c_aspp, c_dec)), bfuse=b(ks[13], (c_dec,)),
        wcls=w(ks[14], (c_dec, n_cls)),                 bcls=b(ks[15], (n_cls,)),
    )
    return dict(aspp=aspp, decoder=decoder)


# ----------------------------------------------------------------------------
if __name__ == "__main__":
    key = jax.random.PRNGKey(0)
    k_lo, k_hi, k_p = jax.random.split(key, 3)

    N, C_LOW, H_LOW, W_LOW = 2, 8, 16, 16        # low_level  (NCHW)
    C_HIGH, H_HIGH, W_HIGH = 16, 8, 8            # high_level (NCHW)
    C_ASPP, C_RED, C_DEC, N_CLS = 16, 8, 16, 4

    low_level = jax.random.normal(k_lo, (N, C_LOW, H_LOW, W_LOW), dtype=jnp.float32)
    high_level = jax.random.normal(k_hi, (N, C_HIGH, H_HIGH, W_HIGH), dtype=jnp.float32)
    params = init_params(k_p, C_LOW, C_HIGH, C_ASPP, C_RED, C_DEC, N_CLS)

    fwd = jax.jit(classifier_forward)
    out = jax.block_until_ready(fwd(params, low_level, high_level))

    assert out.shape == (N, N_CLS, H_LOW, W_LOW), out.shape
    assert bool(jnp.all(jnp.isfinite(out)))

    # correctness check vs. a pure-JAX f32 reference (kernel matmuls are bf16)
    ref = jax.block_until_ready(jax.jit(reference_forward)(params, low_level, high_level))
    assert bool(jnp.allclose(out, ref, rtol=1e-1, atol=1e-1)), \
        float(jnp.max(jnp.abs(out - ref)))

    print("KERNEL_OK")
</pallas_src>

<mosaic_0001>
module attributes {stable_mosaic.version = 11 : i64} {
  func.func @_classifier_fused_kernel(%arg0: i32, %arg1: memref<1x16x16x16xf32, #tpu.memory_space<vmem>>, %arg2: memref<1x16x16x8xf32, #tpu.memory_space<vmem>>, %arg3: memref<16x16xbf16, #tpu.memory_space<vmem>>, %arg4: memref<1x16xf32, #tpu.memory_space<vmem>>, %arg5: memref<144x16xbf16, #tpu.memory_space<vmem>>, %arg6: memref<1x16xf32, #tpu.memory_space<vmem>>, %arg7: memref<144x16xbf16, #tpu.memory_space<vmem>>, %arg8: memref<1x16xf32, #tpu.memory_space<vmem>>, %arg9: memref<16x16xbf16, #tpu.memory_space<vmem>>, %arg10: memref<1x16xf32, #tpu.memory_space<vmem>>, %arg11: memref<64x16xbf16, #tpu.memory_space<vmem>>, %arg12: memref<1x16xf32, #tpu.memory_space<vmem>>, %arg13: memref<8x8xbf16, #tpu.memory_space<vmem>>, %arg14: memref<1x8xf32, #tpu.memory_space<vmem>>, %arg15: memref<216x16xbf16, #tpu.memory_space<vmem>>, %arg16: memref<1x16xf32, #tpu.memory_space<vmem>>, %arg17: memref<4x16xbf16, #tpu.memory_space<vmem>>, %arg18: memref<4x1xf32, #tpu.memory_space<vmem>>, %arg19: memref<1x4x256xf32, #tpu.memory_space<vmem>>, %arg20: memref<18x18x24xbf16, #tpu.memory_space<vmem>>) attributes {dimension_semantics = [#tpu.dimension_semantics<parallel>], iteration_bounds = array<i64: 2>, scalar_prefetch = 0 : i64, scratch_operands = 1 : i64, tpu.core_type = #tpu.core_type<tc>, window_params = [{transform_indices = @transform_0, window_bounds = array<i64: 1, 16, 16, 16>}, {transform_indices = @transform_1, window_bounds = array<i64: 1, 16, 16, 8>}, {pipeline_mode = #tpu.pipeline_mode<synchronous>, transform_indices = @transform_2, window_bounds = array<i64: 16, 16>}, {pipeline_mode = #tpu.pipeline_mode<synchronous>, transform_indices = @transform_3, window_bounds = array<i64: 1, 16>}, {pipeline_mode = #tpu.pipeline_mode<synchronous>, transform_indices = @transform_4, window_bounds = array<i64: 144, 16>}, {pipeline_mode = #tpu.pipeline_mode<synchronous>, transform_indices = @transform_5, window_bounds = array<i64: 1, 16>}, {pipeline_mode = #tpu.pipeline_mode<synchronous>, transform_indices = @transform_6, window_bounds = array<i64: 144, 16>}, {pipeline_mode = #tpu.pipeline_mode<synchronous>, transform_indices = @transform_7, window_bounds = array<i64: 1, 16>}, {pipeline_mode = #tpu.pipeline_mode<synchronous>, transform_indices = @transform_8, window_bounds = array<i64: 16, 16>}, {pipeline_mode = #tpu.pipeline_mode<synchronous>, transform_indices = @transform_9, window_bounds = array<i64: 1, 16>}, {pipeline_mode = #tpu.pipeline_mode<synchronous>, transform_indices = @transform_10, window_bounds = array<i64: 64, 16>}, {pipeline_mode = #tpu.pipeline_mode<synchronous>, transform_indices = @transform_11, window_bounds = array<i64: 1, 16>}, {pipeline_mode = #tpu.pipeline_mode<synchronous>, transform_indices = @transform_12, window_bounds = array<i64: 8, 8>}, {pipeline_mode = #tpu.pipeline_mode<synchronous>, transform_indices = @transform_13, window_bounds = array<i64: 1, 8>}, {pipeline_mode = #tpu.pipeline_mode<synchronous>, transform_indices = @transform_14, window_bounds = array<i64: 216, 16>}, {pipeline_mode = #tpu.pipeline_mode<synchronous>, transform_indices = @transform_15, window_bounds = array<i64: 1, 16>}, {pipeline_mode = #tpu.pipeline_mode<synchronous>, transform_indices = @transform_16, window_bounds = array<i64: 4, 16>}, {pipeline_mode = #tpu.pipeline_mode<synchronous>, transform_indices = @transform_17, window_bounds = array<i64: 4, 1>}, {transform_indices = @transform_18, window_bounds = array<i64: 1, 4, 256>}]} {
    %c0 = arith.constant 0 : index
    %c4 = arith.constant 4 : index
    %c4_0 = arith.constant 4 : index
    %c0_1 = arith.constant 0 : index
    %0 = vector.load %arg1[%c0, %c4, %c4_0, %c0_1] : memref<1x16x16x16xf32, #tpu.memory_space<vmem>>, vector<1x8x8x16xf32>
    %1 = vector.shape_cast %0 : vector<1x8x8x16xf32> to vector<8x8x16xf32>
    %2 = vector.shape_cast %1 : vector<8x8x16xf32> to vector<64x16xf32>
    %3 = arith.truncf %2 : vector<64x16xf32> to vector<64x16xbf16>
    %c0_2 = arith.constant 0 : index
    %c0_3 = arith.constant 0 : index
    %4 = vector.load %arg3[%c0_2, %c0_3] : memref<16x16xbf16, #tpu.memory_space<vmem>>, vector<16x16xbf16>
    %cst = arith.constant dense<0.000000e+00> : vector<64x16xf32>
    %5 = tpu.matmul %3, %4, %cst {dimension_numbers = #tpu.dot_dimension_numbers<[1], [0], [0], [1], [0, 0, 1, 1], [], []>} : vector<64x16xbf16>, vector<16x16xbf16>, vector<64x16xf32> -> vector<64x16xf32>
    %c0_4 = arith.constant 0 : index
    %c0_5 = arith.constant 0 : index
    %6 = vector.load %arg4[%c0_4, %c0_5] : memref<1x16xf32, #tpu.memory_space<vmem>>, vector<1x16xf32>
    %7 = vector.broadcast %6 : vector<1x16xf32> to vector<64x16xf32>
    %8 = arith.addf %5, %7 : vector<64x16xf32>
    %cst_6 = arith.constant 0.000000e+00 : f32
    %9 = vector.broadcast %cst_6 : f32 to vector<64x16xf32>
    %10 = arith.maximumf %8, %9 : vector<64x16xf32>
    %c0_7 = arith.constant 0 : index
    %c2 = arith.constant 2 : index
    %c2_8 = arith.constant 2 : index
    %c0_9 = arith.constant 0 : index
    %11 = vector.load %arg1[%c0_7, %c2, %c2_8, %c0_9] : memref<1x16x16x16xf32, #tpu.memory_space<vmem>>, vector<1x8x8x16xf32>
    %12 = vector.shape_cast %11 : vector<1x8x8x16xf32> to vector<8x8x16xf32>
    %c0_10 = arith.constant 0 : index
    %c2_11 = arith.constant 2 : index
    %c4_12 = arith.constant 4 : index
    %c0_13 = arith.constant 0 : index
    %13 = vector.load %arg1[%c0_10, %c2_11, %c4_12, %c0_13] : memref<1x16x16x16xf32, #tpu.memory_space<vmem>>, vector<1x8x8x16xf32>
    %14 = vector.shape_cast %13 : vector<1x8x8x16xf32> to vector<8x8x16xf32>
    %c0_14 = arith.constant 0 : index
    %c2_15 = arith.constant 2 : index
    %c6 = arith.constant 6 : index
    %c0_16 = arith.constant 0 : index
    %15 = vector.load %arg1[%c0_14, %c2_15, %c6, %c0_16] : memref<1x16x16x16xf32, #tpu.memory_space<vmem>>, vector<1x8x8x16xf32>
    %16 = vector.shape_cast %15 : vector<1x8x8x16xf32> to vector<8x8x16xf32>
    %c0_17 = arith.constant 0 : index
    %c4_18 = arith.constant 4 : index
    %c2_19 = arith.constant 2 : index
    %c0_20 = arith.constant 0 : index
    %17 = vector.load %arg1[%c0_17, %c4_18, %c2_19, %c0_20] : memref<1x16x16x16xf32, #tpu.memory_space<vmem>>, vector<1x8x8x16xf32>
    %18 = vector.shape_cast %17 : vector<1x8x8x16xf32> to vector<8x8x16xf32>
    %c0_21 = arith.constant 0 : index
    %c4_22 = arith.constant 4 : index
    %c4_23 = arith.constant 4 : index
    %c0_24 = arith.constant 0 : index
    %19 = vector.load %arg1[%c0_21, %c4_22, %c4_23, %c0_24] : memref<1x16x16x16xf32, #tpu.memory_space<vmem>>, vector<1x8x8x16xf32>
    %20 = vector.shape_cast %19 : vector<1x8x8x16xf32> to vector<8x8x16xf32>
    %c0_25 = arith.constant 0 : index
    %c4_26 = arith.constant 4 : index
    %c6_27 = arith.constant 6 : index
    %c0_28 = arith.constant 0 : index
    %21 = vector.load %arg1[%c0_25, %c4_26, %c6_27, %c0_28] : memref<1x16x16x16xf32, #tpu.memory_space<vmem>>, vector<1x8x8x16xf32>
    %22 = vector.shape_cast %21 : vector<1x8x8x16xf32> to vector<8x8x16xf32>
    %c0_29 = arith.constant 0 : index
    %c6_30 = arith.constant 6 : index
    %c2_31 = arith.constant 2 : index
    %c0_32 = arith.constant 0 : index
    %23 = vector.load %arg1[%c0_29, %c6_30, %c2_31, %c0_32] : memref<1x16x16x16xf32, #tpu.memory_space<vmem>>, vector<1x8x8x16xf32>
    %24 = vector.shape_cast %23 : vector<1x8x8x16xf32> to vector<8x8x16xf32>
    %c0_33 = arith.constant 0 : index
    %c6_34 = arith.constant 6 : index
    %c4_35 = arith.constant 4 : index
    %c0_36 = arith.constant 0 : index
    %25 = vector.load %arg1[%c0_33, %c6_34, %c4_35, %c0_36] : memref<1x16x16x16xf32, #tpu.memory_space<vmem>>, vector<1x8x8x16xf32>
    %26 = vector.shape_cast %25 : vector<1x8x8x16xf32> to vector<8x8x16xf32>
    %c0_37 = arith.constant 0 : index
    %c6_38 = arith.constant 6 : index
    %c6_39 = arith.constant 6 : index
    %c0_40 = arith.constant 0 : index
    %27 = vector.load %arg1[%c0_37, %c6_38, %c6_39, %c0_40] : memref<1x16x16x16xf32, #tpu.memory_space<vmem>>, vector<1x8x8x16xf32>
    %28 = vector.shape_cast %27 : vector<1x8x8x16xf32> to vector<8x8x16xf32>
    %29 = tpu.concatenate %12, %14, %16, %18, %20, %22, %24, %26, %28 in 2 : vector<8x8x16xf32>, vector<8x8x16xf32>, vector<8x8x16xf32>, vector<8x8x16xf32>, vector<8x8x16xf32>, vector<8x8x16xf32>, vector<8x8x16xf32>, vector<8x8x16xf32>, vector<8x8x16xf32> -> vector<8x8x144xf32>
    %30 = vector.shape_cast %29 : vector<8x8x144xf32> to vector<64x144xf32>
    %31 = arith.truncf %30 : vector<64x144xf32> to vector<64x144xbf16>
    %c0_41 = arith.constant 0 : index
    %c0_42 = arith.constant 0 : index
    %32 = vector.load %arg5[%c0_41, %c0_42] : memref<144x16xbf16, #tpu.memory_space<vmem>>, vector<144x16xbf16>
    %cst_43 = arith.constant dense<0.000000e+00> : vector<64x16xf32>
    %33 = tpu.matmul %31, %32, %cst_43 {dimension_numbers = #tpu.dot_dimension_numbers<[1], [0], [0], [1], [0, 0, 1, 1], [], []>} : vector<64x144xbf16>, vector<144x16xbf16>, vector<64x16xf32> -> vector<64x16xf32>
    %c0_44 = arith.constant 0 : index
    %c0_45 = arith.constant 0 : index
    %34 = vector.load %arg6[%c0_44, %c0_45] : memref<1x16xf32, #tpu.memory_space<vmem>>, vector<1x16xf32>
    %35 = vector.broadcast %34 : vector<1x16xf32> to vector<64x16xf32>
    %36 = arith.addf %33, %35 : vector<64x16xf32>
    %cst_46 = arith.constant 0.000000e+00 : f32
    %37 = vector.broadcast %cst_46 : f32 to vector<64x16xf32>
    %38 = arith.maximumf %36, %37 : vector<64x16xf32>
    %c0_47 = arith.constant 0 : index
    %c0_48 = arith.constant 0 : index
    %c0_49 = arith.constant 0 : index
    %c0_50 = arith.constant 0 : index
    %39 = vector.load %arg1[%c0_47, %c0_48, %c0_49, %c0_50] : memref<1x16x16x16xf32, #tpu.memory_space<vmem>>, vector<1x8x8x16xf32>
    %40 = vector.shape_cast %39 : vector<1x8x8x16xf32> to vector<8x8x16xf32>
    %c0_51 = arith.constant 0 : index
    %c0_52 = arith.constant 0 : index
    %c4_53 = arith.constant 4 : index
    %c0_54 = arith.constant 0 : index
    %41 = vector.load %arg1[%c0_51, %c0_52, %c4_53, %c0_54] : memref<1x16x16x16xf32, #tpu.memory_space<vmem>>, vector<1x8x8x16xf32>
    %42 = vector.shape_cast %41 : vector<1x8x8x16xf32> to vector<8x8x16xf32>
    %c0_55 = arith.constant 0 : index
    %c0_56 = arith.constant 0 : index
    %c8 = arith.constant 8 : index
    %c0_57 = arith.constant 0 : index
    %43 = vector.load %arg1[%c0_55, %c0_56, %c8, %c0_57] : memref<1x16x16x16xf32, #tpu.memory_space<vmem>>, vector<1x8x8x16xf32>
    %44 = vector.shape_cast %43 : vector<1x8x8x16xf32> to vector<8x8x16xf32>
    %c0_58 = arith.constant 0 : index
    %c4_59 = arith.constant 4 : index
    %c0_60 = arith.constant 0 : index
    %c0_61 = arith.constant 0 : index
    %45 = vector.load %arg1[%c0_58, %c4_59, %c0_60, %c0_61] : memref<1x16x16x16xf32, #tpu.memory_space<vmem>>, vector<1x8x8x16xf32>
    %46 = vector.shape_cast %45 : vector<1x8x8x16xf32> to vector<8x8x16xf32>
    %c0_62 = arith.constant 0 : index
    %c4_63 = arith.constant 4 : index
    %c4_64 = arith.constant 4 : index
    %c0_65 = arith.constant 0 : index
    %47 = vector.load %arg1[%c0_62, %c4_63, %c4_64, %c0_65] : memref<1x16x16x16xf32, #tpu.memory_space<vmem>>, vector<1x8x8x16xf32>
    %48 = vector.shape_cast %47 : vector<1x8x8x16xf32> to vector<8x8x16xf32>
    %c0_66 = arith.constant 0 : index
    %c4_67 = arith.constant 4 : index
    %c8_68 = arith.constant 8 : index
    %c0_69 = arith.constant 0 : index
    %49 = vector.load %arg1[%c0_66, %c4_67, %c8_68, %c0_69] : memref<1x16x16x16xf32, #tpu.memory_space<vmem>>, vector<1x8x8x16xf32>
    %50 = vector.shape_cast %49 : vector<1x8x8x16xf32> to vector<8x8x16xf32>
    %c0_70 = arith.constant 0 : index
    %c8_71 = arith.constant 8 : index
    %c0_72 = arith.constant 0 : index
    %c0_73 = arith.constant 0 : index
    %51 = vector.load %arg1[%c0_70, %c8_71, %c0_72, %c0_73] : memref<1x16x16x16xf32, #tpu.memory_space<vmem>>, vector<1x8x8x16xf32>
    %52 = vector.shape_cast %51 : vector<1x8x8x16xf32> to vector<8x8x16xf32>
    %c0_74 = arith.constant 0 : index
    %c8_75 = arith.constant 8 : index
    %c4_76 = arith.constant 4 : index
    %c0_77 = arith.constant 0 : index
    %53 = vector.load %arg1[%c0_74, %c8_75, %c4_76, %c0_77] : memref<1x16x16x16xf32, #tpu.memory_space<vmem>>, vector<1x8x8x16xf32>
    %54 = vector.shape_cast %53 : vector<1x8x8x16xf32> to vector<8x8x16xf32>
    %c0_78 = arith.constant 0 : index
    %c8_79 = arith.constant 8 : index
    %c8_80 = arith.constant 8 : index
    %c0_81 = arith.constant 0 : index
    %55 = vector.load %arg1[%c0_78, %c8_79, %c8_80, %c0_81] : memref<1x16x16x16xf32, #tpu.memory_space<vmem>>, vector<1x8x8x16xf32>
    %56 = vector.shape_cast %55 : vector<1x8x8x16xf32> to vector<8x8x16xf32>
    %57 = tpu.concatenate %40, %42, %44, %46, %48, %50, %52, %54, %56 in 2 : vector<8x8x16xf32>, vector<8x8x16xf32>, vector<8x8x16xf32>, vector<8x8x16xf32>, vector<8x8x16xf32>, vector<8x8x16xf32>, vector<8x8x16xf32>, vector<8x8x16xf32>, vector<8x8x16xf32> -> vector<8x8x144xf32>
    %58 = vector.shape_cast %57 : vector<8x8x144xf32> to vector<64x144xf32>
    %59 = arith.truncf %58 : vector<64x144xf32> to vector<64x144xbf16>
    %c0_82 = arith.constant 0 : index
    %c0_83 = arith.constant 0 : index
    %60 = vector.load %arg7[%c0_82, %c0_83] : memref<144x16xbf16, #tpu.memory_space<vmem>>, vector<144x16xbf16>
    %cst_84 = arith.constant dense<0.000000e+00> : vector<64x16xf32>
    %61 = tpu.matmul %59, %60, %cst_84 {dimension_numbers = #tpu.dot_dimension_numbers<[1], [0], [0], [1], [0, 0, 1, 1], [], []>} : vector<64x144xbf16>, vector<144x16xbf16>, vector<64x16xf32> -> vector<64x16xf32>
    %c0_85 = arith.constant 0 : index
    %c0_86 = arith.constant 0 : index
    %62 = vector.load %arg8[%c0_85, %c0_86] : memref<1x16xf32, #tpu.memory_space<vmem>>, vector<1x16xf32>
    %63 = vector.broadcast %62 : vector<1x16xf32> to vector<64x16xf32>
    %64 = arith.addf %61, %63 : vector<64x16xf32>
    %cst_87 = arith.constant 0.000000e+00 : f32
    %65 = vector.broadcast %cst_87 : f32 to vector<64x16xf32>
    %66 = arith.maximumf %64, %65 : vector<64x16xf32>
    %cst_88 = arith.constant dense<0.000000e+00> : vector<16xf32>
    %67 = vector.multi_reduction <add>, %2, %cst_88 [0] : vector<64x16xf32> to vector<16xf32>
    %68 = vector.shape_cast %67 : vector<16xf32> to vector<1x16xf32>
    %cst_89 = arith.constant 6.400000e+01 : f32
    %69 = vector.broadcast %cst_89 : f32 to vector<1x16xf32>
    %70 = arith.divf %68, %69 : vector<1x16xf32>
    %71 = arith.truncf %70 : vector<1x16xf32> to vector<1x16xbf16>
    %c0_90 = arith.constant 0 : index
    %c0_91 = arith.constant 0 : index
    %72 = vector.load %arg9[%c0_90, %c0_91] : memref<16x16xbf16, #tpu.memory_space<vmem>>, vector<16x16xbf16>
    %cst_92 = arith.constant dense<0.000000e+00> : vector<1x16xf32>
    %73 = tpu.matmul %71, %72, %cst_92 {dimension_numbers = #tpu.dot_dimension_numbers<[1], [0], [0], [1], [0, 0, 1, 1], [], []>} : vector<1x16xbf16>, vector<16x16xbf16>, vector<1x16xf32> -> vector<1x16xf32>
    %c0_93 = arith.constant 0 : index
    %c0_94 = arith.constant 0 : index
    %74 = vector.load %arg10[%c0_93, %c0_94] : memref<1x16xf32, #tpu.memory_space<vmem>>, vector<1x16xf32>
    %75 = arith.addf %73, %74 : vector<1x16xf32>
    %cst_95 = arith.constant 0.000000e+00 : f32
    %76 = vector.broadcast %cst_95 : f32 to vector<1x16xf32>
    %77 = arith.maximumf %75, %76 : vector<1x16xf32>
    %78 = vector.shape_cast %77 : vector<1x16xf32> to vector<1x16xf32>
    %79 = vector.broadcast %78 : vector<1x16xf32> to vector<64x16xf32>
    %80 = tpu.concatenate %10, %38, %66, %79 in 1 : vector<64x16xf32>, vector<64x16xf32>, vector<64x16xf32>, vector<64x16xf32> -> vector<64x64xf32>
    %81 = arith.truncf %80 : vector<64x64xf32> to vector<64x64xbf16>
    %c0_96 = arith.constant 0 : index
    %c0_97 = arith.constant 0 : index
    %82 = vector.load %arg11[%c0_96, %c0_97] : memref<64x16xbf16, #tpu.memory_space<vmem>>, vector<64x16xbf16>
    %cst_98 = arith.constant dense<0.000000e+00> : vector<64x16xf32>
    %83 = tpu.matmul %81, %82, %cst_98 {dimension_numbers = #tpu.dot_dimension_numbers<[1], [0], [0], [1], [0, 0, 1, 1], [], []>} : vector<64x64xbf16>, vector<64x16xbf16>, vector<64x16xf32> -> vector<64x16xf32>
    %c0_99 = arith.constant 0 : index
    %c0_100 = arith.constant 0 : index
    %84 = vector.load %arg12[%c0_99, %c0_100] : memref<1x16xf32, #tpu.memory_space<vmem>>, vector<1x16xf32>
    %85 = vector.broadcast %84 : vector<1x16xf32> to vector<64x16xf32>
    %86 = arith.addf %83, %85 : vector<64x16xf32>
    %cst_101 = arith.constant 0.000000e+00 : f32
    %87 = vector.broadcast %cst_101 : f32 to vector<64x16xf32>
    %88 = arith.maximumf %86, %87 : vector<64x16xf32>
    %c0_102 = arith.constant 0 : index
    %c0_103 = arith.constant 0 : index
    %c0_104 = arith.constant 0 : index
    %c0_105 = arith.constant 0 : index
    %89 = vector.load %arg2[%c0_102, %c0_103, %c0_104, %c0_105] : memref<1x16x16x8xf32, #tpu.memory_space<vmem>>, vector<1x16x16x8xf32>
    %90 = vector.shape_cast %89 : vector<1x16x16x8xf32> to vector<16x16x8xf32>
    %91 = vector.shape_cast %90 : vector<16x16x8xf32> to vector<256x8xf32>
    %92 = arith.truncf %91 : vector<256x8xf32> to vector<256x8xbf16>
    %c0_106 = arith.constant 0 : index
    %c0_107 = arith.constant 0 : index
    %93 = vector.load %arg13[%c0_106, %c0_107] : memref<8x8xbf16, #tpu.memory_space<vmem>>, vector<8x8xbf16>
    %cst_108 = arith.constant dense<0.000000e+00> : vector<256x8xf32>
    %94 = tpu.matmul %92, %93, %cst_108 {dimension_numbers = #tpu.dot_dimension_numbers<[1], [0], [0], [1], [0, 0, 1, 1], [], []>} : vector<256x8xbf16>, vector<8x8xbf16>, vector<256x8xf32> -> vector<256x8xf32>
    %c0_109 = arith.constant 0 : index
    %c0_110 = arith.constant 0 : index
    %95 = vector.load %arg14[%c0_109, %c0_110] : memref<1x8xf32, #tpu.memory_space<vmem>>, vector<1x8xf32>
    %96 = vector.broadcast %95 : vector<1x8xf32> to vector<256x8xf32>
    %97 = arith.addf %94, %96 : vector<256x8xf32>
    %cst_111 = arith.constant 0.000000e+00 : f32
    %98 = vector.broadcast %cst_111 : f32 to vector<256x8xf32>
    %99 = arith.maximumf %97, %98 : vector<256x8xf32>
    %100 = vector.shape_cast %88 : vector<64x16xf32> to vector<8x8x16xf32>
    %101 = vector.shape_cast %100 : vector<8x8x16xf32> to vector<8x1x8x16xf32>
    %102 = vector.shape_cast %101 : vector<8x1x8x16xf32> to vector<8x1x8x16xf32>
    %103 = vector.broadcast %102 : vector<8x1x8x16xf32> to vector<8x2x8x16xf32>
    %104 = vector.shape_cast %103 : vector<8x2x8x16xf32> to vector<16x8x16xf32>
    %105 = vector.shape_cast %104 : vector<16x8x16xf32> to vector<16x8x1x16xf32>
    %106 = vector.shape_cast %105 : vector<16x8x1x16xf32> to vector<16x8x1x16xf32>
    %107 = vector.broadcast %106 : vector<16x8x1x16xf32> to vector<16x8x2x16xf32>
    %108 = vector.shape_cast %107 : vector<16x8x2x16xf32> to vector<16x16x16xf32>
    %cst_112 = arith.constant 0.000000e+00 : bf16
    %109 = vector.broadcast %cst_112 : bf16 to vector<1x18x24xbf16>
    %cst_113 = arith.constant 0.000000e+00 : bf16
    %110 = vector.broadcast %cst_113 : bf16 to vector<18x1x24xbf16>
    %c0_114 = arith.constant 0 : index
    %c0_115 = arith.constant 0 : index
    %c0_116 = arith.constant 0 : index
    %111 = vector.load %arg20[%c0_114, %c0_115, %c0_116] : memref<18x18x24xbf16, #tpu.memory_space<vmem>>, vector<1x18x24xbf16>
    tpu.vector_store %arg20[%c0_114, %c0_115, %c0_116], %109 {strides = array<i32>} : memref<18x18x24xbf16, #tpu.memory_space<vmem>>, vector<1x18x24xbf16>,
    %c17 = arith.constant 17 : index
    %c0_117 = arith.constant 0 : index
    %c0_118 = arith.constant 0 : index
    %112 = vector.load %arg20[%c17, %c0_117, %c0_118] : memref<18x18x24xbf16, #tpu.memory_space<vmem>>, vector<1x18x24xbf16>
    tpu.vector_store %arg20[%c17, %c0_117, %c0_118], %109 {strides = array<i32>} : memref<18x18x24xbf16, #tpu.memory_space<vmem>>, vector<1x18x24xbf16>,
    %c0_119 = arith.constant 0 : index
    %c0_120 = arith.constant 0 : index
    %c0_121 = arith.constant 0 : index
    %113 = vector.load %arg20[%c0_119, %c0_120, %c0_121] : memref<18x18x24xbf16, #tpu.memory_space<vmem>>, vector<18x1x24xbf16>
    tpu.vector_store %arg20[%c0_119, %c0_120, %c0_121], %110 {strides = array<i32>} : memref<18x18x24xbf16, #tpu.memory_space<vmem>>, vector<18x1x24xbf16>,
    %c0_122 = arith.constant 0 : index
    %c17_123 = arith.constant 17 : index
    %c0_124 = arith.constant 0 : index
    %114 = vector.load %arg20[%c0_122, %c17_123, %c0_124] : memref<18x18x24xbf16, #tpu.memory_space<vmem>>, vector<18x1x24xbf16>
    tpu.vector_store %arg20[%c0_122, %c17_123, %c0_124], %110 {strides = array<i32>} : memref<18x18x24xbf16, #tpu.memory_space<vmem>>, vector<18x1x24xbf16>,
    %115 = vector.shape_cast %99 : vector<256x8xf32> to vector<16x16x8xf32>
    %116 = tpu.concatenate %115, %108 in 2 : vector<16x16x8xf32>, vector<16x16x16xf32> -> vector<16x16x24xf32>
    %117 = arith.truncf %116 : vector<16x16x24xf32> to vector<16x16x24xbf16>
    %c1 = arith.constant 1 : index
    %c1_125 = arith.constant 1 : index
    %c0_126 = arith.constant 0 : index
    %118 = vector.load %arg20[%c1, %c1_125, %c0_126] : memref<18x18x24xbf16, #tpu.memory_space<vmem>>, vector<16x16x24xbf16>
    tpu.vector_store %arg20[%c1, %c1_125, %c0_126], %117 {strides = array<i32>} : memref<18x18x24xbf16, #tpu.memory_space<vmem>>, vector<16x16x24xbf16>,
    %c0_127 = arith.constant 0 : index
    %c0_128 = arith.constant 0 : index
    %c0_129 = arith.constant 0 : index
    %119 = vector.load %arg20[%c0_127, %c0_128, %c0_129] : memref<18x18x24xbf16, #tpu.memory_space<vmem>>, vector<16x16x24xbf16>
    %c0_130 = arith.constant 0 : index
    %c1_131 = arith.constant 1 : index
    %c0_132 = arith.constant 0 : index
    %120 = vector.load %arg20[%c0_130, %c1_131, %c0_132] : memref<18x18x24xbf16, #tpu.memory_space<vmem>>, vector<16x16x24xbf16>
    %c0_133 = arith.constant 0 : index
    %c2_134 = arith.constant 2 : index
    %c0_135 = arith.constant 0 : index
    %121 = vector.load %arg20[%c0_133, %c2_134, %c0_135] : memref<18x18x24xbf16, #tpu.memory_space<vmem>>, vector<16x16x24xbf16>
    %c1_136 = arith.constant 1 : index
    %c0_137 = arith.constant 0 : index
    %c0_138 = arith.constant 0 : index
    %122 = vector.load %arg20[%c1_136, %c0_137, %c0_138] : memref<18x18x24xbf16, #tpu.memory_space<vmem>>, vector<16x16x24xbf16>
    %c1_139 = arith.constant 1 : index
    %c1_140 = arith.constant 1 : index
    %c0_141 = arith.constant 0 : index
    %123 = vector.load %arg20[%c1_139, %c1_140, %c0_141] : memref<18x18x24xbf16, #tpu.memory_space<vmem>>, vector<16x16x24xbf16>
    %c1_142 = arith.constant 1 : index
    %c2_143 = arith.constant 2 : index
    %c0_144 = arith.constant 0 : index
    %124 = vector.load %arg20[%c1_142, %c2_143, %c0_144] : memref<18x18x24xbf16, #tpu.memory_space<vmem>>, vector<16x16x24xbf16>
    %c2_145 = arith.constant 2 : index
    %c0_146 = arith.constant 0 : index
    %c0_147 = arith.constant 0 : index
    %125 = vector.load %arg20[%c2_145, %c0_146, %c0_147] : memref<18x18x24xbf16, #tpu.memory_space<vmem>>, vector<16x16x24xbf16>
    %c2_148 = arith.constant 2 : index
    %c1_149 = arith.constant 1 : index
    %c0_150 = arith.constant 0 : index
    %126 = vector.load %arg20[%c2_148, %c1_149, %c0_150] : memref<18x18x24xbf16, #tpu.memory_space<vmem>>, vector<16x16x24xbf16>
    %c2_151 = arith.constant 2 : index
    %c2_152 = arith.constant 2 : index
    %c0_153 = arith.constant 0 : index
    %127 = vector.load %arg20[%c2_151, %c2_152, %c0_153] : memref<18x18x24xbf16, #tpu.memory_space<vmem>>, vector<16x16x24xbf16>
    %128 = tpu.concatenate %119, %120, %121, %122, %123, %124, %125, %126, %127 in 2 : vector<16x16x24xbf16>, vector<16x16x24xbf16>, vector<16x16x24xbf16>, vector<16x16x24xbf16>, vector<16x16x24xbf16>, vector<16x16x24xbf16>, vector<16x16x24xbf16>, vector<16x16x24xbf16>, vector<16x16x24xbf16> -> vector<16x16x216xbf16>
    %129 = vector.shape_cast %128 : vector<16x16x216xbf16> to vector<256x216xbf16>
    %c0_154 = arith.constant 0 : index
    %c0_155 = arith.constant 0 : index
    %130 = vector.load %arg15[%c0_154, %c0_155] : memref<216x16xbf16, #tpu.memory_space<vmem>>, vector<216x16xbf16>
    %cst_156 = arith.constant dense<0.000000e+00> : vector<256x16xf32>
    %131 = tpu.matmul %129, %130, %cst_156 {dimension_numbers = #tpu.dot_dimension_numbers<[1], [0], [0], [1], [0, 0, 1, 1], [], []>} : vector<256x216xbf16>, vector<216x16xbf16>, vector<256x16xf32> -> vector<256x16xf32>
    %c0_157 = arith.constant 0 : index
    %c0_158 = arith.constant 0 : index
    %132 = vector.load %arg16[%c0_157, %c0_158] : memref<1x16xf32, #tpu.memory_space<vmem>>, vector<1x16xf32>
    %133 = vector.broadcast %132 : vector<1x16xf32> to vector<256x16xf32>
    %134 = arith.addf %131, %133 : vector<256x16xf32>
    %cst_159 = arith.constant 0.000000e+00 : f32
    %135 = vector.broadcast %cst_159 : f32 to vector<256x16xf32>
    %136 = arith.maximumf %134, %135 : vector<256x16xf32>
    %c0_160 = arith.constant 0 : index
    %c0_161 = arith.constant 0 : index
    %137 = vector.load %arg17[%c0_160, %c0_161] : memref<4x16xbf16, #tpu.memory_space<vmem>>, vector<4x16xbf16>
    %138 = arith.truncf %136 : vector<256x16xf32> to vector<256x16xbf16>
    %139 = tpu.transpose %138, [1, 0] : vector<256x16xbf16> -> vector<16x256xbf16>
    %cst_162 = arith.constant dense<0.000000e+00> : vector<4x256xf32>
    %140 = tpu.matmul %137, %139, %cst_162 {dimension_numbers = #tpu.dot_dimension_numbers<[1], [0], [0], [1], [0, 0, 1, 1], [], []>} : vector<4x16xbf16>, vector<16x256xbf16>, vector<4x256xf32> -> vector<4x256xf32>
    %c0_163 = arith.constant 0 : index
    %c0_164 = arith.constant 0 : index
    %141 = vector.load %arg18[%c0_163, %c0_164] : memref<4x1xf32, #tpu.memory_space<vmem>>, vector<4x1xf32>
    %142 = vector.broadcast %141 : vector<4x1xf32> to vector<4x256xf32>
    %143 = arith.addf %140, %142 : vector<4x256xf32>
    %c0_165 = arith.constant 0 : index
    %c0_166 = arith.constant 0 : index
    %c0_167 = arith.constant 0 : index
    %144 = vector.load %arg19[%c0_165, %c0_166, %c0_167] : memref<1x4x256xf32, #tpu.memory_space<vmem>>, vector<1x4x256xf32>
    %145 = vector.shape_cast %144 : vector<1x4x256xf32> to vector<4x256xf32>
    %146 = vector.shape_cast %143 : vector<4x256xf32> to vector<1x4x256xf32>
    tpu.vector_store %arg19[%c0_165, %c0_166, %c0_167], %146 {strides = array<i32>} : memref<1x4x256xf32, #tpu.memory_space<vmem>>, vector<1x4x256xf32>,
    return
  }
  func.func @transform_0(%arg0: i32) -> (i32, i32, i32, i32) {
    %c0_i32 = arith.constant 0 : i32
    %c0_i32_0 = arith.constant 0 : i32
    %c0_i32_1 = arith.constant 0 : i32
    %c0_i32_2 = arith.constant 0 : i32
    return %arg0, %c0_i32, %c0_i32_0, %c0_i32_1 : i32, i32, i32, i32
  }
  func.func @transform_1(%arg0: i32) -> (i32, i32, i32, i32) {
    %c0_i32 = arith.constant 0 : i32
    %c0_i32_0 = arith.constant 0 : i32
    %c0_i32_1 = arith.constant 0 : i32
    %c0_i32_2 = arith.constant 0 : i32
    return %arg0, %c0_i32, %c0_i32_0, %c0_i32_1 : i32, i32, i32, i32
  }
  func.func @transform_2(%arg0: i32) -> (i32, i32) {
    %c0_i32 = arith.constant 0 : i32
    %c0_i32_0 = arith.constant 0 : i32
    %c0_i32_1 = arith.constant 0 : i32
    return %c0_i32, %c0_i32_0 : i32, i32
  }
  func.func @transform_3(%arg0: i32) -> (i32, i32) {
    %c0_i32 = arith.constant 0 : i32
    %c0_i32_0 = arith.constant 0 : i32
    %c0_i32_1 = arith.constant 0 : i32
    return %c0_i32, %c0_i32_0 : i32, i32
  }
  func.func @transform_4(%arg0: i32) -> (i32, i32) {
    %c0_i32 = arith.constant 0 : i32
    %c0_i32_0 = arith.constant 0 : i32
    %c0_i32_1 = arith.constant 0 : i32
    return %c0_i32, %c0_i32_0 : i32, i32
  }
  func.func @transform_5(%arg0: i32) -> (i32, i32) {
    %c0_i32 = arith.constant 0 : i32
    %c0_i32_0 = arith.constant 0 : i32
    %c0_i32_1 = arith.constant 0 : i32
    return %c0_i32, %c0_i32_0 : i32, i32
  }
  func.func @transform_6(%arg0: i32) -> (i32, i32) {
    %c0_i32 = arith.constant 0 : i32
    %c0_i32_0 = arith.constant 0 : i32
    %c0_i32_1 = arith.constant 0 : i32
    return %c0_i32, %c0_i32_0 : i32, i32
  }
  func.func @transform_7(%arg0: i32) -> (i32, i32) {
    %c0_i32 = arith.constant 0 : i32
    %c0_i32_0 = arith.constant 0 : i32
    %c0_i32_1 = arith.constant 0 : i32
    return %c0_i32, %c0_i32_0 : i32, i32
  }
  func.func @transform_8(%arg0: i32) -> (i32, i32) {
    %c0_i32 = arith.constant 0 : i32
    %c0_i32_0 = arith.constant 0 : i32
    %c0_i32_1 = arith.constant 0 : i32
    return %c0_i32, %c0_i32_0 : i32, i32
  }
  func.func @transform_9(%arg0: i32) -> (i32, i32) {
    %c0_i32 = arith.constant 0 : i32
    %c0_i32_0 = arith.constant 0 : i32
    %c0_i32_1 = arith.constant 0 : i32
    return %c0_i32, %c0_i32_0 : i32, i32
  }
  func.func @transform_10(%arg0: i32) -> (i32, i32) {
    %c0_i32 = arith.constant 0 : i32
    %c0_i32_0 = arith.constant 0 : i32
    %c0_i32_1 = arith.constant 0 : i32
    return %c0_i32, %c0_i32_0 : i32, i32
  }
  func.func @transform_11(%arg0: i32) -> (i32, i32) {
    %c0_i32 = arith.constant 0 : i32
    %c0_i32_0 = arith.constant 0 : i32
    %c0_i32_1 = arith.constant 0 : i32
    return %c0_i32, %c0_i32_0 : i32, i32
  }
  func.func @transform_12(%arg0: i32) -> (i32, i32) {
    %c0_i32 = arith.constant 0 : i32
    %c0_i32_0 = arith.constant 0 : i32
    %c0_i32_1 = arith.constant 0 : i32
    return %c0_i32, %c0_i32_0 : i32, i32
  }
  func.func @transform_13(%arg0: i32) -> (i32, i32) {
    %c0_i32 = arith.constant 0 : i32
    %c0_i32_0 = arith.constant 0 : i32
    %c0_i32_1 = arith.constant 0 : i32
    return %c0_i32, %c0_i32_0 : i32, i32
  }
  func.func @transform_14(%arg0: i32) -> (i32, i32) {
    %c0_i32 = arith.constant 0 : i32
    %c0_i32_0 = arith.constant 0 : i32
    %c0_i32_1 = arith.constant 0 : i32
    return %c0_i32, %c0_i32_0 : i32, i32
  }
  func.func @transform_15(%arg0: i32) -> (i32, i32) {
    %c0_i32 = arith.constant 0 : i32
    %c0_i32_0 = arith.constant 0 : i32
    %c0_i32_1 = arith.constant 0 : i32
    return %c0_i32, %c0_i32_0 : i32, i32
  }
  func.func @transform_16(%arg0: i32) -> (i32, i32) {
    %c0_i32 = arith.constant 0 : i32
    %c0_i32_0 = arith.constant 0 : i32
    %c0_i32_1 = arith.constant 0 : i32
    return %c0_i32, %c0_i32_0 : i32, i32
  }
  func.func @transform_17(%arg0: i32) -> (i32, i32) {
    %c0_i32 = arith.constant 0 : i32
    %c0_i32_0 = arith.constant 0 : i32
    %c0_i32_1 = arith.constant 0 : i32
    return %c0_i32, %c0_i32_0 : i32, i32
  }
  func.func @transform_18(%arg0: i32) -> (i32, i32, i32) {
    %c0_i32 = arith.constant 0 : i32
    %c0_i32_0 = arith.constant 0 : i32
    %c0_i32_1 = arith.constant 0 : i32
    return %arg0, %c0_i32, %c0_i32_0 : i32, i32, i32
  }
}

</mosaic_0001>

<bundles_post_ra>
// kernel: classifier_forward.1
= control target key start
LH: loop header
LB: loop body
LE: loop exit
PB: predicated region body
PF: predicated region fallthrough
CT: control target
= control target key end

     0   :  { %s6813_s27 = smov 0   ;;  %s9347_s0 = inlined_call_operand.vmem [shape: f32[2,16,16,16], index: 0, kind: input, shape index: {}]   ;;  %s9348_s1 = inlined_call_operand.vmem [shape: f32[2,16,16,8], index: 1, kind: input, shape index: {}]   ;;  %s9349_s2 = inlined_call_operand.vmem [shape: bf16[16,16], index: 2, kind: input, shape index: {}]   ;;  %s9350_s3 = inlined_call_operand.vmem [shape: f32[1,16], index: 3, kind: input, shape index: {}]   ;;  %s9351_s4 = inlined_call_operand.vmem [shape: bf16[144,16], index: 4, kind: input, shape index: {}]   ;;  %s9352_s5 = inlined_call_operand.vmem [shape: f32[1,16], index: 5, kind: input, shape index: {}]   ;;  %s9353_s6 = inlined_call_operand.vmem [shape: bf16[144,16], index: 6, kind: input, shape index: {}]   ;;  %s9354_s7 = inlined_call_operand.vmem [shape: f32[1,16], index: 7, kind: input, shape index: {}]   ;;  %s9355_s8 = inlined_call_operand.vmem [shape: bf16[16,16], index: 8, kind: input, shape index: {}]   ;;  %s9356_s9 = inlined_call_operand.vmem [shape: f32[1,16], index: 9, kind: input, shape index: {}]   ;;  %s9357_s10 = inlined_call_operand.vmem [shape: bf16[64,16], index: 10, kind: input, shape index: {}]   ;;  %s9358_s11 = inlined_call_operand.vmem [shape: f32[1,16], index: 11, kind: input, shape index: {}]   ;;  %s9359_s12 = inlined_call_operand.vmem [shape: bf16[8,8], index: 12, kind: input, shape index: {}]   ;;  %s9360_s13 = inlined_call_operand.vmem [shape: f32[1,8], index: 13, kind: input, shape index: {}]   ;;  %s9361_s14 = inlined_call_operand.vmem [shape: bf16[216,16], index: 14, kind: input, shape index: {}]   ;;  %s9362_s15 = inlined_call_operand.vmem [shape: f32[1,16], index: 15, kind: input, shape index: {}]   ;;  %s9363_s16 = inlined_call_operand.vmem [shape: bf16[4,16], index: 16, kind: input, shape index: {}]   ;;  %s9364_s17 = inlined_call_operand.vmem [shape: f32[4,1], index: 17, kind: input, shape index: {}]   ;;  %s9365_s18 = inlined_call_operand.vmem [shape: f32[2,4,256], index: 18, kind: output, shape index: {}]  }
   0x1   :  { %9368 = sst [smem:[#allocation3_spill]] %s9347_s0 }
   0x2   :  { %9369 = sst [smem:[#allocation4_spill]] %s9348_s1 }
   0x3   :  { %9370 = sst [smem:[#allocation5_spill]] %s9349_s2 }
   0x4 LB: > { %s5646_s28 = sadd.s32 4294967295, %s6702_s27   ;;  %p5650_p0 = scmp.ge.s32.totalorder %s6702_s27, 1  ;;  %s6702_s27 = sphi %s6813_s27, %s28_s27  }
   0x5   : > { %p522_p1 = scmp.lt.s32.totalorder %s6702_s27, 3 }
   0x7   : > { %p523_p2 = pnand %p5650_p0, %p522_p1 }
   0x8   : > { %p581_p3 = scmp.lt.s32.totalorder (!%p523_p2), %s5646_s28, 1  ;;  %s9371_s19 = sld [smem:[#allocation3_spill]] (!%p523_p2) }
   0x9   : > { %526 = sbr.rel (%p523_p2) target bundleno = 1654 (0x676), region = 92  ;;  %s6704_s20 = smov (!%p523_p2), 16  }
   0xa   : > { %s6705_s21 = smov (!%p523_p2), 48   ;;  %s6706_s22 = smov (!%p523_p2), 80  }
   0xb   : > { %s6707_s2 = smov (!%p523_p2), 32   ;;  %s6708_s23 = smov (!%p523_p2), 64  }
   0xc   : > { %s6709_s24 = smov (!%p523_p2), 96   ;;  %s6710_s25 = smov (!%p523_p2), 112  }
   0xd   : > { %s9372_s0 = sld [smem:[#allocation5_spill]] (!%p523_p2) }
   0xe   : > { %s9399_s28 = smov (!%p581_p3, %s5646_s28), 1  ;;  %vm622_vm0 = vcmask 130048   ;;  %v5981_v49 = vld [vmem:[%s9351_s4 + $0x38] sm:$0xff]  ;;  %v5980_v59 = vld [vmem:[%s9351_s4 + $0x30] sm:$0xff]  ;;  %vm970_vm1 = vcmask 261120   ;;  %vm979_vm2 = vcmask 392192  }
   0xf   : > { %s5970_s29 = sshll.u32 %s9399_s28, 8  ;;  %1120 = vmatpush.bf16.msra.mxu1 %v5981_v49  ;;  %vm988_vm3 = vcmask 523264   ;;  %vm997_vm4 = vcmask 654336   ;;  %vm1006_vm5 = vcmask 785408   ;;  %vm1015_vm6 = vcmask 916480  }
  0x10   : > { %s6829_s1 = scalar_lea.vmem %s9371_s19, %s5970_s29  ;;  %vm2001_vm8 = vcmask 1043456   ;;  %vm1952_vm9 = vcmask 64512   ;;  %vm2257_vm10 = vcmask 188416   ;;  %vm2254_vm11 = vcmask 191488   ;;  %s6713_s19 = smov 24  }
  0x11   : > { %v6832_v0 = vld [vmem:[%s6829_s1 + $0x84] sm:$0xff]  ;;  %v6835_v1 = vld [vmem:[%s6829_s1 + $0x94] sm:$0xff]  ;;  %vm2320_vm12 = vsmask.f32 7938  ;;  %vm2264_vm14 = vsmask.f32 256 }
  0x12   : > { %v5703_v2 = vld [vmem:[%s6829_s1 + $0xa2] sm:$0xff]  ;;  %v6840_v3 = vpack.i.bf16 %v6835_v1, %v6832_v0  ;;  %v5704_v4 = vld [vmem:[%s6829_s1 + $0xb2] sm:$0xff]  ;;  %vm7559_vm13 = vmand %vm2257_vm10, %vm2320_vm12 }
  0x13   : > { %v6843_v5 = vpack.i.bf16 %v5704_v4, %v5703_v2  ;;  %v6848_v6 = vld [vmem:[%s6829_s1 + $0x86] sm:$0xff]  ;;  %v6851_v7 = vld [vmem:[%s6829_s1 + $0x96] sm:$0xff]  ;;  %1121 = vmatpush.bf16.msra.mxu1 %v5980_v59  ;;  %vm7567_vm15 = vmand %vm2257_vm10, %vm2264_vm14 }
  0x14   : > { %6239 = vrot.lane.b32.xlu0 %v6840_v3, %s6704_s20  ;;  %v6856_v8 = vld [vmem:[%s6829_s1 + $0xa4] sm:$0xff]  ;;  %v6859_v9 = vld [vmem:[%s6829_s1 + $0xb4] sm:$0xff]  ;;  %v6875_v17 = vpack.i.bf16 %v6851_v7, %v6848_v6 }
  0x15   : > { %6249 = vrot.lane.b32.xlu1 %v6843_v5, %s6705_s21  ;;  %v5657_v10 = vld [vmem:[%s6829_s1 + $0x44] sm:$0xff]  ;;  %v5658_v11 = vld [vmem:[%s6829_s1 + $0x54] sm:$0xff]  ;;  %v6881_v19 = vpack.i.bf16 %v6859_v9, %v6856_v8 }
  0x16   : > { %v1661_v12 = vsel %vm622_vm0, %v5657_v10, 0.0  ;;  %v6865_v13 = vld [vmem:[%s6829_s1 + $0xa6] sm:$0xff]  ;;  %v6868_v14 = vld [vmem:[%s6829_s1 + $0xb6] sm:$0xff]  ;;  %v1662_v15 = vsel %vm622_vm0, %v5658_v11, 0.0  ;;  %v6910_v35 = vpack.i.bf16 %v5658_v11, %v5657_v10  ;;  %v606_v45 = vpack.c.bf16 %v5658_v11, %v5657_v10 }
  0x17   : > { %v6258_v16 = vpack.i.bf16 %v6868_v14, %v6865_v13  ;;  %v6877_v18 = vadd.f32 %v1662_v15, %v1661_v12  ;;  %v5719_v20 = vld [vmem:[%s6829_s1 + $0xc2] sm:$0xff]  ;;  %v5720_v21 = vld [vmem:[%s6829_s1 + $0xd2] sm:$0xff] }
  0x18   : > { %v5727_v22 = vld [vmem:[%s6829_s1 + $0xc4] sm:$0xff]  ;;  %v5728_v23 = vld [vmem:[%s6829_s1 + $0xd4] sm:$0xff]  ;;  %v6263_v24 = vpack.i.bf16 %v5720_v21, %v5719_v20 }
  0x19   : > { %6259 = vrot.lane.b32.xlu2 %v6258_v16, %s6706_s22  ;;  %v1194_v25 = vld [vmem:[%s6829_s1 + $0x4] sm:$0xff]  ;;  %v1195_v26 = vld [vmem:[%s6829_s1 + $0x14] sm:$0xff]  ;;  %v6894_v27 = vpack.i.bf16 %v5728_v23, %v5727_v22 }
  0x1a   : > { %v6273_v28 = vpack.i.bf16 %v1195_v26, %v1194_v25  ;;  %v1202_v29 = vld [vmem:[%s6829_s1 + $0x8] sm:$0xff]  ;;  %v1203_v30 = vld [vmem:[%s6829_s1 + $0x18] sm:$0xff]  ;;  %v6903_v31 = vld [vmem:[%s6829_s1 + $0x40] sm:$0xff] }
  0x1b   : > { %v6906_v32 = vld [vmem:[%s6829_s1 + $0x50] sm:$0xff]  ;;  %v6278_v33 = vpack.i.bf16 %v1203_v30, %v1202_v29  ;;  %v5785_v36 = vld [vmem:[%s6829_s1 + $0x48] sm:$0xff]  ;;  %v5786_v37 = vld [vmem:[%s6829_s1 + $0x58] sm:$0xff] }
  0x1c   : > { %6244 = vrot.lane.b32.xlu0 %v6875_v17, %s6707_s2  ;;  %v6283_v34 = vpack.i.bf16 %v6906_v32, %v6903_v31  ;;  %v5793_v38 = vld [vmem:[%s6829_s1 + $0x80] sm:$0xff]  ;;  %v5794_v39 = vld [vmem:[%s6829_s1 + $0x90] sm:$0xff]  ;;  %v6920_v40 = vpack.i.bf16 %v5786_v37, %v5785_v36  ;;  %v1204_v11 = vld [vmem:[%s6829_s1 + $0x28] sm:$0xff]  ;;  %v1668_v36 = vsel %vm622_vm0, %v6832_v0, 0.0 }
  0x1d   : > { %6254 = vrot.lane.b32.xlu1 %v6881_v19, %s6708_s23  ;;  %v5973_v41 = vld [vmem:[%s9372_s0] sm:$0xff]  ;;  %v6925_v42 = vpack.i.bf16 %v5794_v39, %v5793_v38  ;;  %v5682_v44 = vld [vmem:[%s6829_s1 + $0x34] sm:$0xff]  ;;  %v5979_v16 = vld [vmem:[%s9351_s4 + $0x28] sm:$0xff] }
  0x1e   : > { %642 = vmatpush.bf16.msra.mxu2 %v5973_v41  ;;  %v5681_v43 = vld [vmem:[%s6829_s1 + $0x24] sm:$0xff]  ;;  %v5690_v47 = vld [vmem:[%s6829_s1 + $0x36] sm:$0xff]  ;;  %1122 = vmatpush.bf16.msra.mxu1 %v5979_v16 }
  0x1f   : > { %v5689_v46 = vld [vmem:[%s6829_s1 + $0x26] sm:$0xff]  ;;  %v6308_v48 = vpack.i.bf16 %v5682_v44, %v5681_v43  ;;  %v6945_v51 = vld [vmem:[%s6829_s1 + $0x52] sm:$0xff] }
  0x20   : > { %v6942_v50 = vld [vmem:[%s6829_s1 + $0x42] sm:$0xff]  ;;  %v6313_v52 = vpack.i.bf16 %v5690_v47, %v5689_v46  ;;  %v5706_v55 = vld [vmem:[%s6829_s1 + $0x56] sm:$0xff] }
  0x21   : > { %6264 = vrot.lane.b32.xlu2 %v6263_v24, %s6709_s24  ;;  %5669 = vmatmul.msk.bf16.vlgmr.msra.gmra.mxu2 %vm622_vm0, %v606_v45  ;;  %v6318_v53 = vpack.i.bf16 %v6945_v51, %v6942_v50  ;;  %v5705_v54 = vld [vmem:[%s6829_s1 + $0x46] sm:$0xff]  ;;  %v6958_v57 = vld [vmem:[%s6829_s1 + $0x72] sm:$0xff] }
  0x22   : > { %6200 = vmatpush.bf16.msrb.mxu2 %v5981_v49  ;;  %v6955_v56 = vld [vmem:[%s6829_s1 + $0x62] sm:$0xff]  ;;  %v6323_v58 = vpack.i.bf16 %v5706_v55, %v5705_v54  ;;  %v5722_v61 = vld [vmem:[%s6829_s1 + $0x74] sm:$0xff] }
  0x23   : > { %v5721_v60 = vld [vmem:[%s6829_s1 + $0x64] sm:$0xff]  ;;  %v6328_v62 = vpack.i.bf16 %v6958_v57, %v6955_v56  ;;  %v1666_v10 = vsel %vm622_vm0, %v5722_v61, 0.0  ;;  %v1205_v12 = vld [vmem:[%s6829_s1 + $0x38] sm:$0xff]  ;;  %v5780_v21 = vld [vmem:[%s6829_s1 + $0x70] sm:$0xff] }
  0x24   : > { %6269 = vrot.lane.b32.xlu0 %v6894_v27, %s6710_s25  ;;  %v6967_v63 = vpack.i.bf16 %v5722_v61, %v5721_v60  ;;  %v607_v2 = vpack.c.bf16 %v5722_v61, %v5721_v60  ;;  %v1664_v4 = vsel %vm622_vm0, %v5721_v60, 0.0  ;;  %v5779_v20 = vld [vmem:[%s6829_s1 + $0x60] sm:$0xff]  ;;  %v6343_v23 = vpack.i.bf16 %v1205_v12, %v1204_v11  ;;  %v5788_v25 = vld [vmem:[%s6829_s1 + $0x78] sm:$0xff]  ;;  %v5796_v30 = vld [vmem:[%s6829_s1 + $0xb0] sm:$0xff] }
  0x25   : > { %6274 = vrot.lane.b32.xlu1 %v6273_v28, %s6704_s20  ;;  %v1665_v15 = vadd.f32 %v1664_v4, %v6877_v18  ;;  %v6348_v24 = vpack.i.bf16 %v5780_v21, %v5779_v20  ;;  %v5787_v18 = vld [vmem:[%s6829_s1 + $0x68] sm:$0xff]  ;;  %v5978_v26 = vld [vmem:[%s9351_s4 + $0x20] sm:$0xff]  ;;  %v5977_v39 = vld [vmem:[%s9351_s4 + $0x18] sm:$0xff] }
  0x26   : > { %6201 = vmatpush.bf16.msrb.mxu2 %v5980_v59  ;;  %1123 = vmatpush.bf16.msra.mxu1 %v5978_v26  ;;  %v6992_v28 = vpack.i.bf16 %v5788_v25, %v5787_v18  ;;  %v5795_v29 = vld [vmem:[%s6829_s1 + $0xa0] sm:$0xff]  ;;  %v5976_v43 = vld [vmem:[%s9351_s4 + $0x10] sm:$0xff]  ;;  %v5975_v49 = vld [vmem:[%s9351_s4 + $0x8] sm:$0xff] }
  0x27   : > { %v1667_v22 = vadd.f32 %v1666_v10, %v1665_v15  ;;  %v7009_v37 = vpack.i.bf16 %v5796_v30, %v5795_v29  ;;  %v5715_v44 = vld [vmem:[%s6829_s1 + $0x82] sm:$0xff]  ;;  %v5716_v45 = vld [vmem:[%s6829_s1 + $0x92] sm:$0xff] }
  0x28   : > { %v6393_v47 = vpack.i.bf16 %v5716_v45, %v5715_v44  ;;  %v5982_v60 = vld [vmem:[%s9351_s4 + $0x40] sm:$0xff]  ;;  %v7097_v11 = vld [vmem:[%s6829_s1 + $0xa8] sm:$0xff] }
  0x29   : > { %6279 = vrot.lane.b32.xlu2 %v6278_v33, %s6707_s2  ;;  %v608_v33 = vpack.c.bf16 %v6835_v1, %v6832_v0  ;;  %v1669_v38 = vadd.f32 %v1668_v36, %v1667_v22  ;;  %v7022_v0 = vld [vmem:[%s6829_s1 + $0x66] sm:$0xff] }
  0x2a   : > { %6202 = vmatpush.bf16.msrb.mxu2 %v5979_v16  ;;  %1124 = vmatpush.bf16.msra.mxu1 %v5977_v39  ;;  %v5799_v30 = vld [vmem:[%s6829_s1 + $0xe0] sm:$0xff] }
  0x2c   : > { %6284 = vrot.lane.b32.xlu0 %v6283_v34, %s6705_s21  ;;  %v1670_v34 = vsel %vm622_vm0, %v6835_v1, 0.0  ;;  %v7025_v1 = vld [vmem:[%s6829_s1 + $0x76] sm:$0xff] }
  0x2d   : > { %6289 = vrot.lane.b32.xlu1 %v6910_v35, %s6708_s23  ;;  %v7014_v41 = vadd.f32 %v1670_v34, %v1669_v38  ;;  %v6388_v46 = vpack.i.bf16 %v7025_v1, %v7022_v0  ;;  %v5989_v34 = vld [vmem:[%s9353_s6 + $0x30] sm:$0xff] }
  0x2e   : > { %6203 = vmatpush.bf16.msrb.mxu2 %v5978_v26  ;;  %1125 = vmatpush.bf16.msra.mxu1 %v5976_v43 }
  0x31   : > { %6294 = vrot.lane.b32.xlu2 %v6920_v40, %s6706_s22  ;;  %5670 = vmatmul.msk.bf16.gmra.mxu2 %vm622_vm0, %v607_v2 }
  0x32   : > { %6204 = vmatpush.bf16.msrb.mxu2 %v5977_v39  ;;  %1126 = vmatpush.bf16.msra.mxu1 %v5975_v49 }
  0x34   : > { %6299 = vrot.lane.b32.xlu0 %v6925_v42, %s6709_s24 }
  0x35   : > { %6304 = vrot.lane.b32.xlu1 %v6840_v3, %s6710_s25 }
  0x36   : > { %6205 = vmatpush.bf16.msrb.mxu2 %v5976_v43 }
  0x39   : > { %6309 = vrot.lane.b32.xlu2 %v6308_v48, %s6704_s20 }
  0x3a   : > { %6206 = vmatpush.bf16.msrb.mxu2 %v5975_v49 }
  0x3c   : > { %6314 = vrot.lane.b32.xlu0 %v6313_v52, %s6707_s2  ;;  %v7050_v52 = vld [vmem:[%s6829_s1 + $0x88] sm:$0xff] }
  0x3d   : > { %6319 = vrot.lane.b32.xlu1 %v6318_v53, %s6705_s21  ;;  %v7053_v53 = vld [vmem:[%s6829_s1 + $0x98] sm:$0xff] }
  0x3e   : > { %v6423_v54 = vpack.i.bf16 %v7053_v53, %v7050_v52 }
  0x41   : > { %6324 = vrot.lane.b32.xlu2 %v6323_v58, %s6706_s22  ;;  %5671 = vmatmul.msk.bf16.gmra.mxu2 %vm622_vm0, %v608_v33  ;;  %v5800_v33 = vld [vmem:[%s6829_s1 + $0xf0] sm:$0xff] }
  0x44   : > { %6329 = vrot.lane.b32.xlu0 %v6328_v62, %s6709_s24 }
  0x45   : > { %6334 = vrot.lane.b32.xlu1 %v6967_v63, %s6710_s25 }
  0x49   : > { %6339 = vrot.lane.b32.xlu2 %v6308_v48, %s6704_s20  ;;  %v609_v48 = vpack.c.bf16 %v6859_v9, %v6856_v8 }
  0x4c   : > { %6344 = vrot.lane.b32.xlu0 %v6343_v23, %s6707_s2 }
  0x4d   : > { %6349 = vrot.lane.b32.xlu1 %v6348_v24, %s6705_s21 }
  0x51   : > { %6354 = vrot.lane.b32.xlu2 %v6967_v63, %s6708_s23  ;;  %5672 = vmatmul.msk.bf16.gmra.mxu2 %vm622_vm0, %v609_v48 }
  0x54   : > { %6359 = vrot.lane.b32.xlu0 %v6992_v28, %s6706_s22 }
  0x55   : > { %6364 = vrot.lane.b32.xlu1 %v6910_v35, %s6704_s20 }
  0x59   : > { %6369 = vrot.lane.b32.xlu2 %v7009_v37, %s6709_s24 }
  0x5c   : > { %6374 = vrot.lane.b32.xlu0 %v6323_v58, %s6707_s2  ;;  %v5974_v58 = vld [vmem:[%s9351_s4] sm:$0xff] }
  0x5d   : > { %6379 = vrot.lane.b32.xlu1 %v6881_v19, %s6710_s25  ;;  %6207 = vmatpush.bf16.msrb.mxu2 %v5974_v58 }
  0x5e   : > { %1127 = vmatpush.bf16.msra.mxu1 %v5974_v58 }
  0x61   : > { %6384 = vrot.lane.b32.xlu2 %v6328_v62, %s6705_s21  ;;  %1156 = vmatpush.bf16.msra.mxu2 %v5982_v60 }
  0x64   : > { %6389 = vrot.lane.b32.xlu0 %v6388_v46, %s6706_s22 }
  0x65   : > { %6394 = vrot.lane.b32.xlu1 %v6393_v47, %s6709_s24 }
  0x69   : > { %6399 = vrot.lane.b32.xlu2 %v6840_v3, %s6710_s25 }
  0x6c   : > { %6404 = vrot.lane.b32.xlu0 %v6910_v35, %s6704_s20  ;;  %v5797_v35 = vld [vmem:[%s6829_s1 + $0xc0] sm:$0xff] }
  0x6d   : > { %6409 = vrot.lane.b32.xlu1 %v6920_v40, %s6707_s2  ;;  %v5798_v40 = vld [vmem:[%s6829_s1 + $0xd0] sm:$0xff] }
  0x6e   : > { %v6433_v59 = vpack.i.bf16 %v5798_v40, %v5797_v35 }
  0x71   : > { %6414 = vrot.lane.b32.xlu2 %v6925_v42, %s6705_s21 }
  0x73   : > { %v7059_v55 = vpop.permute.xlu2 %6259 }
  0x74   : > { %6419 = vrot.lane.b32.xlu0 %v6840_v3, %s6708_s23  ;;  %v6262_v36 = vunpack.i.h.bf16 %v7059_v55  ;;  %v6261_v38 = vunpack.i.l.bf16 %v7059_v55 }
  0x75   : > { %6424 = vrot.lane.b32.xlu1 %v6423_v54, %s6706_s22  ;;  %v6488_v54 = vpack.i.bf16 %v5800_v33, %v5799_v30 }
  0x79   : > { %6429 = vrot.lane.b32.xlu2 %v6967_v63, %s6704_s20 }
  0x7b   : > { %v7071_v42 = vpop.permute.xlu2 %6264 }
  0x7c   : > { %6434 = vrot.lane.b32.xlu0 %v6433_v59, %s6709_s24 }
  0x7d   : > { %6439 = vrot.lane.b32.xlu1 %v6388_v46, %s6707_s2  ;;  %v5807_v46 = vld [vmem:[%s6829_s1 + $0xe4] sm:$0xff] }
  0x81   : > { %6444 = vrot.lane.b32.xlu2 %v6894_v27, %s6710_s25  ;;  %v5990_v27 = vld [vmem:[%s9353_s6 + $0x38] sm:$0xff] }
  0x82   : > { %6208 = vmatpush.bf16.msra.mxu3 %v5990_v27 }
  0x83   : > { %v7080_v3 = vpop.permute.xlu2 %6279 }
  0x84   : > { %6449 = vrot.lane.b32.xlu0 %v6393_v47, %s6705_s21  ;;  %v5808_v47 = vld [vmem:[%s6829_s1 + $0xf4] sm:$0xff] }
  0x85   : > { %6454 = vrot.lane.b32.xlu1 %v6875_v17, %s6706_s22  ;;  %v6493_v59 = vpack.i.bf16 %v5808_v47, %v5807_v46 }
  0x86   : > { %v6240_v61 = vpop.permute.xlu0 %6239  ;;  %6209 = vmatpush.bf16.msra.mxu3 %v5989_v34 }
  0x87   : > { %v6250_v62 = vpop.permute.xlu1 %6249  ;;  %v6242_v4 = vunpack.i.h.bf16 %v6240_v61  ;;  %v6241_v10 = vunpack.i.l.bf16 %v6240_v61 }
  0x88   : > { %v6252_v12 = vunpack.i.h.bf16 %v6250_v62  ;;  %v6251_v15 = vunpack.i.l.bf16 %v6250_v62 }
  0x89   : > { %6459 = vrot.lane.b32.xlu2 %v6843_v5, %s6709_s24  ;;  %v7100_v5 = vld [vmem:[%s6829_s1 + $0xb8] sm:$0xff]  ;;  %v968_v21 = vsel %vm622_vm0, %v5715_v44, %v6241_v10  ;;  %v6267_v44 = vunpack.i.h.bf16 %v7071_v42  ;;  %v5988_v10 = vld [vmem:[%s9353_s6 + $0x28] sm:$0xff] }
  0x8a   : > { %v6483_v25 = vpack.i.bf16 %v7100_v5, %v7097_v11  ;;  %6210 = vmatpush.bf16.msra.mxu3 %v5988_v10 }
  0x8b   : > { %v7087_v2 = vpop.permute.xlu2 %6294 }
  0x8c   : > { %6464 = vrot.lane.b32.xlu0 %v6881_v19, %s6710_s25 }
  0x8d   : > { %6469 = vrot.lane.b32.xlu1 %v6967_v63, %s6704_s20  ;;  %v969_v63 = vsel %vm622_vm0, %v5716_v45, %v6242_v4  ;;  %v6266_v45 = vunpack.i.l.bf16 %v7071_v42 }
  0x8e   : > { %v6245_v17 = vpop.permute.xlu0 %6244 }
  0x8f   : > { %v6247_v19 = vunpack.i.h.bf16 %v6245_v17  ;;  %v6246_v16 = vunpack.i.l.bf16 %v6245_v17  ;;  %v7102_v20 = vpop.permute.xlu1 %6254 }
  0x90   : > { %v6257_v22 = vunpack.i.h.bf16 %v7102_v20  ;;  %v6256_v23 = vunpack.i.l.bf16 %v7102_v20 }
  0x91   : > { %v977_v24 = vsel %vm970_vm1, %v968_v21, %v6246_v16  ;;  %v978_v18 = vsel %vm970_vm1, %v969_v63, %v6247_v19  ;;  %6474 = vrot.lane.b32.xlu2 %v6992_v28, %s6707_s2 }
  0x92   : > { %v986_v26 = vsel %vm979_vm2, %v977_v24, %v6251_v15  ;;  %v987_v29 = vsel %vm979_vm2, %v978_v18, %v6252_v12  ;;  %v5987_v15 = vld [vmem:[%s9353_s6 + $0x20] sm:$0xff] }
  0x93   : > { %v996_v28 = vsel %vm988_vm3, %v987_v29, %v6257_v22  ;;  %v995_v39 = vsel %vm988_vm3, %v986_v26, %v6256_v23  ;;  %v6310_v43 = vpop.permute.xlu2 %6309  ;;  %6211 = vmatpush.bf16.msra.mxu3 %v5987_v15  ;;  %v5673_v18 = vld [vmem:[%s6829_s1 + $0x22] sm:$0xff]  ;;  %v5986_v26 = vld [vmem:[%s9353_s6 + $0x18] sm:$0xff] }
  0x94   : > { %6479 = vrot.lane.b32.xlu0 %v7009_v37, %s6705_s21  ;;  %v1004_v48 = vsel %vm997_vm4, %v995_v39, %v6261_v38  ;;  %v1005_v49 = vsel %vm997_vm4, %v996_v28, %v6262_v36  ;;  %v6312_v63 = vunpack.i.h.bf16 %v6310_v43  ;;  %v6311_v24 = vunpack.i.l.bf16 %v6310_v43 }
  0x95   : > { %6484 = vrot.lane.b32.xlu1 %v6483_v25, %s6706_s22  ;;  %v1013_v37 = vsel %vm1006_vm5, %v1004_v48, %v6266_v45  ;;  %v1014_v42 = vsel %vm1006_vm5, %v1005_v49, %v6267_v44  ;;  %v5674_v25 = vld [vmem:[%s6829_s1 + $0x32] sm:$0xff]  ;;  %s9373_s22 = sld [smem:[#allocation4_spill]] }
  0x96   : > { %v6270_v55 = vpop.permute.xlu0 %6269  ;;  %v962_v29 = vsel %vm622_vm0, %v5673_v18, %v6311_v24  ;;  %v963_v30 = vsel %vm622_vm0, %v5674_v25, %v6312_v63 }
  0x97   : > { %v6272_v58 = vunpack.i.h.bf16 %v6270_v55  ;;  %v6271_v35 = vunpack.i.l.bf16 %v6270_v55  ;;  %v7138_v40 = vpop.permute.xlu1 %6274  ;;  %6212 = vmatpush.bf16.msra.mxu3 %v5986_v26 }
  0x99   : > { %v1022_v60 = vsel %vm1015_vm6, %v1013_v37, %v6271_v35  ;;  %v1023_v61 = vsel %vm1015_vm6, %v1014_v42, %v6272_v58  ;;  %6489 = vrot.lane.b32.xlu2 %v6488_v54, %s6709_s24  ;;  %v5985_v54 = vld [vmem:[%s9353_s6 + $0x10] sm:$0xff] }
  0x9a   : > { %v1030_v62 = vpack.c.bf16 %v1023_v61, %v1022_v60 }
  0x9b   : > { %v6325_v4 = vpop.permute.xlu2 %6324  ;;  %6213 = vmatpush.bf16.msra.mxu3 %v5985_v54  ;;  %s7446_s30 = scalar_lea.vmem %s9373_s22, %s5970_s29  ;;  %s6715_s22 = smov 120  }
  0x9c   : > { %6494 = vrot.lane.b32.xlu0 %v6493_v59, %s6710_s25  ;;  %1143 = vmatmul.bf16.vlgmr.msrb.gmra.mxu2 %v1030_v62  ;;  %v6327_v48 = vunpack.i.h.bf16 %v6325_v4  ;;  %v6326_v49 = vunpack.i.l.bf16 %v6325_v4  ;;  %s6714_s25 = smov 8  }
  0x9d   : > { %1595 = vmatpush.bf16.msrb.mxu2 %v5990_v27  ;;  %v1025_v27 = vpack.c.bf16 %v7025_v1, %v7022_v0 }
  0x9e   : > { %v7149_v17 = vpop.permute.xlu0 %6284 }
  0x9f   : > { %v7151_v12 = vpop.permute.xlu1 %6289 }
  0xa0   : > { %v6292_v0 = vunpack.i.h.bf16 %v7151_v12  ;;  %v6291_v1 = vunpack.i.l.bf16 %v7151_v12 }
  0xa1   : > { %1596 = vmatpush.bf16.msrb.mxu2 %v5989_v34 }
  0xa3   : > { %v7156_v19 = vpop.permute.xlu2 %6339 }
  0xa5   : > { %1597 = vmatpush.bf16.msrb.mxu2 %v5988_v10  ;;  %v1027_v10 = vpack.c.bf16 %v6851_v7, %v6848_v6  ;;  %v1188_v6 = vld [vmem:[%s6829_s1 + $0x20] sm:$0xff]  ;;  %v6342_v7 = vunpack.i.h.bf16 %v7156_v19 }
  0xa6   : > { %v7158_v16 = vpop.permute.xlu0 %6299 }
  0xa7   : > { %v7160_v21 = vpop.permute.xlu1 %6304 }
  0xa9   : > { %1598 = vmatpush.bf16.msrb.mxu2 %v5987_v15 }
  0xab   : > { %v7174_v28 = vpop.permute.xlu2 %6354 }
  0xac   : > { %5773 = vmatmul.msk.bf16.vlgmr.msra.gmra.mxu2 %vm622_vm0, %v1025_v27 }
  0xad   : > { %1599 = vmatpush.bf16.msrb.mxu2 %v5986_v26  ;;  %v6341_v26 = vunpack.i.l.bf16 %v7156_v19 }
  0xae   : > { %v6315_v33 = vpop.permute.xlu0 %6314 }
  0xaf   : > { %v6317_v34 = vunpack.i.h.bf16 %v6315_v33  ;;  %v6316_v36 = vunpack.i.l.bf16 %v6315_v33  ;;  %v6320_v38 = vpop.permute.xlu1 %6319 }
  0xb0   : > { %v6322_v39 = vunpack.i.h.bf16 %v6320_v38  ;;  %v6321_v43 = vunpack.i.l.bf16 %v6320_v38  ;;  %v1445_v38 = vsel %vm622_vm0, %v1188_v6, %v6341_v26  ;;  %v6276_v26 = vunpack.i.l.bf16 %v7138_v40 }
  0xb1   : > { %v971_v44 = vsel %vm970_vm1, %v962_v29, %v6316_v36  ;;  %v972_v45 = vsel %vm970_vm1, %v963_v30, %v6317_v34  ;;  %1600 = vmatpush.bf16.msrb.mxu2 %v5985_v54  ;;  %v5984_v29 = vld [vmem:[%s9353_s6 + $0x8] sm:$0xff]  ;;  %v1189_v30 = vld [vmem:[%s6829_s1 + $0x30] sm:$0xff]  ;;  %v1500_v54 = vpack.c.bf16 %v7053_v53, %v7050_v52 }
  0xb2   : > { %v981_v46 = vsel %vm979_vm2, %v972_v45, %v6322_v39  ;;  %v980_v47 = vsel %vm979_vm2, %v971_v44, %v6321_v43  ;;  %6214 = vmatpush.bf16.msra.mxu3 %v5984_v29  ;;  %v1446_v43 = vsel %vm622_vm0, %v1189_v30, %v6342_v7  ;;  %v5991_v45 = vld [vmem:[%s9353_s6 + $0x40] sm:$0xff] }
  0xb3   : > { %v989_v55 = vsel %vm988_vm3, %v980_v47, %v6291_v1  ;;  %v990_v58 = vsel %vm988_vm3, %v981_v46, %v6292_v0  ;;  %v7195_v63 = vpop.permute.xlu2 %6369  ;;  %1631 = vmatpush.bf16.msra.mxu0 %v5991_v45  ;;  %v6281_v45 = vunpack.i.l.bf16 %v7080_v3 }
  0xb4   : > { %v998_v59 = vsel %vm997_vm4, %v989_v55, %v6326_v49  ;;  %v999_v37 = vsel %vm997_vm4, %v990_v58, %v6327_v48  ;;  %v5983_v48 = vld [vmem:[%s9353_s6] sm:$0xff] }
  0xb5   : > { %1601 = vmatpush.bf16.msrb.mxu2 %v5984_v29 }
  0xb6   : > { %v6330_v35 = vpop.permute.xlu0 %6329  ;;  %6215 = vmatpush.bf16.msra.mxu3 %v5983_v48  ;;  %5853 = vmatmul.msk.bf16.vlgmr.msra.gmra.mxu0 %vm622_vm0, %v1500_v54 }
  0xb7   : > { %v6332_v42 = vunpack.i.h.bf16 %v6330_v35  ;;  %v6331_v60 = vunpack.i.l.bf16 %v6330_v35  ;;  %v6335_v61 = vpop.permute.xlu1 %6334 }
  0xb8   : > { %v6337_v62 = vunpack.i.h.bf16 %v6335_v61  ;;  %v6336_v4 = vunpack.i.l.bf16 %v6335_v61  ;;  %v1029_v61 = vpack.c.bf16 %v6868_v14, %v6865_v13  ;;  %v1674_v14 = vsel %vm622_vm0, %v6859_v9, 0.0  ;;  %v1186_v9 = vld [vmem:[%s6829_s1] sm:$0xff] }
  0xb9   : > { %v1007_v15 = vsel %vm1006_vm5, %v998_v59, %v6331_v60  ;;  %v1008_v27 = vsel %vm1006_vm5, %v999_v37, %v6332_v42  ;;  %1602 = vmatpush.bf16.msrb.mxu2 %v5983_v48  ;;  %v6356_v59 = vunpack.i.l.bf16 %v7174_v28  ;;  %v6357_v42 = vunpack.i.h.bf16 %v7174_v28  ;;  %v5992_v28 = vld [vmem:[%s9355_s8] sm:$0xff]  ;;  %v7257_v48 = vpop.f32.mrf.mxu2 }
  0xba   : > { %v1016_v24 = vsel %vm1015_vm6, %v1007_v15, %v6336_v4  ;;  %v1017_v18 = vsel %vm1015_vm6, %v1008_v27, %v6337_v62  ;;  %v6371_v15 = vunpack.i.l.bf16 %v7195_v63  ;;  %v6372_v27 = vunpack.i.h.bf16 %v7195_v63 }
  0xbb   : > { %v1024_v25 = vpack.c.bf16 %v1017_v18, %v1016_v24  ;;  %v6385_v47 = vpop.permute.xlu2 %6384  ;;  %v1672_v24 = vsel %vm622_vm0, %v6856_v8, 0.0  ;;  %v6277_v18 = vunpack.i.h.bf16 %v7138_v40 }
  0xbc   : > { %5774 = vmatmul.msk.bf16.gmra.mxu2 %vm622_vm0, %v1027_v10  ;;  %v6387_v30 = vunpack.i.h.bf16 %v6385_v47 }
  0xbd   : > { %1128 = vmatmul.bf16.vlgmr.msra.gmra.mxu1 %v1024_v25  ;;  %1710 = vmatpush.bf16.msra.mxu2 %v5992_v28 }
  0xbe   : > { %v6345_v33 = vpop.permute.xlu0 %6344 }
  0xbf   : > { %v6346_v34 = vunpack.i.l.bf16 %v6345_v33  ;;  %v6350_v36 = vpop.permute.xlu1 %6349  ;;  %v6347_v39 = vunpack.i.h.bf16 %v6345_v33  ;;  %v1187_v33 = vld [vmem:[%s6829_s1 + $0x10] sm:$0xff] }
  0xc0   : > { %v6351_v44 = vunpack.i.l.bf16 %v6350_v36  ;;  %v6352_v19 = vunpack.i.h.bf16 %v6350_v36 }
  0xc1   : > { %v1453_v46 = vsel %vm970_vm1, %v1445_v38, %v6346_v34  ;;  %v1454_v49 = vsel %vm970_vm1, %v1446_v43, %v6347_v39  ;;  %v6386_v38 = vunpack.i.l.bf16 %v6385_v47  ;;  %v1673_v43 = vadd.f32 %v1672_v24, %v7014_v41 }
  0xc2   : > { %v1461_v55 = vsel %vm979_vm2, %v1453_v46, %v6351_v44  ;;  %v1462_v35 = vsel %vm979_vm2, %v1454_v49, %v6352_v19  ;;  %v1444_v47 = vsel %vm622_vm0, %v1187_v33, %v6277_v18  ;;  %v1443_v41 = vsel %vm622_vm0, %v1186_v9, %v6276_v26 }
  0xc3   : > { %v1469_v62 = vsel %vm988_vm3, %v1461_v55, %v6356_v59  ;;  %v1470_v53 = vsel %vm988_vm3, %v1462_v35, %v6357_v42  ;;  %v7240_v25 = vpop.permute.xlu2 %6399  ;;  %v1675_v35 = vadd.f32 %v1674_v14, %v1673_v43  ;;  %v6711_v26 = vmov 64.0  }
  0xc4   : > { %v6402_v24 = vunpack.i.h.bf16 %v7240_v25  ;;  %v6401_v18 = vunpack.i.l.bf16 %v7240_v25  ;;  %6626 = vrcp.f32 %v6711_v26 }
  0xc5   : > { %v1676_v25 = vrot.slane %v1675_v35, 4 }
  0xc6   : > { %v6360_v58 = vpop.permute.xlu0 %6359 }
  0xc7   : > { %v6365_v37 = vpop.permute.xlu1 %6364  ;;  %v6361_v60 = vunpack.i.l.bf16 %v6360_v58  ;;  %v6362_v52 = vunpack.i.h.bf16 %v6360_v58 }
  0xc8   : > { %v6367_v4 = vunpack.i.h.bf16 %v6365_v37  ;;  %v6366_v10 = vunpack.i.l.bf16 %v6365_v37  ;;  %v1451_v37 = vsel %vm970_vm1, %v1443_v41, %v6281_v45 }
  0xc9   : > { %v1477_v13 = vsel %vm997_vm4, %v1469_v62, %v6361_v60  ;;  %v1478_v63 = vsel %vm997_vm4, %v1470_v53, %v6362_v52  ;;  %v5736_v62 = vld [vmem:[%s6829_s1 + $0xd6] sm:$0xff]  ;;  %v1502_v52 = vpack.c.bf16 %v7100_v5, %v7097_v11  ;;  %v6287_v53 = vunpack.i.h.bf16 %v7149_v17 }
  0xca   : > { %v965_v29 = vsel %vm622_vm0, %v6945_v51, %v6367_v4  ;;  %v964_v6 = vsel %vm622_vm0, %v6942_v50, %v6366_v10  ;;  %v1485_v39 = vsel %vm1006_vm5, %v1477_v13, %v6371_v15  ;;  %v1486_v51 = vsel %vm1006_vm5, %v1478_v63, %v6372_v27  ;;  %v7296_v43 = vpop.eup %6626 }
  0xcb   : > { %v6282_v50 = vunpack.i.h.bf16 %v7080_v3  ;;  %v6286_v4 = vunpack.i.l.bf16 %v7149_v17  ;;  %v7277_v63 = vpop.permute.xlu2 %6414  ;;  %5854 = vmatmul.msk.bf16.gmra.mxu0 %vm622_vm0, %v1502_v52  ;;  %v5814_v52 = vld [vmem:[%s6829_s1 + $0xd8] sm:$0xff]  ;;  %vm1687_vm7 = vweird.f32 %v7296_v43 }
  0xcc   : > { %5775 = vmatmul.msk.bf16.gmra.mxu2 %vm622_vm0, %v1029_v61  ;;  %v5735_v61 = vld [vmem:[%s6829_s1 + $0xc6] sm:$0xff] }
  0xcd   : > { %v1452_v60 = vsel %vm970_vm1, %v1444_v47, %v6282_v50  ;;  %v1031_v17 = vpack.c.bf16 %v5736_v62, %v5735_v61  ;;  %v6302_v47 = vunpack.i.h.bf16 %v7158_v16  ;;  %v6416_v61 = vunpack.i.l.bf16 %v7277_v63  ;;  %v5813_v62 = vld [vmem:[%s6829_s1 + $0xc8] sm:$0xff] }
  0xce   : > { %v6375_v7 = vpop.permute.xlu0 %6374 }
  0xcf   : > { %v6377_v8 = vunpack.i.h.bf16 %v6375_v7  ;;  %v6376_v34 = vunpack.i.l.bf16 %v6375_v7  ;;  %v6380_v36 = vpop.permute.xlu1 %6379 }
  0xd0   : > { %v6382_v40 = vunpack.i.h.bf16 %v6380_v36  ;;  %v6381_v44 = vunpack.i.l.bf16 %v6380_v36 }
  0xd1   : > { %v973_v46 = vsel %vm970_vm1, %v964_v6, %v6376_v34  ;;  %v974_v19 = vsel %vm970_vm1, %v965_v29, %v6377_v8  ;;  %v1459_v29 = vsel %vm979_vm2, %v1451_v37, %v6286_v4  ;;  %v7288_v8 = vpop.f32.mrf.mxu2  ;;  %v6296_v34 = vunpack.i.l.bf16 %v7087_v2 }
  0xd2   : > { %v1493_v49 = vsel %vm1015_vm6, %v1485_v39, %v6381_v44  ;;  %v982_v54 = vsel %vm979_vm2, %v973_v46, %v6386_v38  ;;  %v983_v55 = vsel %vm979_vm2, %v974_v19, %v6387_v30  ;;  %v1494_v58 = vsel %vm1015_vm6, %v1486_v51, %v6382_v40 }
  0xd3   : > { %v1501_v3 = vpack.c.bf16 %v1494_v58, %v1493_v49  ;;  %v991_v15 = vsel %vm988_vm3, %v982_v54, %v6356_v59  ;;  %v992_v27 = vsel %vm988_vm3, %v983_v55, %v6357_v42  ;;  %v1460_v30 = vsel %vm979_vm2, %v1452_v60, %v6287_v53  ;;  %v6430_v49 = vpop.permute.xlu2 %6429 }
  0xd4   : > { %v1467_v38 = vsel %vm988_vm3, %v1459_v29, %v6291_v1  ;;  %v6297_v39 = vunpack.i.h.bf16 %v7087_v2  ;;  %v1468_v40 = vsel %vm988_vm3, %v1460_v30, %v6292_v0  ;;  %v1677_v51 = vadd.f32 %v1676_v25, %v1675_v35 }
  0xd5   : > { %1608 = vmatmul.bf16.vlgmr.msra.gmra.mxu3 %v1501_v3  ;;  %v1475_v19 = vsel %vm997_vm4, %v1467_v38, %v6296_v34  ;;  %v6301_v1 = vunpack.i.l.bf16 %v7158_v16  ;;  %v1683_v0 = vmul.f32 64.0, %v7296_v43  ;;  %v6307_v35 = vunpack.i.h.bf16 %v7160_v21 }
  0xd6   : > { %v6390_v10 = vpop.permute.xlu0 %6389  ;;  %v1476_v2 = vsel %vm997_vm4, %v1468_v40, %v6297_v39  ;;  %v1678_v58 = vrot.slane %v1677_v51, 2  ;;  %v6306_v3 = vunpack.i.l.bf16 %v7160_v21  ;;  %v6417_v60 = vunpack.i.h.bf16 %v7277_v63 }
  0xd7   : > { %v6392_v28 = vunpack.i.h.bf16 %v6390_v10  ;;  %v6391_v13 = vunpack.i.l.bf16 %v6390_v10  ;;  %v6395_v14 = vpop.permute.xlu1 %6394  ;;  %v1483_v16 = vsel %vm1006_vm5, %v1475_v19, %v6301_v1  ;;  %v1484_v37 = vsel %vm1006_vm5, %v1476_v2, %v6302_v47 }
  0xd8   : > { %v6397_v11 = vunpack.i.h.bf16 %v6395_v14  ;;  %v6396_v5 = vunpack.i.l.bf16 %v6395_v14  ;;  %v1684_v4 = vsub.f32 1.0, %v1683_v0  ;;  %v1504_v10 = vpack.c.bf16 %v5814_v52, %v5813_v62 }
  0xd9   : > { %v1000_v59 = vsel %vm997_vm4, %v991_v15, %v6391_v13  ;;  %v1001_v42 = vsel %vm997_vm4, %v992_v27, %v6392_v28  ;;  %v1491_v21 = vsel %vm1015_vm6, %v1483_v16, %v6306_v3  ;;  %v1492_v27 = vsel %vm1015_vm6, %v1484_v37, %v6307_v35 }
  0xda   : > { %v1009_v6 = vsel %vm1006_vm5, %v1000_v59, %v6396_v5  ;;  %v1010_v7 = vsel %vm1006_vm5, %v1001_v42, %v6397_v11  ;;  %v1679_v63 = vadd.f32 %v1678_v58, %v1677_v51  ;;  %v1685_v11 = vmul.f32 %v7296_v43, %v1684_v4 }
  0xdb   : > { %v1018_v9 = vsel %vm1015_vm6, %v1009_v6, %v6401_v18  ;;  %v1019_v33 = vsel %vm1015_vm6, %v1010_v7, %v6402_v24  ;;  %5855 = vmatmul.msk.bf16.gmra.mxu0 %vm622_vm0, %v1504_v10  ;;  %v1499_v26 = vpack.c.bf16 %v1492_v27, %v1491_v21  ;;  %v6445_v29 = vpop.permute.xlu2 %6444  ;;  %v6431_v38 = vunpack.i.l.bf16 %v6430_v49 }
  0xdc   : > { %5776 = vmatmul.msk.bf16.gmra.mxu2 %vm622_vm0, %v1031_v17  ;;  %v1026_v36 = vpack.c.bf16 %v1019_v33, %v1018_v9  ;;  %v1680_v6 = vrot.slane %v1679_v63, 1  ;;  %v1686_v7 = vadd.f32 %v7296_v43, %v1685_v11  ;;  %v6447_v30 = vunpack.i.h.bf16 %v6445_v29 }
  0xdd   : > { %v6446_v9 = vunpack.i.l.bf16 %v6445_v29  ;;  %v1193_v29 = vld [vmem:[%s6829_s1 + $0x70] sm:$0xff] }
  0xde   : > { %v6405_v44 = vpop.permute.xlu0 %6404  ;;  %1133 = vmatmul.bf16.gmra.mxu1 %v1026_v36  ;;  %v6432_v36 = vunpack.i.h.bf16 %v6430_v49  ;;  %v966_v49 = vsel %vm622_vm0, %v6955_v56, %v6431_v38 }
  0xdf   : > { %v6407_v50 = vunpack.i.h.bf16 %v6405_v44  ;;  %v6406_v45 = vunpack.i.l.bf16 %v6405_v44  ;;  %v6410_v46 = vpop.permute.xlu1 %6409 }
  0xe0   : > { %v6412_v41 = vunpack.i.h.bf16 %v6410_v46  ;;  %v6411_v12 = vunpack.i.l.bf16 %v6410_v46 }
  0xe1   : > { %v1448_v54 = vsel %vm622_vm0, %v6906_v32, %v6407_v50  ;;  %v1447_v55 = vsel %vm622_vm0, %v6903_v31, %v6406_v45  ;;  %v7320_v31 = vpop.f32.mrf.mxu2  ;;  %v1681_v50 = vadd.f32 %v1680_v6, %v1679_v63  ;;  %v1688_v45 = vsel %vm1687_vm7, %v7296_v43, %v1686_v7  ;;  %v5816_v43 = vld [vmem:[%s6829_s1 + $0xf8] sm:$0xff] }
  0xe2   : > { %v1456_v32 = vsel %vm970_vm1, %v1448_v54, %v6412_v41  ;;  %v1455_v53 = vsel %vm970_vm1, %v1447_v55, %v6411_v12  ;;  %v967_v12 = vsel %vm622_vm0, %v6958_v57, %v6432_v36  ;;  %v5815_v55 = vld [vmem:[%s6829_s1 + $0xe8] sm:$0xff]  ;;  %vm4839_vm7 = vcmask 195584  }
  0xe3   : > { %v1463_v24 = vsel %vm979_vm2, %v1455_v53, %v6416_v61  ;;  %v1464_v18 = vsel %vm979_vm2, %v1456_v32, %v6417_v60  ;;  %v1689_v54 = vmul.f32 %v1688_v45, %v1681_v50  ;;  %v6460_v58 = vpop.permute.xlu2 %6459  ;;  %v1506_v35 = vpack.c.bf16 %v5816_v43, %v5815_v55 }
  0xe4   : > { %v6462_v10 = vunpack.i.h.bf16 %v6460_v58  ;;  %v6461_v21 = vunpack.i.l.bf16 %v6460_v58 }
  0xe5   : > { %v1690_v56 = vpack.c.bf16 %v1689_v54, %v1689_v54 }
  0xe6   : > { %v7322_v15 = vpop.permute.xlu0 %6419 }
  0xe7   : > { %v6422_v28 = vunpack.i.h.bf16 %v7322_v15  ;;  %v6421_v13 = vunpack.i.l.bf16 %v7322_v15  ;;  %v6425_v14 = vpop.permute.xlu1 %6424 }
  0xe8   : > { %v6427_v5 = vunpack.i.h.bf16 %v6425_v14  ;;  %v6426_v17 = vunpack.i.l.bf16 %v6425_v14 }
  0xe9   : > { %v1471_v59 = vsel %vm988_vm3, %v1463_v24, %v6421_v13  ;;  %v1472_v42 = vsel %vm988_vm3, %v1464_v18, %v6422_v28  ;;  %v7340_v44 = vpop.f32.mrf.mxu2 }
  0xea   : > { %v1479_v33 = vsel %vm997_vm4, %v1471_v59, %v6426_v17  ;;  %v1480_v34 = vsel %vm997_vm4, %v1472_v42, %v6427_v5 }
  0xeb   : > { %5856 = vmatmul.msk.bf16.gmra.mxu0 %vm622_vm0, %v1506_v35  ;;  %v6475_v42 = vpop.permute.xlu2 %6474 }
  0xec   : > { %1603 = vmatmul.bf16.vlgmr.msrb.gmra.mxu2 %v1499_v26 }
  0xee   : > { %v6435_v25 = vpop.permute.xlu0 %6434 }
  0xef   : > { %v6437_v39 = vunpack.i.h.bf16 %v6435_v25  ;;  %v6436_v40 = vunpack.i.l.bf16 %v6435_v25  ;;  %v6440_v51 = vpop.permute.xlu1 %6439  ;;  %v6477_v25 = vunpack.i.h.bf16 %v6475_v42 }
  0xf0   : > { %v6442_v47 = vunpack.i.h.bf16 %v6440_v51  ;;  %v6441_v1 = vunpack.i.l.bf16 %v6440_v51 }
  0xf1   : > { %v1487_v46 = vsel %vm1006_vm5, %v1479_v33, %v6436_v40  ;;  %v1488_v19 = vsel %vm1006_vm5, %v1480_v34, %v6437_v39  ;;  %v7358_v4 = vpop.f32.mrf.mxu2 }
  0xf2   : > { %v1495_v2 = vsel %vm1015_vm6, %v1487_v46, %v6446_v9  ;;  %v1496_v41 = vsel %vm1015_vm6, %v1488_v19, %v6447_v30  ;;  %v976_v3 = vsel %vm970_vm1, %v967_v12, %v6442_v47  ;;  %v975_v16 = vsel %vm970_vm1, %v966_v49, %v6441_v1 }
  0xf3   : > { %v1503_v0 = vpack.c.bf16 %v1496_v41, %v1495_v2  ;;  %v6476_v30 = vunpack.i.l.bf16 %v6475_v42  ;;  %v6490_v2 = vpop.permute.xlu2 %6489 }
  0xf4   : > { %v6492_v49 = vunpack.i.h.bf16 %v6490_v2 }
  0xf5   : > { %1613 = vmatmul.bf16.gmra.mxu3 %v1503_v0  ;;  %v6491_v0 = vunpack.i.l.bf16 %v6490_v2 }
  0xf6   : > { %v6450_v37 = vpop.permute.xlu0 %6449 }
  0xf7   : > { %v6452_v60 = vunpack.i.h.bf16 %v6450_v37  ;;  %v6451_v61 = vunpack.i.l.bf16 %v6450_v37  ;;  %v6455_v62 = vpop.permute.xlu1 %6454 }
  0xf8   : > { %v6457_v57 = vunpack.i.h.bf16 %v6455_v62  ;;  %v6456_v52 = vunpack.i.l.bf16 %v6455_v62 }
  0xf9   : > { %v984_v32 = vsel %vm979_vm2, %v975_v16, %v6451_v61  ;;  %v985_v53 = vsel %vm979_vm2, %v976_v3, %v6452_v60  ;;  %v7373_v33 = vpop.f32.mrf.mxu2 }
  0xfa   : > { %v993_v27 = vsel %vm988_vm3, %v984_v32, %v6421_v13  ;;  %v994_v14 = vsel %vm988_vm3, %v985_v53, %v6422_v28  ;;  %v1192_v13 = vld [vmem:[%s6829_s1 + $0x60] sm:$0xff]  ;;  %s6717_s1 = smov 40  }
  0xfb   : > { %v1002_v24 = vsel %vm997_vm4, %v993_v27, %v6456_v52  ;;  %v1003_v18 = vsel %vm997_vm4, %v994_v14, %v6457_v57  ;;  %v7404_v32 = vld [vmem:[%s9352_s5] ss:$0 sm:$0xff] }
  0xfc   : > { %5861 = vmatmul.msk.bf16.vlgmr.msra.gmra.mxu2 %vm622_vm0, %v1690_v56  ;;  %v1011_v11 = vsel %vm1006_vm5, %v1002_v24, %v6461_v21  ;;  %v1012_v5 = vsel %vm1006_vm5, %v1003_v18, %v6462_v10 }
  0xfe   : > { %v6465_v63 = vpop.permute.xlu0 %6464 }
  0xff   : > { %v6467_v17 = vunpack.i.h.bf16 %v6465_v63  ;;  %v6466_v26 = vunpack.i.l.bf16 %v6465_v63  ;;  %v6470_v59 = vpop.permute.xlu1 %6469 }
 0x100   : > { %v6472_v15 = vunpack.i.h.bf16 %v6470_v59  ;;  %v6471_v6 = vunpack.i.l.bf16 %v6470_v59 }
 0x101   : > { %v1020_v28 = vsel %vm1015_vm6, %v1011_v11, %v6466_v26  ;;  %v1021_v7 = vsel %vm1015_vm6, %v1012_v5, %v6467_v17  ;;  %v7387_v54 = vpop.f32.mrf.mxu2 }
 0x102   : > { %v1028_v9 = vpack.c.bf16 %v1021_v7, %v1020_v28  ;;  %v1450_v34 = vsel %vm622_vm0, %v1193_v29, %v6472_v15  ;;  %v1449_v36 = vsel %vm622_vm0, %v1192_v13, %v6471_v6 }
 0x103   : > { %v1457_v38 = vsel %vm970_vm1, %v1449_v36, %v6476_v30  ;;  %v1458_v39 = vsel %vm970_vm1, %v1450_v34, %v6477_v25 }
 0x104   : > { %1138 = vmatmul.bf16.gmra.mxu1 %v1028_v9 }
 0x106   : > { %v6480_v40 = vpop.permute.xlu0 %6479 }
 0x107   : > { %v6482_v51 = vunpack.i.h.bf16 %v6480_v40  ;;  %v6481_v50 = vunpack.i.l.bf16 %v6480_v40  ;;  %v6485_v45 = vpop.permute.xlu1 %6484 }
 0x108   : > { %v6487_v47 = vunpack.i.h.bf16 %v6485_v45  ;;  %v6486_v1 = vunpack.i.l.bf16 %v6485_v45  ;;  %v6622_v45 = vld [vmem:[%s9354_s7] ss:$0 sm:$0xff] }
 0x109   : > { %v1465_v46 = vsel %vm979_vm2, %v1457_v38, %v6481_v50  ;;  %v1466_v19 = vsel %vm979_vm2, %v1458_v39, %v6482_v51  ;;  %v7395_v60 = vpop.f32.mrf.mxu2 }
 0x10a   : > { %v1473_v41 = vsel %vm988_vm3, %v1465_v46, %v6256_v23  ;;  %v1474_v12 = vsel %vm988_vm3, %v1466_v19, %v6257_v22 }
 0x10b   : > { %v1481_v55 = vsel %vm997_vm4, %v1473_v41, %v6486_v1  ;;  %v1482_v43 = vsel %vm997_vm4, %v1474_v12, %v6487_v47  ;;  %vm3734_vm4 = vcmask 1046528  }
 0x10c   : > { %v1489_v16 = vsel %vm1006_vm5, %v1481_v55, %v6491_v0  ;;  %v1490_v37 = vsel %vm1006_vm5, %v1482_v43, %v6492_v49 }
 0x10e   : > { %v6495_v58 = vpop.permute.xlu0 %6494 }
 0x10f   : > { %v6497_v35 = vunpack.i.h.bf16 %v6495_v58  ;;  %v6496_v3 = vunpack.i.l.bf16 %v6495_v58 }
 0x111   : > { %v1497_v23 = vsel %vm1015_vm6, %v1489_v16, %v6496_v3  ;;  %v1498_v20 = vsel %vm1015_vm6, %v1490_v37, %v6497_v35  ;;  %v1693_v16 = vld [vmem:[%s9356_s9] sm:$0x1]  ;;  %vm7726_vm6 = vmand %vm2254_vm11, %vm2320_vm12 }
 0x112   : > { %v1505_v22 = vpack.c.bf16 %v1498_v20, %v1497_v23 }
 0x114   : > { %1618 = vmatmul.bf16.gmra.mxu3 %v1505_v22 }
 0x11f   : > { %v7397_v61 = vpop.f32.mrf.mxu2 }
 0x127   : > { %v7399_v62 = vpop.f32.mrf.mxu2 }
 0x12f   : > { %v1158_v57 = vpop.f32.mrf.mxu2 }
 0x133   : > { %v1633_v17 = vpop.f32.mrf.mxu0 }
 0x137   : > { %v1160_v52 = vpop.f32.mrf.mxu2 }
 0x13a   : > { %v1129_v56 = vpop.f32.mrf.mxu1 }
 0x13b   : > { %v1130_v53 = vadd.f32 %v7404_v32, %v1129_v56  ;;  %v1635_v42 = vpop.f32.mrf.mxu0 }
 0x13d   : > { %v1159_v27 = vadd.f32 %v1158_v57, %v1130_v53 }
 0x13f   : > { %v1163_v10 = vpop.f32.mrf.mxu2  ;;  %v1178_v18 = vmax.f32 %v1159_v27, 0.0 }
 0x142   : > { %v1131_v21 = vpop.f32.mrf.mxu1 }
 0x143   : > { %v1132_v14 = vadd.f32 %v7404_v32, %v1131_v21 }
 0x145   : > { %v1161_v24 = vadd.f32 %v1160_v52, %v1132_v14 }
 0x147   : > { %v1179_v63 = vmax.f32 %v1161_v24, 0.0  ;;  %v1165_v11 = vpop.f32.mrf.mxu2 }
 0x148   : > { %v1638_v6 = vpop.f32.mrf.mxu0 }
 0x149   : > { %v6498_v5 = vpack.i.bf16 %v1179_v63, %v1178_v18  ;;  %v1147_v18 = vadd.f32 %v7404_v32, %v7399_v62 }
 0x14b   : > { %6499 = vrot.lane.b32.xlu1 %v6498_v5, %s6704_s20 }
 0x14f   : > { %v7409_v26 = vpop.f32.mrf.mxu2 }
 0x150   : > { %v1640_v40 = vpop.f32.mrf.mxu0 }
 0x157   : > { %v7411_v59 = vpop.f32.mrf.mxu2 }
 0x158   : > { %v1609_v30 = vpop.f32.mrf.mxu3  ;;  %v1643_v19 = vpop.f32.mrf.mxu0 }
 0x159   : > { %v1610_v2 = vadd.f32 %v6622_v45, %v1609_v30 }
 0x15b   : > { %v1134_v13 = vpop.f32.mrf.mxu1  ;;  %v1639_v58 = vadd.f32 %v1638_v6, %v1610_v2  ;;  %v1947_v2 = vld [vmem:[%s9359_s12] sm:$0xf] }
 0x15c   : > { %v1135_v15 = vadd.f32 %v7404_v32, %v1134_v13 }
 0x15d   : > { %v1655_v22 = vmax.f32 %v1639_v58, 0.0  ;;  %v5993_v58 = vld [vmem:[%s9357_s10] sm:$0xff] }
 0x15e   : > { %v1164_v7 = vadd.f32 %v1163_v10, %v1135_v15 }
 0x15f   : > { %v1173_v29 = vpop.f32.mrf.mxu2 }
 0x160   : > { %v1180_v36 = vmax.f32 %v1164_v7, 0.0  ;;  %v1611_v51 = vpop.f32.mrf.mxu3  ;;  %v1645_v53 = vpop.f32.mrf.mxu0 }
 0x161   : > { %v1612_v12 = vadd.f32 %v6622_v45, %v1611_v51 }
 0x163   : > { %v1136_v28 = vpop.f32.mrf.mxu1  ;;  %v1641_v3 = vadd.f32 %v1640_v40, %v1612_v12  ;;  %v1900_v12 = vld [vmem:[%s7446_s30 + $0x8] sm:$0xff] }
 0x164   : > { %v1137_v25 = vadd.f32 %v7404_v32, %v1136_v28 }
 0x165   : > { %v1656_v57 = vmax.f32 %v1641_v3, 0.0  ;;  %v1902_v3 = vld [vmem:[%s7446_s30 + $0x18] sm:$0xff] }
 0x166   : > { %v1166_v9 = vadd.f32 %v1165_v11, %v1137_v25 }
 0x167   : > { %v1175_v34 = vpop.f32.mrf.mxu2  ;;  %v6513_v11 = vpack.i.bf16 %v1656_v57, %v1655_v22  ;;  %v7471_v22 = vld [vmem:[%s9350_s3] ss:$0 sm:$0xff] }
 0x168   : > { %v1181_v38 = vmax.f32 %v1166_v9, 0.0 }
 0x16a   : > { %v6508_v39 = vpack.i.bf16 %v1181_v38, %v1180_v36 }
 0x16c   : > { %6509 = vrot.lane.b32.xlu1 %v6508_v39, %s6704_s20 }
 0x16f   : > { %v1604_v50 = vpop.f32.mrf.mxu2 }
 0x170   : > { %v1605_v46 = vadd.f32 %v6622_v45, %v1604_v50 }
 0x172   : > { %v1634_v1 = vadd.f32 %v1633_v17, %v1605_v46  ;;  %v1145_v17 = vadd.f32 %v7404_v32, %v7397_v61 }
 0x174   : > { %v1653_v43 = vmax.f32 %v1634_v1, 0.0  ;;  %v1174_v28 = vadd.f32 %v1173_v29, %v1145_v17  ;;  %v1648_v29 = vpop.f32.mrf.mxu0 }
 0x176   : > { %v1184_v9 = vmax.f32 %v1174_v28, 0.0 }
 0x177   : > { %v1606_v47 = vpop.f32.mrf.mxu2 }
 0x178   : > { %v1607_v41 = vadd.f32 %v6622_v45, %v1606_v47  ;;  %v1614_v49 = vpop.f32.mrf.mxu3 }
 0x179   : > { %v1615_v55 = vadd.f32 %v6622_v45, %v1614_v49  ;;  %v5996_v49 = vld [vmem:[%s9357_s10 + $0x18] sm:$0xff] }
 0x17a   : > { %v1636_v0 = vadd.f32 %v1635_v42, %v1607_v41  ;;  %v1176_v42 = vadd.f32 %v1175_v34, %v1147_v18  ;;  %v2003_v41 = vsel %vm2001_vm8, %v1947_v2, 0  ;;  %1866 = vmatpush.bf16.msrb.mxu2 %v5996_v49 }
 0x17b   : > { %v1644_v20 = vadd.f32 %v1643_v19, %v1615_v55  ;;  %2012 = vmatpush.bf16.msrb.mxu1 %v2003_v41  ;;  %v5995_v55 = vld [vmem:[%s9357_s10 + $0x10] sm:$0xff] }
 0x17c   : > { %v1654_v35 = vmax.f32 %v1636_v0, 0.0  ;;  %v1185_v62 = vmax.f32 %v1176_v42, 0.0  ;;  %v1650_v46 = vpop.f32.mrf.mxu0 }
 0x17d   : > { %v1657_v14 = vmax.f32 %v1644_v20, 0.0 }
 0x17e   : > { %v6503_v37 = vpack.i.bf16 %v1654_v35, %v1653_v43  ;;  %v6528_v34 = vpack.i.bf16 %v1185_v62, %v1184_v9  ;;  %1867 = vmatpush.bf16.msrb.mxu2 %v5995_v55  ;;  %v5994_v43 = vld [vmem:[%s9357_s10 + $0x8] sm:$0xff]  ;;  %v1901_v35 = vld [vmem:[%s7446_s30 + $0x10] sm:$0xff]  ;;  %v650_v62 = vadd.f32 %v7471_v22, %v7320_v31 }
 0x17f   : > { %v1712_v23 = vpop.f32.mrf.mxu2 }
 0x180   : > { %v1713_v52 = vadd.f32 %v1712_v23, %v1693_v16  ;;  %6504 = vrot.lane.b32.xlu2 %v6503_v37, %s6707_s2  ;;  %v1616_v56 = vpop.f32.mrf.mxu3  ;;  %v1932_v16 = vpack.c.bf16 %v1902_v3, %v1901_v35  ;;  %v1903_v37 = vld [vmem:[%s7446_s30 + $0x20] sm:$0xff]  ;;  %v1904_v23 = vld [vmem:[%s7446_s30 + $0x28] sm:$0xff]  ;;  %v1909_v35 = vld [vmem:[%s7446_s30 + $0x50] sm:$0xff] }
 0x181   : > { %v1139_v10 = vpop.f32.mrf.mxu1  ;;  %v1617_v21 = vadd.f32 %v6622_v45, %v1616_v56  ;;  %v1933_v20 = vpack.c.bf16 %v1904_v23, %v1903_v37  ;;  %v647_v56 = vadd.f32 %v7471_v22, %v7288_v8  ;;  %v1910_v3 = vld [vmem:[%s7446_s30 + $0x58] sm:$0xff] }
 0x182   : > { %v1716_v27 = vmax.f32 %v1713_v52, 0.0  ;;  %v1140_v13 = vadd.f32 %v7404_v32, %v1139_v10  ;;  %1868 = vmatpush.bf16.msrb.mxu2 %v5994_v43  ;;  %v645_v52 = vadd.f32 %v7471_v22, %v7257_v48  ;;  %v1936_v23 = vpack.c.bf16 %v1910_v3, %v1909_v35  ;;  %v7590_v3 = vld [vmem:[%s9358_s11] ss:$0 sm:$0xff] }
 0x183   : > { %v1646_v24 = vadd.f32 %v1645_v53, %v1617_v21  ;;  %v665_v18 = vmax.f32 %v647_v56, 0.0  ;;  %v662_v56 = vadd.f32 %v7471_v22, %v7395_v60 }
 0x184   : > { %v1717_v63 = vperm.slane %v1716_v27, 0  ;;  %v1169_v25 = vadd.f32 %v7409_v26, %v1140_v13 }
 0x185   : > { %v1658_v5 = vmax.f32 %v1646_v24, 0.0  ;;  %v664_v24 = vmax.f32 %v645_v52, 0.0  ;;  %v660_v52 = vadd.f32 %v7471_v22, %v7387_v54 }
 0x186   : > { %1783 = vrot.lane.b32.xlu0 %v1717_v63, %s6705_s21  ;;  %v1182_v36 = vmax.f32 %v1169_v25, 0.0  ;;  %1869 = vmatpush.bf16.msrb.mxu2 %v5993_v58  ;;  %v652_v25 = vadd.f32 %v7471_v22, %v7340_v44 }
 0x187   : > { %v1714_v15 = vpop.f32.mrf.mxu2  ;;  %v6523_v6 = vpack.i.bf16 %v1658_v5, %v1657_v14 }
 0x188   : > { %6514 = vrot.lane.b32.xlu2 %v6513_v11, %s6707_s2  ;;  %v1905_v15 = vld [vmem:[%s7446_s30 + $0x30] sm:$0xff] }
 0x189   : > { %v1141_v7 = vpop.f32.mrf.mxu1  ;;  %6524 = vrot.lane.b32.xlu1 %v6523_v6, %s6707_s2  ;;  %v1906_v6 = vld [vmem:[%s7446_s30 + $0x38] sm:$0xff] }
 0x18a   : > { %v1142_v30 = vadd.f32 %v7404_v32, %v1141_v7  ;;  %v1934_v28 = vpack.c.bf16 %v1906_v6, %v1905_v15  ;;  %v1913_v15 = vld [vmem:[%s7446_s30 + $0x70] sm:$0xff]  ;;  %v1914_v6 = vld [vmem:[%s7446_s30 + $0x78] sm:$0xff] }
 0x18c   : > { %v1171_v61 = vadd.f32 %v7411_v59, %v1142_v30 }
 0x18e   : > { %v1183_v38 = vmax.f32 %v1171_v61, 0.0 }
 0x190   : > { %6529 = vrot.lane.b32.xlu2 %v6528_v34, %s6704_s20  ;;  %v6518_v39 = vpack.i.bf16 %v1183_v38, %v1182_v36  ;;  %v666_v38 = vmax.f32 %v650_v62, 0.0  ;;  %v1916_v62 = vld [vmem:[%s7446_s30 + $0x88] sm:$0xff] }
 0x192   : > { %6519 = vrot.lane.b32.xlu0 %v6518_v39, %s6704_s20  ;;  %v667_v39 = vmax.f32 %v652_v25, 0.0 }
 0x197   : > { %v1619_v40 = vpop.f32.mrf.mxu3 }
 0x198   : > { %v1620_v51 = vadd.f32 %v6622_v45, %v1619_v40 }
 0x19a   : > { %v1649_v26 = vadd.f32 %v1648_v29, %v1620_v51 }
 0x19c   : > { %v1659_v47 = vmax.f32 %v1649_v26, 0.0 }
 0x19f   : > { %v1621_v50 = vpop.f32.mrf.mxu3 }
 0x1a0   : > { %v1622_v19 = vadd.f32 %v6622_v45, %v1621_v50  ;;  %v1899_v45 = vld [vmem:[%s7446_s30] sm:$0xff] }
 0x1a1   : > { %v1931_v0 = vpack.c.bf16 %v1900_v12, %v1899_v45 }
 0x1a2   : > { %v1651_v32 = vadd.f32 %v1650_v46, %v1622_v19  ;;  %v1907_v19 = vld [vmem:[%s7446_s30 + $0x40] sm:$0xff] }
 0x1a3   : > { %5882 = vmatmul.msk.bf16.vlgmr.msrb.gmra.mxu1 %vm1952_vm9, %v1931_v0 }
 0x1a4   : > { %v1660_v1 = vmax.f32 %v1651_v32, 0.0  ;;  %v1908_v32 = vld [vmem:[%s7446_s30 + $0x48] sm:$0xff] }
 0x1a6   : > { %v6533_v59 = vpack.i.bf16 %v1660_v1, %v1659_v47  ;;  %v655_v47 = vadd.f32 %v7471_v22, %v7358_v4  ;;  %v657_v1 = vadd.f32 %v7471_v22, %v7373_v33  ;;  %v1911_v22 = vld [vmem:[%s7446_s30 + $0x60] sm:$0xff] }
 0x1a8   : > { %6534 = vrot.lane.b32.xlu0 %v6533_v59, %s6707_s2  ;;  %v1935_v59 = vpack.c.bf16 %v1908_v32, %v1907_v19  ;;  %v668_v12 = vmax.f32 %v655_v47, 0.0  ;;  %v669_v49 = vmax.f32 %v657_v1, 0.0  ;;  %s6716_s2 = smov 72  }
 0x1b3   : > { %5883 = vmatmul.msk.bf16.gmra.mxu1 %vm1952_vm9, %v1932_v16 }
 0x1bd   : > { %v6500_v57 = vpop.permute.xlu1 %6499 }
 0x1be   : > { %v6502_v10 = vunpack.i.h.bf16 %v6500_v57  ;;  %v6501_v21 = vunpack.i.l.bf16 %v6500_v57 }
 0x1c0   : > { %v1786_v63 = vsel %vm622_vm0, %v664_v24, %v6501_v21  ;;  %v1787_v11 = vsel %vm622_vm0, %v665_v18, %v6502_v10  ;;  %v670_v24 = vmax.f32 %v660_v52, 0.0  ;;  %v671_v18 = vmax.f32 %v662_v56, 0.0 }
 0x1c3   : > { %5884 = vmatmul.msk.bf16.gmra.mxu1 %vm1952_vm9, %v1933_v20 }
 0x1d3   : > { %5885 = vmatmul.msk.bf16.gmra.mxu1 %vm1952_vm9, %v1934_v28  ;;  %v1938_v28 = vpack.c.bf16 %v1914_v6, %v1913_v15 }
 0x1da   : > { %v6505_v53 = vpop.permute.xlu2 %6504 }
 0x1db   : > { %v6507_v27 = vunpack.i.h.bf16 %v6505_v53  ;;  %v6506_v14 = vunpack.i.l.bf16 %v6505_v53 }
 0x1dd   : > { %v1794_v5 = vsel %vm970_vm1, %v1786_v63, %v6506_v14  ;;  %v1795_v48 = vsel %vm970_vm1, %v1787_v11, %v6507_v27 }
 0x1de   : > { %v6510_v7 = vpop.permute.xlu1 %6509 }
 0x1df   : > { %v6512_v9 = vunpack.i.h.bf16 %v6510_v7  ;;  %v6511_v61 = vunpack.i.l.bf16 %v6510_v7  ;;  %v1915_v7 = vld [vmem:[%s7446_s30 + $0x80] sm:$0xff] }
 0x1e0   : > { %v1939_v25 = vpack.c.bf16 %v1916_v62, %v1915_v7 }
 0x1e1   : > { %v1788_v29 = vsel %vm622_vm0, %v666_v38, %v6511_v61  ;;  %v1789_v40 = vsel %vm622_vm0, %v667_v39, %v6512_v9  ;;  %v1918_v9 = vld [vmem:[%s7446_s30 + $0x98] sm:$0xff] }
 0x1e2   : > { %v6515_v30 = vpop.permute.xlu2 %6514 }
 0x1e3   : > { %v6517_v34 = vunpack.i.h.bf16 %v6515_v30  ;;  %v6516_v36 = vunpack.i.l.bf16 %v6515_v30  ;;  %5886 = vmatmul.msk.bf16.gmra.mxu1 %vm1952_vm9, %v1935_v59  ;;  %v1917_v30 = vld [vmem:[%s7446_s30 + $0x90] sm:$0xff] }
 0x1e4   : > { %v1940_v61 = vpack.c.bf16 %v1918_v9, %v1917_v30  ;;  %v1922_v30 = vld [vmem:[%s7446_s30 + $0xb8] sm:$0xff] }
 0x1e5   : > { %v1796_v51 = vsel %vm970_vm1, %v1788_v29, %v6516_v36  ;;  %v1797_v31 = vsel %vm970_vm1, %v1789_v40, %v6517_v34  ;;  %v6712_v34 = vmov 0  }
 0x1e6   : > { %2258 = vst.msk [vmem:[#allocation2 + $0x8] sm:$0x1] %vm2257_vm10, %v6712_v34  ;;  %6618 = vset.pattern.permute.xlu1 %v6712_v34  ;;  %6619 = vset.pattern.permute.xlu0 %v6712_v34 }
 0x1e7   : > { %2262 = vst.msk [vmem:[#allocation2 + $0xd4] sm:$0x1] %vm2257_vm10, %v6712_v34  ;;  %vm2703_vm10 = vsmask.f32 4368 }
 0x1e8   : > { %2255 = vst.msk [vmem:[#allocation2] sm:$0xf] %vm2254_vm11, %v6712_v34  ;;  %vm7771_vm12 = vmor %vm2264_vm14, %vm2703_vm10  ;;  %vm5050_vm14 = vcmask 326656  }
 0x1e9   : > { %2256 = vst.msk [vmem:[#allocation2 + $0x4] sm:$0xf] %vm2254_vm11, %v6712_v34 }
 0x1ea   : > { %v6530_v57 = vpop.permute.xlu2 %6529  ;;  %2260 = vst.msk [vmem:[#allocation2 + $0xcc] sm:$0xf] %vm2254_vm11, %v6712_v34 }
 0x1eb   : > { %v6532_v10 = vunpack.i.h.bf16 %v6530_v57  ;;  %v6531_v21 = vunpack.i.l.bf16 %v6530_v57  ;;  %2261 = vst.msk [vmem:[#allocation2 + $0xd0] sm:$0xf] %vm2254_vm11, %v6712_v34 }
 0x1ed   : > { %v1792_v63 = vsel %vm622_vm0, %v670_v24, %v6531_v21  ;;  %v1793_v11 = vsel %vm622_vm0, %v671_v18, %v6532_v10  ;;  %v2322_v38 = vld [vmem:[#allocation2 + $0x8] sm:$0x1] }
 0x1ee   : > { %v2323_v39 = vsel %vm7559_vm13, 0, %v2322_v38 }
 0x1ef   : > { %v2266_v40 = vld [vmem:[#allocation2] sm:$0x1]  ;;  %2324 = vst [vmem:[#allocation2 + $0x8] sm:$0x1] %v2323_v39 }
 0x1f3   : > { %5887 = vmatmul.msk.bf16.gmra.mxu1 %vm1952_vm9, %v1936_v23 }
 0x1f8   : > { %v7482_v17 = vpop.permute.xlu0 %1783 }
 0x1f9   : > { %v1802_v8 = vsel %vm979_vm2, %v1794_v5, %v7482_v17  ;;  %v1803_v42 = vsel %vm979_vm2, %v1795_v48, %v7482_v17  ;;  %v1804_v44 = vsel %vm979_vm2, %v1796_v51, %v7482_v17  ;;  %v1805_v50 = vsel %vm979_vm2, %v1797_v31, %v7482_v17  ;;  %v1912_v5 = vld [vmem:[%s7446_s30 + $0x68] sm:$0xff] }
 0x1fa   : > { %v1810_v13 = vpack.c.bf16 %v1803_v42, %v1802_v8  ;;  %v1811_v26 = vpack.c.bf16 %v1805_v50, %v1804_v44  ;;  %v1937_v42 = vpack.c.bf16 %v1912_v5, %v1911_v22  ;;  %v2267_v31 = vsel %vm7567_vm15, 0, %v2266_v40  ;;  %v3172_v44 = vld [vmem:[#allocation2 + $0x8] sm:$0x1] }
 0x1fb   : > { %v6525_v45 = vpop.permute.xlu1 %6524  ;;  %2268 = vst [vmem:[#allocation2] sm:$0x1] %v2267_v31  ;;  %v3429_v50 = vunpack.c.l.b16 %v3172_v44 }
 0x1fc   : > { %5878 = vmatmul.msk.bf16.vlgmr.msrb.gmra.mxu2 %vm988_vm3, %v1810_v13  ;;  %v6527_v0 = vunpack.i.h.bf16 %v6525_v45  ;;  %v6526_v55 = vunpack.i.l.bf16 %v6525_v45 }
 0x203   : > { %5888 = vmatmul.msk.bf16.gmra.mxu1 %vm1952_vm9, %v1937_v42 }
 0x204   : > { %v6520_v46 = vpop.permute.xlu0 %6519 }
 0x205   : > { %v6522_v2 = vunpack.i.h.bf16 %v6520_v46  ;;  %v6521_v41 = vunpack.i.l.bf16 %v6520_v46  ;;  %v7575_v46 = vld [vmem:[#allocation2] sm:$0xff]  }
 0x206   : > { %v3465_v19 = vshll.u32 %v7575_v46, 16  ;;  %v3463_v47 = vshrl.u32 %v7575_v46, 16 }
 0x207   : > { %v1790_v43 = vsel %vm622_vm0, %v668_v12, %v6521_v41  ;;  %v1791_v4 = vsel %vm622_vm0, %v669_v49, %v6522_v2  ;;  %v6128_v2 = vld [vmem:[#allocation2] sm:$0xf0]  ;;  %v6129_v41 = vld [vmem:[#allocation2] sm:$0xe] }
 0x208   : > { %v1798_v58 = vsel %vm970_vm1, %v1790_v43, %v6526_v55  ;;  %v1799_v33 = vsel %vm970_vm1, %v1791_v4, %v6527_v0  ;;  %v3467_v1 = vrot.slane %v3465_v19, 1  ;;  %v6130_v49 = vor.u32 %v6129_v41, %v6128_v2 }
 0x209   : > { %v1806_v16 = vsel %vm979_vm2, %v1798_v58, %v7482_v17  ;;  %v1807_v37 = vsel %vm979_vm2, %v1799_v33, %v7482_v17  ;;  %v1919_v58 = vld [vmem:[%s7446_s30 + $0xa0] sm:$0xff]  ;;  %v1920_v33 = vld [vmem:[%s7446_s30 + $0xa8] sm:$0xff] }
 0x20a   : > { %v1812_v20 = vpack.c.bf16 %v1807_v37, %v1806_v16  ;;  %v3468_v45 = vor.u32 %v3467_v1, %v3463_v47  ;;  %v3735_v43 = vrot.slane %v6130_v49, 1  ;;  %v1941_v35 = vpack.c.bf16 %v1920_v33, %v1919_v58 }
 0x20c   : > { %5879 = vmatmul.msk.bf16.gmra.mxu2 %vm988_vm3, %v1811_v26  ;;  %v3445_v26 = vpack.c.b16 %v3429_v50, %v3429_v50 }
 0x20e   : > { %v3470_v59 = vshll.u32 %v3445_v26, 16  ;;  %v3736_v0 = vrot.slane %v3445_v26, 1 }
 0x210   : > { %v3472_v12 = vrot.slane %v3470_v59, 1  ;;  %v3737_v4 = vsel %vm3734_vm4, %v3735_v43, %v3736_v0 }
 0x211   : > { %3783 = vrot.lane.b32.xlu1 %v3737_v4, %s6705_s21 }
 0x213   : > { %5889 = vmatmul.msk.bf16.gmra.mxu1 %vm1952_vm9, %v1938_v28  ;;  %v1921_v28 = vld [vmem:[%s7446_s30 + $0xb0] sm:$0xff] }
 0x214   : > { %v1942_v34 = vpack.c.bf16 %v1922_v30, %v1921_v28  ;;  %v1926_v30 = vld [vmem:[%s7446_s30 + $0xd8] sm:$0xff] }
 0x21a   : > { %v6535_v53 = vpop.permute.xlu0 %6534 }
 0x21b   : > { %v6537_v27 = vunpack.i.h.bf16 %v6535_v53  ;;  %v6536_v14 = vunpack.i.l.bf16 %v6535_v53 }
 0x21c   : > { %5880 = vmatmul.msk.bf16.gmra.mxu2 %vm988_vm3, %v1812_v20 }
 0x21d   : > { %v1800_v54 = vsel %vm970_vm1, %v1792_v63, %v6536_v14  ;;  %v1801_v60 = vsel %vm970_vm1, %v1793_v11, %v6537_v27  ;;  %vm3461_vm1 = vsmask.f32 7424 }
 0x21e   : > { %v1808_v48 = vsel %vm979_vm2, %v1800_v54, %v7482_v17  ;;  %v1809_v8 = vsel %vm979_vm2, %v1801_v60, %v7482_v17  ;;  %v3473_v55 = vsel %vm3461_vm1, %v3468_v45, %v3472_v12 }
 0x21f   : > { %v1813_v13 = vpack.c.bf16 %v1809_v8, %v1808_v48  ;;  %3654 = vrot.lane.b32.xlu0 %v3473_v55, %s6713_s19 }
 0x220   : > { %v7549_v17 = vpop.f32.mrf.mxu1 }
 0x223   : > { %5890 = vmatmul.msk.bf16.gmra.mxu1 %vm1952_vm9, %v1939_v25 }
 0x228   : > { %v7571_v51 = vpop.f32.mrf.mxu1 }
 0x22c   : > { %5881 = vmatmul.msk.bf16.gmra.mxu2 %vm988_vm3, %v1813_v13 }
 0x230   : > { %v7578_v32 = vpop.f32.mrf.mxu1 }
 0x233   : > { %5891 = vmatmul.msk.bf16.gmra.mxu1 %vm1952_vm9, %v1940_v61 }
 0x238   : > { %v7592_v16 = vpop.f32.mrf.mxu1 }
 0x240   : > { %v7596_v11 = vpop.f32.mrf.mxu1 }
 0x243   : > { %5892 = vmatmul.msk.bf16.gmra.mxu1 %vm1952_vm9, %v1941_v35 }
 0x248   : > { %v7599_v42 = vpop.f32.mrf.mxu1 }
 0x250   : > { %v7603_v61 = vpop.f32.mrf.mxu1 }
 0x253   : > { %5893 = vmatmul.msk.bf16.gmra.mxu1 %vm1952_vm9, %v1942_v34 }
 0x258   : > { %v7608_v0 = vpop.f32.mrf.mxu1 }
 0x27f   : > { %v1871_v37 = vpop.f32.mrf.mxu2 }
 0x280   : > { %v1872_v23 = vadd.f32 %v7590_v3, %v1871_v37  ;;  %v7612_v37 = vpop.f32.mrf.mxu1 }
 0x282   : > { %v1891_v20 = vmax.f32 %v1872_v23, 0.0 }
 0x284   : > { %v2134_v57 = vrot.slane %v1891_v20, 1  ;;  %v2135_v52 = vrot.slane %v1891_v20, 2  ;;  %v2136_v56 = vrot.slane %v1891_v20, 3  ;;  %v2137_v53 = vrot.slane %v1891_v20, 4 }
 0x285   : > { %v2138_v10 = vrot.slane %v1891_v20, 5  ;;  %v2139_v21 = vrot.slane %v1891_v20, 6  ;;  %v2190_v27 = vperm.slane %v1891_v20, 0  ;;  %v2140_v14 = vrot.slane %v1891_v20, 7 }
 0x286   : > { %v2191_v24 = vperm.slane %v2134_v57, 0  ;;  %v2192_v18 = vperm.slane %v2135_v52, 0  ;;  %v2193_v63 = vperm.slane %v2136_v56, 0  ;;  %v2194_v54 = vperm.slane %v2137_v53, 0  ;;  %v1923_v57 = vld [vmem:[%s7446_s30 + $0xc0] sm:$0xff]  ;;  %v1924_v52 = vld [vmem:[%s7446_s30 + $0xc8] sm:$0xff] }
 0x287   : > { %2376 = vst [vmem:[#allocation1] ss:$4 sm:$0xff] %v2190_v27  ;;  %v2195_v60 = vperm.slane %v2138_v10, 0  ;;  %v2196_v22 = vperm.slane %v2139_v21, 0  ;;  %v2197_v5 = vperm.slane %v2140_v14, 0  ;;  %v1873_v48 = vpop.f32.mrf.mxu2  ;;  %v1943_v10 = vpack.c.bf16 %v1924_v52, %v1923_v57 }
 0x288   : > { %2378 = vst [vmem:[#allocation1 + $0x1] ss:$4 sm:$0xff] %v2191_v24  ;;  %v1874_v8 = vadd.f32 %v7590_v3, %v1873_v48  ;;  %v7617_v48 = vpop.f32.mrf.mxu1 }
 0x289   : > { %2380 = vst [vmem:[#allocation1 + $0x2] ss:$4 sm:$0xff] %v2192_v18  ;;  %5894 = vmatmul.msk.bf16.gmra.mxu1 %vm1952_vm9, %v1943_v10 }
 0x28a   : > { %2382 = vst [vmem:[#allocation1 + $0x3] ss:$4 sm:$0xff] %v2193_v63  ;;  %v1892_v15 = vmax.f32 %v1874_v8, 0.0 }
 0x28b   : > { %2384 = vst [vmem:[#allocation1 + $0x20] ss:$4 sm:$0xff] %v2194_v54 }
 0x28c   : > { %2386 = vst [vmem:[#allocation1 + $0x21] ss:$4 sm:$0xff] %v2195_v60  ;;  %v2141_v7 = vrot.slane %v1892_v15, 1  ;;  %v2142_v62 = vrot.slane %v1892_v15, 2  ;;  %v2143_v9 = vrot.slane %v1892_v15, 3  ;;  %v2144_v38 = vrot.slane %v1892_v15, 4 }
 0x28d   : > { %2388 = vst [vmem:[#allocation1 + $0x22] ss:$4 sm:$0xff] %v2196_v22  ;;  %v2198_v39 = vperm.slane %v1892_v15, 0  ;;  %v2145_v31 = vrot.slane %v1892_v15, 5  ;;  %v2146_v50 = vrot.slane %v1892_v15, 6  ;;  %v2147_v19 = vrot.slane %v1892_v15, 7 }
 0x28e   : > { %2390 = vst [vmem:[#allocation1 + $0x23] ss:$4 sm:$0xff] %v2197_v5  ;;  %v2199_v44 = vperm.slane %v2141_v7, 0  ;;  %v2200_v26 = vperm.slane %v2142_v62, 0  ;;  %v2201_v47 = vperm.slane %v2143_v9, 0  ;;  %v2202_v1 = vperm.slane %v2144_v38, 0 }
 0x28f   : > { %v2203_v2 = vperm.slane %v2145_v31, 0  ;;  %v2204_v41 = vperm.slane %v2146_v50, 0  ;;  %v2205_v12 = vperm.slane %v2147_v19, 0  ;;  %v1876_v49 = vpop.f32.mrf.mxu2 }
 0x290   : > { %v1877_v55 = vadd.f32 %v7590_v3, %v1876_v49  ;;  %v7621_v62 = vpop.f32.mrf.mxu1 }
 0x291   : > { %v2391_v13 = vld.sshfl [vmem:[#allocation1] sm:$0xff pattern:$0x73625140] }
 0x292   : > { %2393 = vst [vmem:[#allocation1] ss:$4 sm:$0xff] %v2190_v27  ;;  %v1893_v4 = vmax.f32 %v1877_v55, 0.0 }
 0x293   : > { %2394 = vst [vmem:[#allocation1 + $0x1] ss:$4 sm:$0xff] %v2191_v24 }
 0x294   : > { %2395 = vst [vmem:[#allocation1 + $0x2] ss:$4 sm:$0xff] %v2192_v18  ;;  %v2148_v35 = vrot.slane %v1893_v4, 1  ;;  %v2149_v23 = vrot.slane %v1893_v4, 2  ;;  %v2150_v20 = vrot.slane %v1893_v4, 3  ;;  %v2151_v56 = vrot.slane %v1893_v4, 4 }
 0x295   : > { %v2392_v6 = vld.sshfl [vmem:[#allocation1 + $0x20] sm:$0xff pattern:$0x73625140]  ;;  %2396 = vst [vmem:[#allocation1 + $0x3] ss:$4 sm:$0xff] %v2193_v63  ;;  %v2206_v53 = vperm.slane %v1893_v4, 0 }
 0x296   : > { %2397 = vst [vmem:[#allocation1 + $0x20] ss:$4 sm:$0xff] %v2194_v54  ;;  %v6538_v25 = vpack.i.bf16 %v2392_v6, %v2391_v13  ;;  %v2152_v27 = vrot.slane %v1893_v4, 5  ;;  %v2207_v14 = vperm.slane %v2148_v35, 0  ;;  %v2153_v24 = vrot.slane %v1893_v4, 6 }
 0x297   : > { %2398 = vst [vmem:[#allocation1 + $0x21] ss:$4 sm:$0xff] %v2195_v60  ;;  %v2208_v18 = vperm.slane %v2149_v23, 0  ;;  %v2154_v63 = vrot.slane %v1893_v4, 7  ;;  %v2209_v54 = vperm.slane %v2150_v20, 0  ;;  %v2210_v60 = vperm.slane %v2151_v56, 0  ;;  %v1878_v6 = vpop.f32.mrf.mxu2 }
 0x298   : > { %2399 = vst [vmem:[#allocation1 + $0x22] ss:$4 sm:$0xff] %v2196_v22  ;;  %6539 = vrot.lane.b32.xlu1 %v6538_v25, %s6714_s25  ;;  %v2212_v8 = vperm.slane %v2153_v24, 0  ;;  %v1879_v28 = vadd.f32 %v7590_v3, %v1878_v6  ;;  %v1925_v25 = vld [vmem:[%s7446_s30 + $0xd0] sm:$0xff]  ;;  %v7627_v50 = vpop.f32.mrf.mxu1  ;;  %v1927_v23 = vld [vmem:[%s7446_s30 + $0xe0] sm:$0xff]  ;;  %v1928_v20 = vld [vmem:[%s7446_s30 + $0xe8] sm:$0xff] }
 0x299   : > { %2400 = vst [vmem:[#allocation1 + $0x23] ss:$4 sm:$0xff] %v2197_v5  ;;  %v2211_v5 = vperm.slane %v2152_v27, 0  ;;  %v2213_v15 = vperm.slane %v2154_v63, 0  ;;  %v1944_v9 = vpack.c.bf16 %v1926_v30, %v1925_v25  ;;  %v1945_v52 = vpack.c.bf16 %v1928_v20, %v1927_v23 }
 0x29a   : > { %v1894_v34 = vmax.f32 %v1879_v28, 0.0 }
 0x29b   : > { %5895 = vmatmul.msk.bf16.gmra.mxu1 %vm1952_vm9, %v1944_v9 }
 0x29c   : > { %v2401_v40 = vld.sshfl [vmem:[#allocation1] sm:$0xff pattern:$0x73625140]  ;;  %v2156_v31 = vrot.slane %v1894_v34, 2  ;;  %v2214_v19 = vperm.slane %v1894_v34, 0 }
 0x29d   : > { %2403 = vst [vmem:[#allocation1] ss:$4 sm:$0xff] %v2198_v39 }
 0x29e   : > { %2404 = vst [vmem:[#allocation1 + $0x1] ss:$4 sm:$0xff] %v2199_v44 }
 0x29f   : > { %2405 = vst [vmem:[#allocation1 + $0x2] ss:$4 sm:$0xff] %v2200_v26  ;;  %v1881_v57 = vpop.f32.mrf.mxu2 }
 0x2a0   : > { %v2402_v59 = vld.sshfl [vmem:[#allocation1 + $0x20] sm:$0xff pattern:$0x73625140]  ;;  %2406 = vst [vmem:[#allocation1 + $0x3] ss:$4 sm:$0xff] %v2201_v47  ;;  %v7629_v35 = vpop.f32.mrf.mxu1  ;;  %v1882_v56 = vadd.f32 %v7590_v3, %v1881_v57 }
 0x2a1   : > { %2407 = vst [vmem:[#allocation1 + $0x20] ss:$4 sm:$0xff] %v2202_v1  ;;  %v6543_v45 = vpack.i.bf16 %v2401_v40, %v2402_v59  ;;  %v2155_v40 = vrot.slane %v1894_v34, 1 }
 0x2a2   : > { %2408 = vst [vmem:[#allocation1 + $0x21] ss:$4 sm:$0xff] %v2203_v2  ;;  %v1895_v10 = vmax.f32 %v1882_v56, 0.0 }
 0x2a3   : > { %2409 = vst [vmem:[#allocation1 + $0x22] ss:$4 sm:$0xff] %v2204_v41  ;;  %6544 = vrot.lane.b32.xlu2 %v6543_v45, %s6714_s25  ;;  %v2215_v59 = vperm.slane %v2155_v40, 0  ;;  %v2161_v45 = vrot.slane %v1894_v34, 7 }
 0x2a4   : > { %2410 = vst [vmem:[#allocation1 + $0x23] ss:$4 sm:$0xff] %v2205_v12  ;;  %v2162_v24 = vrot.slane %v1895_v10, 1  ;;  %v2164_v63 = vrot.slane %v1895_v10, 3  ;;  %v2167_v28 = vrot.slane %v1895_v10, 6  ;;  %v2168_v30 = vrot.slane %v1895_v10, 7 }
 0x2a6   : > { %v2225_v9 = vperm.slane %v2164_v63, 0  ;;  %v2228_v40 = vperm.slane %v2167_v28, 0 }
 0x2a7   : > { %v2411_v43 = vld.sshfl [vmem:[#allocation1] sm:$0xff pattern:$0x73625140] }
 0x2a8   : > { %2413 = vst [vmem:[#allocation1] ss:$4 sm:$0xff] %v2198_v39 }
 0x2a9   : > { %2414 = vst [vmem:[#allocation1 + $0x1] ss:$4 sm:$0xff] %v2199_v44  ;;  %v2157_v44 = vrot.slane %v1894_v34, 3 }
 0x2aa   : > { %2415 = vst [vmem:[#allocation1 + $0x2] ss:$4 sm:$0xff] %v2200_v26  ;;  %v2158_v26 = vrot.slane %v1894_v34, 4 }
 0x2ab   : > { %v2412_v58 = vld.sshfl [vmem:[#allocation1 + $0x20] sm:$0xff pattern:$0x73625140]  ;;  %2416 = vst [vmem:[#allocation1 + $0x3] ss:$4 sm:$0xff] %v2201_v47  ;;  %5896 = vmatmul.msk.bf16.gmra.mxu1 %vm1952_vm9, %v1945_v52 }
 0x2ac   : > { %2417 = vst [vmem:[#allocation1 + $0x20] ss:$4 sm:$0xff] %v2202_v1  ;;  %v6548_v33 = vpack.i.bf16 %v2412_v58, %v2411_v43  ;;  %v2159_v1 = vrot.slane %v1894_v34, 5  ;;  %v2218_v49 = vperm.slane %v2158_v26, 0  ;;  %v1883_v26 = vpop.f32.mrf.mxu2 }
 0x2ad   : > { %2418 = vst [vmem:[#allocation1 + $0x21] ss:$4 sm:$0xff] %v2203_v2  ;;  %v2160_v2 = vrot.slane %v1894_v34, 6 }
 0x2ae   : > { %2419 = vst [vmem:[#allocation1 + $0x22] ss:$4 sm:$0xff] %v2204_v41  ;;  %6549 = vrot.lane.b32.xlu0 %v6548_v33, %s6714_s25  ;;  %v2216_v41 = vperm.slane %v2156_v31, 0  ;;  %v2219_v43 = vperm.slane %v2159_v1, 0  ;;  %v2221_v33 = vperm.slane %v2161_v45, 0 }
 0x2af   : > { %2420 = vst [vmem:[#allocation1 + $0x23] ss:$4 sm:$0xff] %v2205_v12  ;;  %v2217_v12 = vperm.slane %v2157_v44, 0  ;;  %v2220_v4 = vperm.slane %v2160_v2, 0  ;;  %v2229_v44 = vperm.slane %v2168_v30, 0 }
 0x2b2   : > { %v2421_v21 = vld.sshfl [vmem:[#allocation1] sm:$0xff pattern:$0x73625140] }
 0x2b3   : > { %2423 = vst [vmem:[#allocation1] ss:$4 sm:$0xff] %v2206_v53 }
 0x2b4   : > { %2424 = vst [vmem:[#allocation1 + $0x1] ss:$4 sm:$0xff] %v2207_v14 }
 0x2b5   : > { %2425 = vst [vmem:[#allocation1 + $0x2] ss:$4 sm:$0xff] %v2208_v18 }
 0x2b6   : > { %v2422_v22 = vld.sshfl [vmem:[#allocation1 + $0x20] sm:$0xff pattern:$0x73625140]  ;;  %2426 = vst [vmem:[#allocation1 + $0x3] ss:$4 sm:$0xff] %v2209_v54 }
 0x2b7   : > { %2427 = vst [vmem:[#allocation1 + $0x20] ss:$4 sm:$0xff] %v2210_v60  ;;  %v6553_v13 = vpack.i.bf16 %v2421_v21, %v2422_v22  ;;  %v7636_v21 = vpop.f32.mrf.mxu1  ;;  %v2165_v22 = vrot.slane %v1895_v10, 4 }
 0x2b8   : > { %2428 = vst [vmem:[#allocation1 + $0x21] ss:$4 sm:$0xff] %v2211_v5 }
 0x2b9   : > { %2429 = vst [vmem:[#allocation1 + $0x22] ss:$4 sm:$0xff] %v2212_v8  ;;  %6554 = vrot.lane.b32.xlu1 %v6553_v13, %s6714_s25  ;;  %v2166_v13 = vrot.slane %v1895_v10, 5  ;;  %v2226_v34 = vperm.slane %v2165_v22, 0 }
 0x2ba   : > { %2430 = vst [vmem:[#allocation1 + $0x23] ss:$4 sm:$0xff] %v2213_v15 }
 0x2bd   : > { %v2431_v7 = vld.sshfl [vmem:[#allocation1] sm:$0xff pattern:$0x73625140] }
 0x2be   : > { %2433 = vst [vmem:[#allocation1] ss:$4 sm:$0xff] %v2206_v53 }
 0x2bf   : > { %2434 = vst [vmem:[#allocation1 + $0x1] ss:$4 sm:$0xff] %v2207_v14  ;;  %v7641_v6 = vpop.f32.mrf.mxu1 }
 0x2c0   : > { %2435 = vst [vmem:[#allocation1 + $0x2] ss:$4 sm:$0xff] %v2208_v18  ;;  %v2163_v18 = vrot.slane %v1895_v10, 2 }
 0x2c1   : > { %v2432_v38 = vld.sshfl [vmem:[#allocation1 + $0x20] sm:$0xff pattern:$0x73625140]  ;;  %2436 = vst [vmem:[#allocation1 + $0x3] ss:$4 sm:$0xff] %v2209_v54  ;;  %v1929_v54 = vld [vmem:[%s7446_s30 + $0xf0] sm:$0xff] }
 0x2c2   : > { %2437 = vst [vmem:[#allocation1 + $0x20] ss:$4 sm:$0xff] %v2210_v60  ;;  %v6558_v39 = vpack.i.bf16 %v2432_v38, %v2431_v7  ;;  %v1930_v60 = vld [vmem:[%s7446_s30 + $0xf8] sm:$0xff]  ;;  %v2224_v7 = vperm.slane %v2163_v18, 0 }
 0x2c3   : > { %2438 = vst [vmem:[#allocation1 + $0x21] ss:$4 sm:$0xff] %v2211_v5  ;;  %v2222_v5 = vperm.slane %v1895_v10, 0  ;;  %v1946_v25 = vpack.c.bf16 %v1930_v60, %v1929_v54 }
 0x2c4   : > { %2439 = vst [vmem:[#allocation1 + $0x22] ss:$4 sm:$0xff] %v2212_v8  ;;  %6559 = vrot.lane.b32.xlu2 %v6558_v39, %s6714_s25  ;;  %v2227_v39 = vperm.slane %v2166_v13, 0 }
 0x2c5   : > { %2440 = vst [vmem:[#allocation1 + $0x23] ss:$4 sm:$0xff] %v2213_v15  ;;  %v2223_v15 = vperm.slane %v2162_v24, 0  ;;  %5897 = vmatmul.msk.bf16.gmra.mxu1 %vm1952_vm9, %v1946_v25 }
 0x2c8   : > { %v2441_v47 = vld.sshfl [vmem:[#allocation1] sm:$0xff pattern:$0x73625140] }
 0x2c9   : > { %2443 = vst [vmem:[#allocation1] ss:$4 sm:$0xff] %v2214_v19 }
 0x2ca   : > { %2444 = vst [vmem:[#allocation1 + $0x1] ss:$4 sm:$0xff] %v2215_v59 }
 0x2cb   : > { %2445 = vst [vmem:[#allocation1 + $0x2] ss:$4 sm:$0xff] %v2216_v41 }
 0x2cc   : > { %v2442_v55 = vld.sshfl [vmem:[#allocation1 + $0x20] sm:$0xff pattern:$0x73625140]  ;;  %2446 = vst [vmem:[#allocation1 + $0x3] ss:$4 sm:$0xff] %v2217_v12 }
 0x2cd   : > { %2447 = vst [vmem:[#allocation1 + $0x20] ss:$4 sm:$0xff] %v2218_v49  ;;  %v6563_v58 = vpack.i.bf16 %v2441_v47, %v2442_v55  ;;  %v1884_v47 = vadd.f32 %v7590_v3, %v1883_v26 }
 0x2ce   : > { %2448 = vst [vmem:[#allocation1 + $0x21] ss:$4 sm:$0xff] %v2219_v43 }
 0x2cf   : > { %2449 = vst [vmem:[#allocation1 + $0x22] ss:$4 sm:$0xff] %v2220_v4  ;;  %6564 = vrot.lane.b32.xlu2 %v6563_v58, %s6714_s25 }
 0x2d0   : > { %2450 = vst [vmem:[#allocation1 + $0x23] ss:$4 sm:$0xff] %v2221_v33 }
 0x2d3   : > { %v2451_v53 = vld.sshfl [vmem:[#allocation1] sm:$0xff pattern:$0x73625140] }
 0x2d4   : > { %2453 = vst [vmem:[#allocation1] ss:$4 sm:$0xff] %v2214_v19  ;;  %v7645_v19 = vpop.f32.mrf.mxu1 }
 0x2d5   : > { %2454 = vst [vmem:[#allocation1 + $0x1] ss:$4 sm:$0xff] %v2215_v59  ;;  %v7648_v59 = vmax.f32 %v1884_v47, 0.0 }
 0x2d6   : > { %2455 = vst [vmem:[#allocation1 + $0x2] ss:$4 sm:$0xff] %v2216_v41 }
 0x2d7   : > { %v2452_v27 = vld.sshfl [vmem:[#allocation1 + $0x20] sm:$0xff pattern:$0x73625140]  ;;  %2456 = vst [vmem:[#allocation1 + $0x3] ss:$4 sm:$0xff] %v2217_v12  ;;  %v2169_v12 = vrot.slane %v7648_v59, 1 }
 0x2d8   : > { %2457 = vst [vmem:[#allocation1 + $0x20] ss:$4 sm:$0xff] %v2218_v49  ;;  %v6568_v14 = vpack.i.bf16 %v2452_v27, %v2451_v53  ;;  %v2170_v49 = vrot.slane %v7648_v59, 2  ;;  %v2171_v55 = vrot.slane %v7648_v59, 3  ;;  %v2230_v58 = vperm.slane %v7648_v59, 0 }
 0x2d9   : > { %2458 = vst [vmem:[#allocation1 + $0x21] ss:$4 sm:$0xff] %v2219_v43  ;;  %v7659_v43 = vld [vmem:[%s9360_s13] ss:$0 sm:$0xff]  ;;  %v2173_v20 = vrot.slane %v7648_v59, 5  ;;  %v2231_v57 = vperm.slane %v2169_v12, 0 }
 0x2da   : > { %2459 = vst [vmem:[#allocation1 + $0x22] ss:$4 sm:$0xff] %v2220_v4  ;;  %6569 = vrot.lane.b32.xlu2 %v6568_v14, %s6714_s25  ;;  %v2172_v4 = vrot.slane %v7648_v59, 4  ;;  %v2174_v52 = vrot.slane %v7648_v59, 6  ;;  %v2232_v56 = vperm.slane %v2170_v49, 0  ;;  %v2175_v53 = vrot.slane %v7648_v59, 7 }
 0x2db   : > { %2460 = vst [vmem:[#allocation1 + $0x23] ss:$4 sm:$0xff] %v2221_v33  ;;  %v1886_v33 = vpop.f32.mrf.mxu2  ;;  %v2233_v10 = vperm.slane %v2171_v55, 0  ;;  %v7671_v24 = vadd.f32 %v7659_v43, %v7549_v17  ;;  %v7675_v63 = vadd.f32 %v7659_v43, %v7571_v51  ;;  %v2020_v54 = vadd.f32 %v7659_v43, %v7578_v32 }
 0x2dc   : > { %v7650_v45 = vpop.f32.mrf.mxu1  ;;  %v1887_v27 = vadd.f32 %v7590_v3, %v1886_v33  ;;  %v2234_v18 = vperm.slane %v2172_v4, 0  ;;  %v2022_v60 = vadd.f32 %v7659_v43, %v7592_v16  ;;  %v7687_v17 = vadd.f32 %v7659_v43, %v7599_v42 }
 0x2dd   : > { %v2236_v13 = vperm.slane %v2174_v52, 0  ;;  %v2096_v16 = vmax.f32 %v2020_v54, 0.0 }
 0x2de   : > { %v2461_v8 = vld.sshfl [vmem:[#allocation1] sm:$0xff pattern:$0x73625140]  ;;  %v7689_v32 = vmax.f32 %v1887_v27, 0.0  ;;  %v2097_v28 = vmax.f32 %v2022_v60, 0.0  ;;  %v2099_v25 = vmax.f32 %v7687_v17, 0.0 }
 0x2df   : > { %2463 = vst [vmem:[#allocation1] ss:$4 sm:$0xff] %v2222_v5 }
 0x2e0   : > { %2464 = vst [vmem:[#allocation1 + $0x1] ss:$4 sm:$0xff] %v2223_v15  ;;  %v2179_v12 = vrot.slane %v7689_v32, 4  ;;  %v2180_v49 = vrot.slane %v7689_v32, 5  ;;  %v2181_v33 = vrot.slane %v7689_v32, 6 }
 0x2e1   : > { %2465 = vst [vmem:[#allocation1 + $0x2] ss:$4 sm:$0xff] %v2224_v7 }
 0x2e2   : > { %v2462_v38 = vld.sshfl [vmem:[#allocation1 + $0x20] sm:$0xff pattern:$0x73625140]  ;;  %2466 = vst [vmem:[#allocation1 + $0x3] ss:$4 sm:$0xff] %v2225_v9 }
 0x2e3   : > { %2467 = vst [vmem:[#allocation1 + $0x20] ss:$4 sm:$0xff] %v2226_v34  ;;  %v6573_v31 = vpack.i.bf16 %v2461_v8, %v2462_v38  ;;  %v7683_v8 = vadd.f32 %v7659_v43, %v7596_v11  ;;  %v2094_v11 = vmax.f32 %v7671_v24, 0.0  ;;  %v1888_v30 = vpop.f32.mrf.mxu2  ;;  %v2176_v38 = vrot.slane %v7689_v32, 1  ;;  %v2325_v24 = vld [vmem:[#allocation2 + $0x14] sm:$0x1] }
 0x2e4   : > { %2468 = vst [vmem:[#allocation1 + $0x21] ss:$4 sm:$0xff] %v2227_v39  ;;  %v7667_v14 = vpop.f32.mrf.mxu1  ;;  %v1889_v59 = vadd.f32 %v7590_v3, %v1888_v30  ;;  %v7734_v30 = vperm.slane %v2181_v33, 0 }
 0x2e5   : > { %2469 = vst [vmem:[#allocation1 + $0x22] ss:$4 sm:$0xff] %v2228_v40  ;;  %6574 = vrot.lane.b32.xlu2 %v6573_v31, %s6714_s25  ;;  %v2098_v42 = vmax.f32 %v7683_v8, 0.0  ;;  %v7713_v60 = vperm.slane %v2176_v38, 0 }
 0x2e6   : > { %2470 = vst [vmem:[#allocation1 + $0x23] ss:$4 sm:$0xff] %v2229_v44 }
 0x2e9   : > { %v2471_v1 = vld.sshfl [vmem:[#allocation1] sm:$0xff pattern:$0x73625140] }
 0x2ea   : > { %2473 = vst [vmem:[#allocation1] ss:$4 sm:$0xff] %v2222_v5  ;;  %v2235_v5 = vperm.slane %v2173_v20, 0  ;;  %v2328_v20 = vld [vmem:[#allocation2 + $0x20] sm:$0x1] }
 0x2eb   : > { %2474 = vst [vmem:[#allocation1 + $0x1] ss:$4 sm:$0xff] %v2223_v15  ;;  %v2237_v15 = vperm.slane %v2175_v53, 0  ;;  %v7711_v53 = vmax.f32 %v1889_v59, 0.0 }
 0x2ec   : > { %2475 = vst [vmem:[#allocation1 + $0x2] ss:$4 sm:$0xff] %v2224_v7  ;;  %v2095_v7 = vmax.f32 %v7675_v63, 0.0  ;;  %v7700_v47 = vpop.f32.mrf.mxu1  ;;  %v7918_v63 = vld [vmem:[#allocation2 + $0x2c] sm:$0x1] }
 0x2ed   : > { %v2472_v2 = vld.sshfl [vmem:[#allocation1 + $0x20] sm:$0xff pattern:$0x73625140]  ;;  %2476 = vst [vmem:[#allocation1 + $0x3] ss:$4 sm:$0xff] %v2225_v9 }
 0x2ee   : > { %2477 = vst [vmem:[#allocation1 + $0x20] ss:$4 sm:$0xff] %v2226_v34  ;;  %v6578_v41 = vpack.i.bf16 %v2472_v2, %v2471_v1  ;;  %v2272_v9 = vld [vmem:[#allocation2 + $0x18] sm:$0x1]  ;;  %v2178_v1 = vrot.slane %v7689_v32, 3 }
 0x2ef   : > { %2478 = vst [vmem:[#allocation1 + $0x21] ss:$4 sm:$0xff] %v2227_v39  ;;  %v2273_v39 = vsel %vm7567_vm15, 0, %v2272_v9 }
 0x2f0   : > { %2479 = vst [vmem:[#allocation1 + $0x22] ss:$4 sm:$0xff] %v2228_v40  ;;  %6579 = vrot.lane.b32.xlu2 %v6578_v41, %s6714_s25 }
 0x2f1   : > { %2480 = vst [vmem:[#allocation1 + $0x23] ss:$4 sm:$0xff] %v2229_v44  ;;  %v2177_v44 = vrot.slane %v7689_v32, 2 }
 0x2f2   : > { %2274 = vst [vmem:[#allocation2 + $0x18] sm:$0x1] %v2273_v39  ;;  %v3655_v39 = vpop.permute.xlu0 %3654 }
 0x2f4   : > { %v2481_v23 = vld.sshfl [vmem:[#allocation1] sm:$0xff pattern:$0x73625140] }
 0x2f5   : > { %2483 = vst [vmem:[#allocation1] ss:$4 sm:$0xff] %v2230_v58 }
 0x2f6   : > { %2484 = vst [vmem:[#allocation1 + $0x1] ss:$4 sm:$0xff] %v2231_v57 }
 0x2f7   : > { %2485 = vst [vmem:[#allocation1 + $0x2] ss:$4 sm:$0xff] %v2232_v56 }
 0x2f8   : > { %v2482_v22 = vld.sshfl [vmem:[#allocation1 + $0x20] sm:$0xff pattern:$0x73625140]  ;;  %2486 = vst [vmem:[#allocation1 + $0x3] ss:$4 sm:$0xff] %v2233_v10 }
 0x2f9   : > { %2487 = vst [vmem:[#allocation1 + $0x20] ss:$4 sm:$0xff] %v2234_v18  ;;  %v6583_v51 = vpack.i.bf16 %v2481_v23, %v2482_v22  ;;  %v2182_v23 = vrot.slane %v7689_v32, 7 }
 0x2fa   : > { %2488 = vst [vmem:[#allocation1 + $0x21] ss:$4 sm:$0xff] %v2235_v5 }
 0x2fb   : > { %2489 = vst [vmem:[#allocation1 + $0x22] ss:$4 sm:$0xff] %v2236_v13  ;;  %6584 = vrot.lane.b32.xlu2 %v6583_v51, %s6714_s25  ;;  %v7719_v51 = vperm.slane %v2177_v44, 0 }
 0x2fc   : > { %2490 = vst [vmem:[#allocation1 + $0x23] ss:$4 sm:$0xff] %v2237_v15 }
 0x2fd   : > { %v6545_v34 = vpop.permute.xlu2 %6544 }
 0x2fe   : > { %v6547_v40 = vunpack.i.h.bf16 %v6545_v34  ;;  %v6546_v31 = vunpack.i.l.bf16 %v6545_v34  ;;  %v7737_v34 = vperm.slane %v2182_v23, 0 }
 0x2ff   : > { %v2491_v26 = vld.sshfl [vmem:[#allocation1] sm:$0xff pattern:$0x73625140] }
 0x300   : > { %2493 = vst [vmem:[#allocation1] ss:$4 sm:$0xff] %v2230_v58  ;;  %v2641_v2 = vsel %vm1952_vm9, %v2096_v16, %v6547_v40  ;;  %v2642_v41 = vsel %vm1952_vm9, %v2097_v28, %v6546_v31  ;;  %v2238_v58 = vperm.slane %v7689_v32, 0  ;;  %v7730_v16 = vperm.slane %v2179_v12, 0  ;;  %v3784_v40 = vpop.permute.xlu1 %3783 }
 0x301   : > { %2494 = vst [vmem:[#allocation1 + $0x1] ss:$4 sm:$0xff] %v2231_v57  ;;  %v2673_v55 = vpack.c.bf16 %v2641_v2, %v2641_v2  ;;  %v2674_v4 = vpack.c.bf16 %v2642_v41, %v2642_v41  ;;  %v2329_v57 = vsel %vm7559_vm13, 0, %v2328_v20  ;;  %v7732_v28 = vperm.slane %v2180_v49, 0 }
 0x302   : > { %2495 = vst [vmem:[#allocation1 + $0x2] ss:$4 sm:$0xff] %v2232_v56  ;;  %v2184_v31 = vrot.slane %v7711_v53, 2  ;;  %v7752_v41 = vadd.f32 %v7659_v43, %v7603_v61  ;;  %v2185_v12 = vrot.slane %v7711_v53, 3  ;;  %v2186_v49 = vrot.slane %v7711_v53, 4 }
 0x303   : > { %v2492_v52 = vld.sshfl [vmem:[#allocation1 + $0x20] sm:$0xff pattern:$0x73625140]  ;;  %2496 = vst [vmem:[#allocation1 + $0x3] ss:$4 sm:$0xff] %v2233_v10  ;;  %v2723_v3 = vshrl.u32 %v2673_v55, 16 }
 0x304   : > { %v6588_v27 = vpack.i.bf16 %v2492_v52, %v2491_v26  ;;  %2497 = vst [vmem:[#allocation1 + $0x20] ss:$4 sm:$0xff] %v2234_v18  ;;  %v2731_v54 = vshrl.u32 %v2674_v4, 16  ;;  %v2726_v56 = vshll.u32 %v2673_v55, 16  ;;  %v7721_v10 = vperm.slane %v2178_v1, 0  ;;  %v7745_v26 = vpop.f32.mrf.mxu1 }
 0x305   : > { %2498 = vst [vmem:[#allocation1 + $0x21] ss:$4 sm:$0xff] %v2235_v5  ;;  %v7717_v22 = vrot.slane %v2723_v3, 7  ;;  %v3035_v5 = vld [vmem:[#allocation2 + $0x18] sm:$0xf]  ;;  %v2734_v59 = vshll.u32 %v2674_v4, 16 }
 0x306   : > { %6589 = vrot.lane.b32.xlu2 %v6588_v27, %s6714_s25  ;;  %2499 = vst [vmem:[#allocation1 + $0x22] ss:$4 sm:$0xff] %v2236_v13  ;;  %v2183_v13 = vrot.slane %v7711_v53, 1  ;;  %v2733_v38 = vrot.slane %v2731_v54, 7  ;;  %v2187_v55 = vrot.slane %v7711_v53, 5  ;;  %v2189_v4 = vrot.slane %v7711_v53, 7 }
 0x307   : > { %2500 = vst [vmem:[#allocation1 + $0x23] ss:$4 sm:$0xff] %v2237_v15  ;;  %v2728_v9 = vor.u32 %v2726_v56, %v7717_v22  ;;  %v4841_v15 = vsel %vm4839_vm7, %v7575_v46, %v3655_v39  ;;  %v2188_v46 = vrot.slane %v7711_v53, 6  ;;  %v2729_v33 = vrot.slane %v7717_v22, 4 }
 0x308   : > { %2330 = vst [vmem:[#allocation2 + $0x20] sm:$0x1] %v2329_v57  ;;  %v7748_v2 = vsel %vm979_vm2, %v4841_v15, %v3784_v40  ;;  %v2736_v23 = vor.u32 %v2734_v59, %v2733_v38  ;;  %v2246_v61 = vperm.slane %v7711_v53, 0  ;;  %v7764_v20 = vperm.slane %v2183_v13, 0 }
 0x309   : > { %v3036_v44 = vsel %vm7726_vm6, %v2728_v9, %v3035_v5  ;;  %v7766_v52 = vperm.slane %v2184_v31, 0  ;;  %v2738_v27 = vrot.slane %v2733_v38, 4  ;;  %v7777_v54 = vadd.f32 %v7659_v43, %v7608_v0 }
 0x30a   : > { %v2501_v1 = vld.sshfl [vmem:[#allocation1] sm:$0xff pattern:$0x73625140]  ;;  %3037 = vst [vmem:[#allocation2 + $0x18] sm:$0xf] %v3036_v44  ;;  %v7781_v57 = vadd.f32 %v7659_v43, %v7612_v37  ;;  %v7785_v22 = vadd.f32 %v7659_v43, %v7617_v48  ;;  %v7789_v56 = vadd.f32 %v7659_v43, %v7621_v62  ;;  %v7792_v9 = vperm.slane %v2185_v12, 0 }
 0x30b   : > { %2503 = vst [vmem:[#allocation1] ss:$4 sm:$0xff] %v2238_v58  ;;  %v7796_v0 = vadd.f32 %v7659_v43, %v7627_v50  ;;  %v7800_v37 = vadd.f32 %v7659_v43, %v7629_v35  ;;  %v2100_v62 = vmax.f32 %v7752_v41, 0.0  ;;  %v7804_v38 = vperm.slane %v2186_v49, 0 }
 0x30c   : > { %2504 = vst [vmem:[#allocation1 + $0x1] ss:$4 sm:$0xff] %v7713_v60  ;;  %v7806_v39 = vperm.slane %v2187_v55, 0  ;;  %v2737_v50 = vsel %vm7771_vm12, %v2729_v33, %v2736_v23  ;;  %v7811_v40 = vperm.slane %v2188_v46, 0  ;;  %v7813_v31 = vperm.slane %v2189_v4, 0  ;;  %v6540_v4 = vpop.permute.xlu1 %6539  ;;  %v2064_v33 = vpop.f32.mrf.mxu1 }
 0x30d   : > { %2505 = vst [vmem:[#allocation1 + $0x2] ss:$4 sm:$0xff] %v7719_v51  ;;  %v7817_v35 = vadd.f32 %v7659_v43, %v7636_v21  ;;  %v2103_v59 = vmax.f32 %v7785_v22, 0.0  ;;  %v2104_v12 = vmax.f32 %v7789_v56, 0.0  ;;  %v2105_v21 = vmax.f32 %v7796_v0, 0.0 }
 0x30e   : > { %v2502_v5 = vld.sshfl [vmem:[#allocation1 + $0x20] sm:$0xff pattern:$0x73625140]  ;;  %2506 = vst [vmem:[#allocation1 + $0x3] ss:$4 sm:$0xff] %v7721_v10  ;;  %v7832_v55 = vadd.f32 %v7659_v43, %v7641_v6  ;;  %v7837_v23 = vadd.f32 %v7659_v43, %v7645_v19  ;;  %v7844_v6 = vadd.f32 %v7659_v43, %v7650_v45  ;;  %v7861_v45 = vadd.f32 %v7659_v43, %v7700_v47 }
 0x30f   : > { %v6593_v13 = vpack.i.bf16 %v2501_v1, %v2502_v5  ;;  %2507 = vst [vmem:[#allocation1 + $0x20] ss:$4 sm:$0xff] %v7730_v16  ;;  %v3039_v48 = vld [vmem:[#allocation2 + $0x20] sm:$0x1]  ;;  %v2102_v1 = vmax.f32 %v7781_v57, 0.0  ;;  %v6542_v5 = vunpack.i.h.bf16 %v6540_v4 }
 0x310   : > { %2508 = vst [vmem:[#allocation1 + $0x21] ss:$4 sm:$0xff] %v7732_v28  ;;  %v3040_v44 = vsel %vm7567_vm15, %v2738_v27, %v3039_v48  ;;  %v2269_v46 = vld [vmem:[#allocation2 + $0xc] sm:$0x1]  ;;  %v7968_v57 = vld [vmem:[#allocation2 + $0x30] sm:$0x1] }
 0x311   : > { %6594 = vrot.lane.b32.xlu2 %v6593_v13, %s6714_s25  ;;  %2509 = vst [vmem:[#allocation1 + $0x22] ss:$4 sm:$0xff] %v7734_v30  ;;  %v2270_v27 = vsel %vm7567_vm15, 0, %v2269_v46  ;;  %v6541_v13 = vunpack.i.l.bf16 %v6540_v4  ;;  %v2640_v19 = vsel %vm1952_vm9, %v2095_v7, %v6542_v5  ;;  %v2279_v53 = vsel %vm7567_vm15, 0, %v7968_v57 }
 0x312   : > { %2510 = vst [vmem:[#allocation1 + $0x23] ss:$4 sm:$0xff] %v7737_v34  ;;  %v7867_v32 = vpack.c.bf16 %v2640_v19, %v2640_v19 }
 0x313   : > { %3038 = vst.msk [vmem:[#allocation2 + $0x1c] sm:$0xf] %vm2254_vm11, %v2737_v50  ;;  %v7848_v50 = vadd.f32 %v7659_v43, %v7667_v14  ;;  %v7865_v14 = vadd.f32 %v7659_v43, %v7745_v26 }
 0x314   : > { %3041 = vst [vmem:[#allocation2 + $0x20] sm:$0x1] %v3040_v44  ;;  %v2639_v44 = vsel %vm1952_vm9, %v2094_v11, %v6541_v13  ;;  %v7873_v11 = vadd.f32 %v7659_v43, %v2064_v33  ;;  %v2714_v47 = vshrl.u32 %v7867_v32, 16 }
 0x315   : > { %v2511_v49 = vld.sshfl [vmem:[#allocation1] sm:$0xff pattern:$0x73625140]  ;;  %2271 = vst [vmem:[#allocation2 + $0xc] sm:$0x1] %v2270_v27 }
 0x316   : > { %2513 = vst [vmem:[#allocation1] ss:$4 sm:$0xff] %v2238_v58  ;;  %v2671_v58 = vpack.c.bf16 %v2639_v44, %v2639_v44  ;;  %v2716_v13 = vrot.slane %v2714_v47, 7  ;;  %v2066_v47 = vpop.f32.mrf.mxu1 }
 0x317   : > { %2514 = vst [vmem:[#allocation1 + $0x1] ss:$4 sm:$0xff] %v7713_v60 }
 0x318   : > { %2515 = vst [vmem:[#allocation1 + $0x2] ss:$4 sm:$0xff] %v7719_v51  ;;  %v2706_v27 = vshrl.u32 %v2671_v58, 16  ;;  %v2721_v33 = vrot.slane %v2716_v13, 4 }
 0x319   : > { %v2512_v60 = vld.sshfl [vmem:[#allocation1 + $0x20] sm:$0xff pattern:$0x73625140]  ;;  %2516 = vst [vmem:[#allocation1 + $0x3] ss:$4 sm:$0xff] %v7721_v10  ;;  %v2326_v10 = vsel %vm7559_vm13, 0, %v2325_v24 }
 0x31a   : > { %v6598_v4 = vpack.i.bf16 %v2512_v60, %v2511_v49  ;;  %2517 = vst [vmem:[#allocation1 + $0x20] ss:$4 sm:$0xff] %v7730_v16  ;;  %v7880_v5 = vld [vmem:[#allocation2 + $0x18] sm:$0xff]   ;;  %v2717_v16 = vshll.u32 %v7867_v32, 16  ;;  %v2709_v49 = vshll.u32 %v2671_v58, 16  ;;  %v7895_v44 = vrot.slane %v2706_v27, 7 }
 0x31b   : > { %2518 = vst [vmem:[#allocation1 + $0x21] ss:$4 sm:$0xff] %v7732_v28  ;;  %4407 = vrot.lane.b32.xlu0 %v7880_v5, %s6704_s20  ;;  %v4490_v28 = vshll.u32 %v7880_v5, 16  ;;  %v4488_v24 = vshrl.u32 %v7880_v5, 16  ;;  %v2281_v60 = vld [vmem:[#allocation2 + $0x3c] sm:$0x1] }
 0x31c   : > { %6599 = vrot.lane.b32.xlu2 %v6598_v4, %s6714_s25  ;;  %2519 = vst [vmem:[#allocation1 + $0x22] ss:$4 sm:$0xff] %v7734_v30  ;;  %v2282_v30 = vsel %vm7567_vm15, 0, %v2281_v60  ;;  %v2337_v4 = vld [vmem:[#allocation2 + $0x44] sm:$0x1] }
 0x31d   : > { %2520 = vst [vmem:[#allocation1 + $0x23] ss:$4 sm:$0xff] %v7737_v34  ;;  %v2338_v58 = vsel %vm7559_vm13, 0, %v2337_v4  ;;  %v7903_v34 = vadd.f32 %v7659_v43, %v2066_v47  ;;  %v7905_v27 = vld [vmem:[#allocation2 + $0x24] sm:$0x1]  ;;  %v4492_v46 = vrot.slane %v4490_v28, 1 }
 0x31e   : > { %2327 = vst [vmem:[#allocation2 + $0x14] sm:$0x1] %v2326_v10  ;;  %v6560_v32 = vpop.permute.xlu2 %6559  ;;  %v3028_v60 = vld [vmem:[#allocation2 + $0xc] sm:$0xf]  ;;  %v2712_v28 = vrot.slane %v7895_v44, 4 }
 0x31f   : > { %2283 = vst [vmem:[#allocation2 + $0x3c] sm:$0x1] %v2282_v30  ;;  %v6562_v19 = vunpack.i.h.bf16 %v6560_v32  ;;  %v6561_v51 = vunpack.i.l.bf16 %v6560_v32  ;;  %v2711_v30 = vor.u32 %v2709_v49, %v7895_v44  ;;  %v2719_v49 = vor.u32 %v2717_v16, %v2716_v13  ;;  %v2069_v16 = vpop.f32.mrf.mxu1 }
 0x320   : > { %v2521_v26 = vld.sshfl [vmem:[#allocation1] sm:$0xff pattern:$0x73625140]  ;;  %2339 = vst [vmem:[#allocation2 + $0x44] sm:$0x1] %v2338_v58  ;;  %v6550_v10 = vpop.permute.xlu0 %6549 }
 0x321   : > { %2523 = vst [vmem:[#allocation1] ss:$4 sm:$0xff] %v2246_v61  ;;  %v2648_v4 = vsel %vm1952_vm9, %v2103_v59, %v6562_v19  ;;  %v2647_v47 = vsel %vm1952_vm9, %v2102_v1, %v6561_v51  ;;  %v6552_v32 = vunpack.i.h.bf16 %v6550_v10  ;;  %v6551_v48 = vunpack.i.l.bf16 %v6550_v10  ;;  %v7928_v59 = vld [vmem:[#allocation2 + $0x48] sm:$0x1] }
 0x322   : > { %2524 = vst [vmem:[#allocation1 + $0x1] ss:$4 sm:$0xff] %v7764_v20  ;;  %v2680_v58 = vpack.c.bf16 %v2648_v4, %v2648_v4  ;;  %v2679_v7 = vpack.c.bf16 %v2647_v47, %v2647_v47  ;;  %v3029_v8 = vsel %vm7726_vm6, %v2711_v30, %v3028_v60  ;;  %v7957_v60 = vor.u32 %v4492_v46, %v4488_v24 }
 0x323   : > { %2525 = vst [vmem:[#allocation1 + $0x2] ss:$4 sm:$0xff] %v7766_v52  ;;  %v2644_v1 = vsel %vm1952_vm9, %v2099_v25, %v6552_v32  ;;  %v2643_v10 = vsel %vm1952_vm9, %v2098_v42, %v6551_v48 }
 0x324   : > { %v2522_v51 = vld.sshfl [vmem:[#allocation1 + $0x20] sm:$0xff pattern:$0x73625140]  ;;  %2526 = vst [vmem:[#allocation1 + $0x3] ss:$4 sm:$0xff] %v7792_v9  ;;  %v2782_v19 = vshrl.u32 %v2680_v58, 16  ;;  %v2676_v44 = vpack.c.bf16 %v2644_v1, %v2644_v1  ;;  %v7938_v25 = vpack.c.bf16 %v2643_v10, %v2643_v10 }
 0x325   : > { %v6603_v4 = vpack.i.bf16 %v2521_v26, %v2522_v51  ;;  %2527 = vst [vmem:[#allocation1 + $0x20] ss:$4 sm:$0xff] %v7804_v38  ;;  %v3032_v47 = vld [vmem:[#allocation2 + $0x14] sm:$0x1]  ;;  %v2774_v22 = vshrl.u32 %v2679_v7, 16  ;;  %v2785_v32 = vshll.u32 %v2680_v58, 16 }
 0x326   : > { %2528 = vst [vmem:[#allocation1 + $0x21] ss:$4 sm:$0xff] %v7806_v39  ;;  %v3033_v13 = vsel %vm7567_vm15, %v2721_v33, %v3032_v47  ;;  %v2784_v42 = vrot.slane %v2782_v19, 7  ;;  %v7948_v26 = vld [vmem:[#allocation2 + $0x50] sm:$0x1]  ;;  %v2777_v51 = vshll.u32 %v2679_v7, 16  ;;  %v2720_v33 = vsel %vm7771_vm12, %v2712_v28, %v2719_v49 }
 0x327   : > { %6604 = vrot.lane.b32.xlu2 %v6603_v4, %s6714_s25  ;;  %2529 = vst [vmem:[#allocation1 + $0x22] ss:$4 sm:$0xff] %v7811_v40  ;;  %v2776_v1 = vrot.slane %v2774_v22, 7  ;;  %v2748_v10 = vshrl.u32 %v2676_v44, 16  ;;  %v3060_v30 = vld [vmem:[#allocation2 + $0x44] sm:$0x1]  ;;  %v7963_v22 = vadd.f32 %v7659_v43, %v2069_v16 }
 0x328   : > { %2530 = vst [vmem:[#allocation1 + $0x23] ss:$4 sm:$0xff] %v7813_v31  ;;  %v2789_v19 = vrot.slane %v2784_v42, 4  ;;  %v2740_v47 = vshrl.u32 %v7938_v25, 16  ;;  %v2751_v58 = vshll.u32 %v2676_v44, 16  ;;  %v2787_v28 = vor.u32 %v2785_v32, %v2784_v42 }
 0x329   : > { %3034 = vst [vmem:[#allocation2 + $0x14] sm:$0x1] %v3033_v13  ;;  %v2780_v4 = vrot.slane %v2776_v1, 4  ;;  %v7960_v48 = vrot.slane %v2748_v10, 7  ;;  %v6565_v7 = vpop.permute.xlu2 %6564  ;;  %v7965_v17 = vld [vmem:[#allocation2 + $0x3c] sm:$0xf]  ;;  %v2779_v13 = vor.u32 %v2777_v51, %v2776_v1 }
 0x32a   : > { %3030 = vst [vmem:[#allocation2 + $0xc] sm:$0xf] %v3029_v8  ;;  %v2742_v49 = vrot.slane %v2740_v47, 7  ;;  %v2743_v46 = vshll.u32 %v7938_v25, 16  ;;  %v6567_v24 = vunpack.i.h.bf16 %v6565_v7  ;;  %v3061_v44 = vsel %vm7567_vm15, %v2789_v19, %v3060_v30  ;;  %v7983_v30 = vld [vmem:[#allocation2 + $0x38] sm:$0x1] }
 0x32b   : > { %v2531_v15 = vld.sshfl [vmem:[#allocation1] sm:$0xff pattern:$0x73625140]  ;;  %3031 = vst.msk [vmem:[#allocation2 + $0x10] sm:$0xf] %vm2254_vm11, %v2720_v33  ;;  %v2753_v16 = vor.u32 %v2751_v58, %v7960_v48  ;;  %v2341_v8 = vsel %vm7559_vm13, 0, %v7948_v26  ;;  %v6555_v42 = vpop.permute.xlu1 %6554  ;;  %v6566_v33 = vunpack.i.l.bf16 %v6565_v7  ;;  %v2788_v58 = vsel %vm7771_vm12, %v2780_v4, %v2787_v28 }
 0x32c   : > { %2533 = vst [vmem:[#allocation1] ss:$4 sm:$0xff] %v2246_v61  ;;  %v2755_v25 = vrot.slane %v7960_v48, 4  ;;  %v2746_v32 = vrot.slane %v2742_v49, 4  ;;  %v2649_v10 = vsel %vm1952_vm9, %v2104_v12, %v6567_v24  ;;  %v2116_v51 = vmax.f32 %v7963_v22, 0.0 }
 0x32d   : > { %2534 = vst [vmem:[#allocation1 + $0x1] ss:$4 sm:$0xff] %v7764_v20  ;;  %v7986_v1 = vpack.c.bf16 %v2649_v10, %v2649_v10  ;;  %v2335_v61 = vsel %vm7559_vm13, 0, %v7983_v30  ;;  %v2650_v20 = vsel %vm1952_vm9, %v2105_v21, %v6566_v33  ;;  %v6557_v12 = vunpack.i.h.bf16 %v6555_v42  ;;  %v8019_v28 = vld [vmem:[#allocation2 + $0x54] sm:$0x1] }
 0x32e   : > { %2535 = vst [vmem:[#allocation1 + $0x2] ss:$4 sm:$0xff] %v7766_v52  ;;  %v7998_v56 = vsel %vm7771_vm12, %v2746_v32, %v2753_v16  ;;  %v6556_v19 = vunpack.i.l.bf16 %v6555_v42  ;;  %v3057_v52 = vsel %vm7726_vm6, %v2779_v13, %v7965_v17  ;;  %v2682_v24 = vpack.c.bf16 %v2650_v20, %v2650_v20  ;;  %v2071_v17 = vpop.f32.mrf.mxu1 }
 0x32f   : > { %v2532_v47 = vld.sshfl [vmem:[#allocation1 + $0x20] sm:$0xff pattern:$0x73625140]  ;;  %2536 = vst [vmem:[#allocation1 + $0x3] ss:$4 sm:$0xff] %v7792_v9  ;;  %v2791_v7 = vshrl.u32 %v7986_v1, 16  ;;  %v8011_v0 = vor.u32 %v2743_v46, %v2742_v49  ;;  %v2645_v21 = vsel %vm1952_vm9, %v2100_v62, %v6557_v12  ;;  %v8027_v41 = vadd.f32 %v7659_v43, %v2071_v17 }
 0x330   : > { %v6608_v16 = vpack.i.bf16 %v2532_v47, %v2531_v15  ;;  %2537 = vst [vmem:[#allocation1 + $0x20] ss:$4 sm:$0xff] %v7804_v38  ;;  %v9382_v9 = vmax.f32 %v7777_v54, 0.0  ;;  %v3236_v42 = vld [vmem:[#allocation2 + $0x14] sm:$0x1]  ;;  %v2799_v15 = vshrl.u32 %v2682_v24, 16  ;;  %v8022_v32 = vpack.c.bf16 %v2645_v21, %v2645_v21 }
 0x331   : > { %2538 = vst [vmem:[#allocation1 + $0x21] ss:$4 sm:$0xff] %v7806_v39  ;;  %v2793_v13 = vrot.slane %v2791_v7, 7  ;;  %v8024_v38 = vld [vmem:[#allocation2 + $0x5c] sm:$0x1]  ;;  %v2794_v54 = vshll.u32 %v7986_v1, 16  ;;  %v3943_v10 = vunpack.c.l.b16 %v3236_v42 }
 0x332   : > { %v2646_v4 = vsel %vm1952_vm9, %v9382_v9, %v6556_v19  ;;  %6609 = vrot.lane.b32.xlu2 %v6608_v16, %s6714_s25  ;;  %2539 = vst [vmem:[#allocation1 + $0x22] ss:$4 sm:$0xff] %v7811_v40  ;;  %v2802_v62 = vshll.u32 %v2682_v24, 16  ;;  %v8032_v46 = vld [vmem:[#allocation2 + $0xc] sm:$0xff]   ;;  %v8037_v20 = vrot.slane %v2799_v15, 7  ;;  %v2757_v12 = vshrl.u32 %v8022_v32, 16 }
 0x333   : > { %v2678_v49 = vpack.c.bf16 %v2646_v4, %v2646_v4  ;;  %v8034_v39 = vld [vmem:[#allocation2 + $0xc] sm:$0xf0]  ;;  %2540 = vst [vmem:[#allocation1 + $0x23] ss:$4 sm:$0xff] %v7813_v31  ;;  %v2797_v33 = vrot.slane %v2793_v13, 4  ;;  %v2288_v40 = vsel %vm7567_vm15, 0, %v8019_v28  ;;  %v8051_v42 = vpack.c.b16 %v3943_v10, %v3943_v10 }
 0x334   : > { %3062 = vst [vmem:[#allocation2 + $0x44] sm:$0x1] %v3061_v44  ;;  %v2760_v1 = vshll.u32 %v8022_v32, 16  ;;  %v2344_v7 = vsel %vm7559_vm13, 0, %v8024_v38  ;;  %v6570_v24 = vpop.permute.xlu2 %6569  ;;  %v2804_v31 = vor.u32 %v2802_v62, %v8037_v20  ;;  %v2759_v16 = vrot.slane %v2757_v12, 7 }
 0x335   : > { %v2765_v19 = vshrl.u32 %v2678_v49, 16  ;;  %v2768_v47 = vshll.u32 %v2678_v49, 16  ;;  %3058 = vst [vmem:[#allocation2 + $0x3c] sm:$0xf] %v3057_v52  ;;  %v6572_v21 = vunpack.i.h.bf16 %v6570_v24  ;;  %v6571_v4 = vunpack.i.l.bf16 %v6570_v24  ;;  %v6637_v44 = vld [vmem:[#allocation2 + $0xc] sm:$0xe] }
 0x336   : > { %3059 = vst.msk [vmem:[#allocation2 + $0x40] sm:$0xf] %vm2254_vm11, %v2788_v58  ;;  %v9383_v17 = vsel %vm7567_vm15, 0, %v7905_v27  ;;  %v2805_v52 = vsel %vm7771_vm12, %v2797_v33, %v2804_v31  ;;  %v2806_v15 = vrot.slane %v8037_v20, 4  ;;  %v2763_v32 = vrot.slane %v2759_v16, 4  ;;  %v8063_v49 = vld [vmem:[#allocation2 + $0xc] sm:$0xff]  }
 0x337   : > { %v8049_v9 = vrot.slane %v2765_v19, 7  ;;  %2277 = vst [vmem:[#allocation2 + $0x24] sm:$0x1] %v9383_v17  ;;  %v9384_v62 = vmax.f32 %v7817_v35, 0.0  ;;  %v8065_v12 = vld [vmem:[#allocation2 + $0xc] sm:$0xf0] }
 0x338   : > { %v2541_v10 = vld.sshfl [vmem:[#allocation1] sm:$0xff pattern:$0x73625140]  ;;  %v9385_v27 = vsel %vm7559_vm13, 0, %v7918_v63  ;;  %v9386_v31 = vmax.f32 %v7800_v37, 0.0  ;;  %v4248_v17 = vrot.slane %v8051_v42, 1 }
 0x339   : > { %v2652_v58 = vsel %vm1952_vm9, %v9384_v62, %v6572_v21  ;;  %2333 = vst [vmem:[#allocation2 + $0x2c] sm:$0x1] %v9385_v27  ;;  %v2770_v19 = vor.u32 %v2768_v47, %v8049_v9  ;;  %v2772_v33 = vrot.slane %v8049_v9, 4  ;;  %v9387_v63 = vsel %vm7567_vm15, 0, %v7928_v59 }
 0x33a   : > { %v2684_v24 = vpack.c.bf16 %v2652_v58, %v2652_v58  ;;  %v2651_v35 = vsel %vm1952_vm9, %v9386_v31, %v6571_v4  ;;  %3045 = vst.msk [vmem:[#allocation2 + $0x28] sm:$0xf] %vm2254_vm11, %v7998_v56  ;;  %v2542_v62 = vld.sshfl [vmem:[#allocation1 + $0x20] sm:$0xff pattern:$0x73625140]  ;;  %v2796_v47 = vor.u32 %v2794_v54, %v2793_v13  ;;  %v3978_v13 = vshll.u32 %v8032_v46, 16 }
 0x33b   : > { %v2683_v21 = vpack.c.bf16 %v2651_v35, %v2651_v35  ;;  %2286 = vst [vmem:[#allocation2 + $0x48] sm:$0x1] %v9387_v63  ;;  %v2771_v58 = vsel %vm7771_vm12, %v2763_v32, %v2770_v19  ;;  %v6613_v37 = vpack.i.bf16 %v2541_v10, %v2542_v62  ;;  %v8089_v31 = vld [vmem:[#allocation2 + $0x60] sm:$0x1]  ;;  %v6638_v54 = vor.u32 %v6637_v44, %v8034_v39  ;;  %v8104_v10 = vld [vmem:[#allocation2 + $0x68] sm:$0x1] }
 0x33c   : > { %v2816_v27 = vshrl.u32 %v2684_v24, 16  ;;  %2342 = vst [vmem:[#allocation2 + $0x50] sm:$0x1] %v2341_v8  ;;  %v2819_v56 = vshll.u32 %v2684_v24, 16  ;;  %v2117_v8 = vmax.f32 %v8027_v41, 0.0  ;;  %v3976_v32 = vshrl.u32 %v8032_v46, 16 }
 0x33d   : > { %v2808_v4 = vshrl.u32 %v2683_v21, 16  ;;  %3066 = vst.msk [vmem:[#allocation2 + $0x4c] sm:$0xf] %vm2254_vm11, %v2805_v52  ;;  %v2811_v59 = vshll.u32 %v2683_v21, 16  ;;  %6614 = vrot.lane.b32.xlu2 %v6613_v37, %s6714_s25  ;;  %v3983_v52 = vshll.u32 %v8051_v42, 16  ;;  %v2762_v39 = vor.u32 %v2760_v1, %v2759_v16 }
 0x33e   : > { %v8092_v35 = vrot.slane %v2816_v27, 7  ;;  %2280 = vst [vmem:[#allocation2 + $0x30] sm:$0x1] %v2279_v53  ;;  %v3173_v19 = vld [vmem:[#allocation2 + $0x14] sm:$0x1]  ;;  %v4247_v53 = vrot.slane %v6638_v54, 1 }
 0x33f   : > { %v2810_v26 = vrot.slane %v2808_v4, 7  ;;  %v3042_v24 = vld [vmem:[#allocation2 + $0x24] sm:$0xf]  ;;  %2336 = vst [vmem:[#allocation2 + $0x38] sm:$0x1] %v2335_v61  ;;  %v2291_v44 = vsel %vm7567_vm15, 0, %v8089_v31  ;;  %v6575_v30 = vpop.permute.xlu2 %6574 }
 0x340   : > { %v2821_v57 = vor.u32 %v2819_v56, %v8092_v35  ;;  %v3046_v21 = vld [vmem:[#allocation2 + $0x2c] sm:$0x1]  ;;  %v3043_v42 = vsel %vm7726_vm6, %v8011_v0, %v3042_v24  ;;  %3052 = vst.msk [vmem:[#allocation2 + $0x34] sm:$0xf] %vm2254_vm11, %v2771_v58  ;;  %v2823_v62 = vrot.slane %v8092_v35, 4  ;;  %v3980_v63 = vrot.slane %v3978_v13, 1 }
 0x341   : > { %v3047_v61 = vsel %vm7567_vm15, %v2755_v25, %v3046_v21  ;;  %3044 = vst [vmem:[#allocation2 + $0x24] sm:$0xf] %v3043_v42  ;;  %v8123_v1 = vor.u32 %v2811_v59, %v2810_v26  ;;  %v2814_v16 = vrot.slane %v2810_v26, 4  ;;  %v4249_v27 = vsel %vm3734_vm4, %v4247_v53, %v4248_v17  ;;  %v6640_v37 = vld [vmem:[#allocation2 + $0xc] sm:$0xe] }
 0x342   : > { %3048 = vst [vmem:[#allocation2 + $0x2c] sm:$0x1] %v3047_v61  ;;  %v3063_v0 = vld [vmem:[#allocation2 + $0x48] sm:$0xf]  ;;  %4295 = vrot.lane.b32.xlu1 %v4249_v27, %s6715_s22  ;;  %v3981_v58 = vor.u32 %v3980_v63, %v3976_v32  ;;  %v3985_v56 = vrot.slane %v3983_v52, 1  ;;  %v6577_v4 = vunpack.i.h.bf16 %v6575_v30  ;;  %v6576_v13 = vunpack.i.l.bf16 %v6575_v30  ;;  %v2074_v52 = vpop.f32.mrf.mxu1 }
 0x343   : > { %v3067_v48 = vld [vmem:[#allocation2 + $0x50] sm:$0x1]  ;;  %v3064_v25 = vsel %vm7726_vm6, %v2796_v47, %v3063_v0  ;;  %2289 = vst [vmem:[#allocation2 + $0x54] sm:$0x1] %v2288_v40  ;;  %v2347_v17 = vsel %vm7559_vm13, 0, %v8104_v10  ;;  %v3430_v59 = vunpack.c.l.b16 %v3173_v19  ;;  %v9388_v47 = vmax.f32 %v7832_v55, 0.0 }
 0x344   : > { %3065 = vst [vmem:[#allocation2 + $0x48] sm:$0xf] %v3064_v25  ;;  %v3068_v54 = vsel %vm7567_vm15, %v2806_v15, %v3067_v48  ;;  %v3986_v26 = vsel %vm3461_vm1, %v3981_v58, %v3985_v56  ;;  %v9389_v28 = vmax.f32 %v7837_v23, 0.0  ;;  %v2293_v53 = vld [vmem:[#allocation2 + $0x6c] sm:$0x1]  ;;  %v2822_v55 = vsel %vm7771_vm12, %v2814_v16, %v2821_v57 }
 0x345   : > { %v2653_v32 = vsel %vm1952_vm9, %v9388_v47, %v6577_v4  ;;  %3069 = vst [vmem:[#allocation2 + $0x50] sm:$0x1] %v3068_v54  ;;  %v3049_v10 = vld [vmem:[#allocation2 + $0x30] sm:$0xf]  ;;  %4167 = vrot.lane.b32.xlu0 %v3986_v26, %s6709_s24  ;;  %v3446_v24 = vpack.c.b16 %v3430_v59, %v3430_v59  ;;  %3895 = vrot.lane.b32.xlu2 %v8032_v46, %s6716_s2  ;;  %v3477_v42 = vshll.u32 %v8063_v49, 16 }
 0x346   : > { %v2654_v40 = vsel %vm1952_vm9, %v9389_v28, %v6576_v13  ;;  %v2685_v19 = vpack.c.bf16 %v2653_v32, %v2653_v32  ;;  %v3053_v15 = vld [vmem:[#allocation2 + $0x38] sm:$0x1]  ;;  %v3050_v21 = vsel %vm7726_vm6, %v2762_v39, %v3049_v10  ;;  %2345 = vst [vmem:[#allocation2 + $0x5c] sm:$0x1] %v2344_v7  ;;  %v6641_v23 = vor.u32 %v6640_v37, %v8065_v12  ;;  %v2349_v57 = vld [vmem:[#allocation2 + $0x74] sm:$0x1] }
 0x347   : > { %v2686_v20 = vpack.c.bf16 %v2654_v40, %v2654_v40  ;;  %3051 = vst [vmem:[#allocation2 + $0x30] sm:$0xf] %v3050_v21  ;;  %v3054_v39 = vsel %vm7567_vm15, %v2772_v33, %v3053_v15  ;;  %v8165_v7 = vadd.f32 %v7659_v43, %v2074_v52  ;;  %v3301_v30 = vld [vmem:[#allocation2 + $0x20] sm:$0x1]  ;;  %v3739_v46 = vrot.slane %v3446_v24, 1 }
 0x348   : > { %v2825_v63 = vshrl.u32 %v2685_v19, 16  ;;  %3055 = vst [vmem:[#allocation2 + $0x38] sm:$0x1] %v3054_v39  ;;  %v3738_v61 = vrot.slane %v6641_v23, 1  ;;  %v3475_v12 = vshrl.u32 %v8063_v49, 16  ;;  %v3479_v16 = vrot.slane %v3477_v42, 1 }
 0x349   : > { %v2833_v38 = vshrl.u32 %v2686_v20, 16  ;;  %v6176_v27 = vld [vmem:[#allocation2 + $0x18] sm:$0xf0]  ;;  %3073 = vst.msk [vmem:[#allocation2 + $0x58] sm:$0xf] %vm2254_vm11, %v2822_v55  ;;  %v2836_v33 = vshll.u32 %v2686_v20, 16  ;;  %v4455_v48 = vunpack.c.l.b16 %v3301_v30 }
 0x34a   : > { %v2827_v9 = vrot.slane %v2825_v63, 7  ;;  %v3482_v0 = vshll.u32 %v3446_v24, 16  ;;  %v3070_v58 = vld [vmem:[#allocation2 + $0x54] sm:$0xf]  ;;  %2292 = vst [vmem:[#allocation2 + $0x60] sm:$0x1] %v2291_v44  ;;  %v3740_v56 = vsel %vm3734_vm4, %v3738_v61, %v3739_v46  ;;  %v3480_v4 = vor.u32 %v3479_v16, %v3475_v12  ;;  %v6580_v31 = vpop.permute.xlu2 %6579  ;;  %v2076_v39 = vpop.f32.mrf.mxu1 }
 0x34b   : > { %v8169_v37 = vrot.slane %v2833_v38, 7  ;;  %v2294_v13 = vsel %vm7567_vm15, 0, %v2293_v53  ;;  %v3071_v25 = vsel %vm7726_vm6, %v8123_v1, %v3070_v58  ;;  %2348 = vst [vmem:[#allocation2 + $0x68] sm:$0x1] %v2347_v17  ;;  %v2828_v59 = vshll.u32 %v2685_v19, 16  ;;  %3785 = vrot.lane.b32.xlu1 %v3740_v56, %s6705_s21  ;;  %v8209_v16 = vld [vmem:[#allocation2 + $0x24] sm:$0xff]  }
 0x34c   : > { %v2831_v54 = vrot.slane %v2827_v9, 4  ;;  %v6177_v44 = vld [vmem:[#allocation2 + $0x18] sm:$0xe]  ;;  %3072 = vst [vmem:[#allocation2 + $0x54] sm:$0xf] %v3071_v25  ;;  %v3484_v47 = vrot.slane %v3482_v0, 1  ;;  %v6582_v28 = vunpack.i.h.bf16 %v6580_v31  ;;  %v6581_v40 = vunpack.i.l.bf16 %v6580_v31 }
 0x34d   : > { %v2838_v26 = vor.u32 %v2836_v33, %v8169_v37  ;;  %v2350_v32 = vsel %vm7559_vm13, 0, %v2349_v57  ;;  %v6152_v52 = vld [vmem:[#allocation2 + $0x18] sm:$0xf0]  ;;  %v2830_v20 = vor.u32 %v2828_v59, %v2827_v9  ;;  %2295 = vst [vmem:[#allocation2 + $0x6c] sm:$0x1] %v2294_v13  ;;  %v8187_v17 = vpack.c.b16 %v4455_v48, %v4455_v48  ;;  %3897 = vrot.lane.b32.xlu2 %v7880_v5, %s6716_s2 }
 0x34e   : > { %v3074_v10 = vld [vmem:[#allocation2 + $0x5c] sm:$0x1]  ;;  %v6178_v19 = vor.u32 %v6177_v44, %v6176_v27  ;;  %v3237_v24 = vld [vmem:[#allocation2 + $0x20] sm:$0x1]  ;;  %v3485_v15 = vsel %vm3461_vm1, %v3480_v4, %v3484_v47  ;;  %v9390_v21 = vmax.f32 %v7848_v50, 0.0  ;;  %v2840_v35 = vrot.slane %v8169_v37, 4 }
 0x34f   : > { %v2839_v1 = vsel %vm7771_vm12, %v2831_v54, %v2838_v26  ;;  %v3075_v53 = vsel %vm7567_vm15, %v2823_v62, %v3074_v10  ;;  %v6153_v23 = vld [vmem:[#allocation2 + $0x18] sm:$0xe]  ;;  %v3944_v42 = vunpack.c.l.b16 %v3237_v24  ;;  %v2296_v63 = vld [vmem:[#allocation2 + $0x78] sm:$0x1]  ;;  %3656 = vrot.lane.b32.xlu0 %v3485_v15, %s6713_s19  ;;  %v9391_v38 = vmax.f32 %v7844_v6, 0.0 }
 0x350   : > { %3080 = vst.msk [vmem:[#allocation2 + $0x64] sm:$0xf] %vm2254_vm11, %v2839_v1  ;;  %v2656_v55 = vsel %vm1952_vm9, %v9390_v21, %v6582_v28  ;;  %v8206_v57 = vadd.f32 %v7659_v43, %v2076_v39  ;;  %v4760_v30 = vrot.slane %v8187_v17, 1  ;;  %v6154_v46 = vor.u32 %v6153_v23, %v6152_v52  ;;  %v2352_v12 = vld [vmem:[#allocation2 + $0x80] sm:$0x1] }
 0x351   : > { %3076 = vst [vmem:[#allocation2 + $0x5c] sm:$0x1] %v3075_v53  ;;  %v2688_v62 = vpack.c.bf16 %v2656_v55, %v2656_v55  ;;  %v2655_v5 = vsel %vm1952_vm9, %v9391_v38, %v6581_v40  ;;  %v3960_v61 = vpack.c.b16 %v3944_v42, %v3944_v42  ;;  %v8211_v27 = vld [vmem:[#allocation2 + $0x24] sm:$0xf0]  ;;  %v3077_v9 = vld [vmem:[#allocation2 + $0x60] sm:$0xf] }
 0x352   : > { %2351 = vst [vmem:[#allocation2 + $0x74] sm:$0x1] %v2350_v32  ;;  %v2687_v50 = vpack.c.bf16 %v2655_v5, %v2655_v5  ;;  %v4759_v6 = vrot.slane %v6178_v19, 1  ;;  %v2297_v0 = vsel %vm7567_vm15, 0, %v2296_v63  ;;  %v3081_v43 = vld [vmem:[#allocation2 + $0x68] sm:$0x1]  ;;  %v3078_v58 = vsel %vm7726_vm6, %v2830_v20, %v3077_v9 }
 0x353   : > { %v2850_v37 = vshrl.u32 %v2688_v62, 16  ;;  %v2853_v33 = vshll.u32 %v2688_v62, 16  ;;  %v4250_v13 = vrot.slane %v6154_v46, 1  ;;  %v6131_v48 = vld [vmem:[#allocation2 + $0x18] sm:$0xf0]  ;;  %v3082_v25 = vsel %vm7567_vm15, %v2840_v35, %v3081_v43 }
 0x354   : > { %v2842_v56 = vshrl.u32 %v2687_v50, 16  ;;  %v2845_v4 = vshll.u32 %v2687_v50, 16  ;;  %3079 = vst [vmem:[#allocation2 + $0x60] sm:$0xf] %v3078_v58  ;;  %v4251_v54 = vrot.slane %v3960_v61, 1  ;;  %v3995_v26 = vshll.u32 %v3960_v61, 16  ;;  %v2079_v50 = vpop.f32.mrf.mxu1 }
 0x355   : > { %v2852_v59 = vrot.slane %v2850_v37, 7  ;;  %3083 = vst [vmem:[#allocation2 + $0x68] sm:$0x1] %v3082_v25  ;;  %v3084_v31 = vld [vmem:[#allocation2 + $0x6c] sm:$0xf]  ;;  %v4761_v47 = vsel %vm3734_vm4, %v4759_v6, %v4760_v30  ;;  %v2353_v32 = vsel %vm7559_vm13, 0, %v2352_v12  ;;  %v6585_v24 = vpop.permute.xlu2 %6584 }
 0x356   : > { %v2844_v44 = vrot.slane %v2842_v56, 7  ;;  %v4252_v52 = vsel %vm3734_vm4, %v4250_v13, %v4251_v54  ;;  %v3997_v10 = vrot.slane %v3995_v26, 1  ;;  %2298 = vst [vmem:[#allocation2 + $0x78] sm:$0x1] %v2297_v0  ;;  %v3174_v20 = vld [vmem:[#allocation2 + $0x20] sm:$0x1]  ;;  %4807 = vrot.lane.b32.xlu2 %v4761_v47, %s6708_s23  ;;  %v6587_v23 = vunpack.i.h.bf16 %v6585_v24 }
 0x357   : > { %v2855_v28 = vor.u32 %v2853_v33, %v2852_v59  ;;  %v2857_v40 = vrot.slane %v2852_v59, 4  ;;  %4297 = vrot.lane.b32.xlu1 %v4252_v52, %s6715_s22  ;;  %2354 = vst [vmem:[#allocation2 + $0x80] sm:$0x1] %v2353_v32  ;;  %v6132_v53 = vld [vmem:[#allocation2 + $0x18] sm:$0xe]  ;;  %v3431_v15 = vunpack.c.l.b16 %v3174_v20  ;;  %v6586_v42 = vunpack.i.l.bf16 %v6585_v24  ;;  %v8242_v6 = vld [vmem:[#allocation2 + $0x24] sm:$0xff]  }
 0x358   : > { %v2847_v1 = vor.u32 %v2845_v4, %v2844_v44  ;;  %v2848_v19 = vrot.slane %v2844_v44, 4  ;;  %v3998_v55 = vsel %vm3461_vm1, %v7957_v60, %v3997_v10  ;;  %v6133_v39 = vor.u32 %v6132_v53, %v6131_v48  ;;  %v2299_v63 = vld [vmem:[#allocation2 + $0x84] sm:$0x1]  ;;  %v2355_v30 = vld [vmem:[#allocation2 + $0x8c] sm:$0x1] }
 0x359   : > { %v3088_v21 = vld [vmem:[#allocation2 + $0x74] sm:$0x1]  ;;  %v2118_v35 = vmax.f32 %v8165_v7, 0.0  ;;  %4169 = vrot.lane.b32.xlu0 %v3998_v55, %s6709_s24  ;;  %v2119_v61 = vmax.f32 %v8206_v57, 0.0  ;;  %v9392_v46 = vmax.f32 %v7861_v45, 0.0  ;;  %v9393_v9 = vmax.f32 %v7865_v14, 0.0 }
 0x35a   : > { %v3089_v62 = vsel %vm7567_vm15, %v2857_v40, %v3088_v21  ;;  %v2856_v38 = vsel %vm7771_vm12, %v2848_v19, %v2855_v28  ;;  %v3085_v5 = vsel %vm7726_vm6, %v2847_v1, %v3084_v31  ;;  %v3447_v33 = vpack.c.b16 %v3431_v15, %v3431_v15  ;;  %v6673_v0 = vld [vmem:[#allocation2 + $0x24] sm:$0xf0]  ;;  %v3302_v43 = vld [vmem:[#allocation2 + $0x2c] sm:$0x1]  ;;  %v6674_v13 = vld [vmem:[#allocation2 + $0x24] sm:$0xe] }
 0x35b   : > { %3090 = vst [vmem:[#allocation2 + $0x74] sm:$0x1] %v3089_v62  ;;  %v2657_v12 = vsel %vm1952_vm9, %v9392_v46, %v6587_v23  ;;  %v2658_v37 = vsel %vm1952_vm9, %v9393_v9, %v6586_v42  ;;  %v2300_v4 = vsel %vm7567_vm15, 0, %v2299_v63  ;;  %v3741_v45 = vrot.slane %v6133_v39, 1  ;;  %v8258_v19 = vld [vmem:[%s9360_s13] ss:$0 sm:$0xff] }
 0x35c   : > { %3086 = vst [vmem:[#allocation2 + $0x6c] sm:$0xf] %v3085_v5  ;;  %v2689_v58 = vpack.c.bf16 %v2657_v12, %v2657_v12  ;;  %v2690_v56 = vpack.c.bf16 %v2658_v37, %v2658_v37  ;;  %v3742_v48 = vrot.slane %v3447_v33, 1  ;;  %v3494_v25 = vshll.u32 %v3447_v33, 16  ;;  %v2302_v42 = vld [vmem:[#allocation2 + $0x90] sm:$0x1]  ;;  %v2081_v37 = vpop.f32.mrf.mxu1 }
 0x35d   : > { %3087 = vst.msk [vmem:[#allocation2 + $0x70] sm:$0xf] %vm2254_vm11, %v2856_v38  ;;  %v2356_v14 = vsel %vm7559_vm13, 0, %v2355_v30  ;;  %v4456_v32 = vunpack.c.l.b16 %v3302_v43  ;;  %v4495_v52 = vshll.u32 %v8187_v17, 16  ;;  %v3091_v10 = vld [vmem:[#allocation2 + $0x78] sm:$0xf]  ;;  %v8261_v24 = vadd.f32 %v8258_v19, %v2079_v50 }
 0x35e   : > { %v2859_v59 = vshrl.u32 %v2689_v58, 16  ;;  %v2862_v54 = vshll.u32 %v2689_v58, 16  ;;  %v2867_v26 = vshrl.u32 %v2690_v56, 16  ;;  %v2870_v31 = vshll.u32 %v2690_v56, 16  ;;  %2301 = vst [vmem:[#allocation2 + $0x84] sm:$0x1] %v2300_v4  ;;  %3899 = vrot.lane.b32.xlu2 %v8209_v16, %s6716_s2 }
 0x35f   : > { %v3743_v44 = vsel %vm3734_vm4, %v3741_v45, %v3742_v48  ;;  %v3496_v47 = vrot.slane %v3494_v25, 1  ;;  %2357 = vst [vmem:[#allocation2 + $0x8c] sm:$0x1] %v2356_v14  ;;  %v3095_v20 = vld [vmem:[#allocation2 + $0x80] sm:$0x1]  ;;  %v4002_v1 = vshll.u32 %v8209_v16, 16  ;;  %v8265_v15 = vpack.c.b16 %v4456_v32, %v4456_v32 }
 0x360   : > { %v2861_v28 = vrot.slane %v2859_v59, 7  ;;  %v2869_v40 = vrot.slane %v2867_v26, 7  ;;  %3787 = vrot.lane.b32.xlu1 %v3743_v44, %s6705_s21  ;;  %v6590_v39 = vpop.permute.xlu2 %6589  ;;  %v6675_v63 = vor.u32 %v6674_v13, %v6673_v0  ;;  %v4497_v38 = vrot.slane %v4495_v52, 1  ;;  %v2358_v5 = vld [vmem:[#allocation2 + $0x98] sm:$0x1] }
 0x361   : > { %v3497_v53 = vsel %vm3461_vm1, %v7957_v60, %v3496_v47  ;;  %v4763_v62 = vrot.slane %v8265_v15, 1  ;;  %v3238_v50 = vld [vmem:[#allocation2 + $0x2c] sm:$0x1]  ;;  %v6592_v9 = vunpack.i.h.bf16 %v6590_v39  ;;  %v2120_v33 = vmax.f32 %v8261_v24, 0.0  ;;  %v6643_v48 = vld [vmem:[#allocation2 + $0x24] sm:$0xe] }
 0x362   : > { %v2864_v21 = vor.u32 %v2862_v54, %v2861_v28  ;;  %v2865_v55 = vrot.slane %v2861_v28, 4  ;;  %v2872_v17 = vor.u32 %v2870_v31, %v2869_v40  ;;  %v2874_v23 = vrot.slane %v2869_v40, 4  ;;  %3658 = vrot.lane.b32.xlu0 %v3497_v53, %s6713_s19  ;;  %v2305_v47 = vld [vmem:[#allocation2 + $0x9c] sm:$0x1]  ;;  %v2361_v32 = vld [vmem:[#allocation2 + $0xa4] sm:$0x1] }
 0x363   : > { %v6591_v0 = vunpack.i.l.bf16 %v6590_v39  ;;  %v4762_v43 = vrot.slane %v6675_v63, 1  ;;  %v8277_v58 = vadd.f32 %v8258_v19, %v2081_v37  ;;  %v9394_v56 = vmax.f32 %v7903_v34, 0.0  ;;  %v3303_v40 = vld [vmem:[#allocation2 + $0x38] sm:$0x1]  ;;  %v2308_v41 = vld [vmem:[#allocation2 + $0xa8] sm:$0x1] }
 0x364   : > { %v3092_v30 = vsel %vm7726_vm6, %v2864_v21, %v3091_v10  ;;  %v2873_v46 = vsel %vm7771_vm12, %v2865_v55, %v2872_v17  ;;  %v3096_v12 = vsel %vm7567_vm15, %v2874_v23, %v3095_v20  ;;  %v2303_v13 = vsel %vm7567_vm15, 0, %v2302_v42  ;;  %v6180_v20 = vld [vmem:[#allocation2 + $0x30] sm:$0xe] }
 0x365   : > { %3093 = vst [vmem:[#allocation2 + $0x78] sm:$0xf] %v3092_v30  ;;  %v2660_v4 = vsel %vm1952_vm9, %v9394_v56, %v6592_v9  ;;  %v2359_v45 = vsel %vm7559_vm13, 0, %v2358_v5  ;;  %v3945_v25 = vunpack.c.l.b16 %v3238_v50  ;;  %v9395_v59 = vmax.f32 %v7873_v11, 0.0  ;;  %v6676_v56 = vld [vmem:[#allocation2 + $0x24] sm:$0xf0] }
 0x366   : > { %3094 = vst.msk [vmem:[#allocation2 + $0x7c] sm:$0xf] %vm2254_vm11, %v2873_v46  ;;  %v2692_v14 = vpack.c.bf16 %v2660_v4, %v2660_v4  ;;  %v4764_v26 = vsel %vm3734_vm4, %v4762_v43, %v4763_v62  ;;  %v4498_v34 = vsel %vm3461_vm1, %v7957_v60, %v4497_v38  ;;  %v2121_v11 = vmax.f32 %v8277_v58, 0.0  ;;  %v6179_v60 = vld [vmem:[#allocation2 + $0x30] sm:$0xf0]  ;;  %v8309_v43 = vld [vmem:[#allocation2 + $0x24] sm:$0xff]  }
 0x367   : > { %3097 = vst [vmem:[#allocation2 + $0x80] sm:$0x1] %v3096_v12  ;;  %v2659_v54 = vsel %vm1952_vm9, %v9395_v59, %v6591_v0  ;;  %4809 = vrot.lane.b32.xlu2 %v4764_v26, %s6708_s23  ;;  %v8295_v44 = vpack.c.b16 %v3945_v25, %v3945_v25  ;;  %v3102_v53 = vld [vmem:[#allocation2 + $0x8c] sm:$0x1]  ;;  %v6644_v55 = vor.u32 %v6643_v48, %v8211_v27  ;;  %v2306_v23 = vsel %vm7567_vm15, 0, %v2305_v47  ;;  %v8313_v25 = vld [vmem:[#allocation2 + $0x30] sm:$0xff]  }
 0x368   : > { %v2691_v31 = vpack.c.bf16 %v2659_v54, %v2659_v54  ;;  %4679 = vrot.lane.b32.xlu1 %v4498_v34, %s6717_s1  ;;  %2304 = vst [vmem:[#allocation2 + $0x90] sm:$0x1] %v2303_v13  ;;  %v2884_v28 = vshrl.u32 %v2692_v14, 16  ;;  %v2887_v52 = vshll.u32 %v2692_v14, 16  ;;  %v2362_v63 = vsel %vm7559_vm13, 0, %v2361_v32 }
 0x369   : > { %2360 = vst [vmem:[#allocation2 + $0x98] sm:$0x1] %v2359_v45  ;;  %v4254_v17 = vrot.slane %v8295_v44, 1  ;;  %v4457_v62 = vunpack.c.l.b16 %v3303_v40  ;;  %v3098_v38 = vld [vmem:[#allocation2 + $0x84] sm:$0xf]  ;;  %v4253_v30 = vrot.slane %v6644_v55, 1  ;;  %v6181_v46 = vor.u32 %v6180_v20, %v6179_v60 }
 0x36a   : > { %v2876_v10 = vshrl.u32 %v2691_v31, 16  ;;  %4409 = vrot.lane.b32.xlu0 %v8242_v6, %s6704_s20  ;;  %v2886_v21 = vrot.slane %v2884_v28, 7  ;;  %v2879_v39 = vshll.u32 %v2691_v31, 16  ;;  %2307 = vst [vmem:[#allocation2 + $0x9c] sm:$0x1] %v2306_v23  ;;  %v4502_v9 = vshll.u32 %v8242_v6, 16  ;;  %v8330_v28 = vpop.f32.mrf.mxu1 }
 0x36b   : > { %2363 = vst [vmem:[#allocation2 + $0xa4] sm:$0x1] %v2362_v63  ;;  %v6595_v37 = vpop.permute.xlu2 %6594  ;;  %v8307_v0 = vpack.c.b16 %v4457_v62, %v4457_v62  ;;  %v3175_v4 = vld [vmem:[#allocation2 + $0x2c] sm:$0x1]  ;;  %v4255_v14 = vsel %vm3734_vm4, %v4253_v30, %v4254_v17  ;;  %v6677_v59 = vld [vmem:[#allocation2 + $0x24] sm:$0xe] }
 0x36c   : > { %v2878_v42 = vrot.slane %v2876_v10, 7  ;;  %v2889_v5 = vor.u32 %v2887_v52, %v2886_v21  ;;  %v2891_v50 = vrot.slane %v2886_v21, 4  ;;  %v6597_v45 = vunpack.i.h.bf16 %v6595_v37  ;;  %v2364_v17 = vld [vmem:[#allocation2 + $0xb0] sm:$0x1]  ;;  %v8344_v62 = vld [vmem:[#allocation2 + $0x3c] sm:$0xff]  }
 0x36d   : > { %v6596_v48 = vunpack.i.l.bf16 %v6595_v37  ;;  %v4765_v34 = vrot.slane %v6181_v46, 1  ;;  %v4766_v31 = vrot.slane %v8307_v0, 1  ;;  %v3432_v40 = vunpack.c.l.b16 %v3175_v4  ;;  %v3176_v58 = vld [vmem:[#allocation2 + $0x38] sm:$0x1] }
 0x36e   : > { %v2881_v12 = vor.u32 %v2879_v39, %v2878_v42  ;;  %v2882_v27 = vrot.slane %v2878_v42, 4  ;;  %v3103_v13 = vsel %vm7567_vm15, %v2891_v50, %v3102_v53  ;;  %v2661_v47 = vsel %vm1952_vm9, %v2116_v51, %v6597_v45 }
 0x36f   : > { %3104 = vst [vmem:[#allocation2 + $0x8c] sm:$0x1] %v3103_v13  ;;  %3901 = vrot.lane.b32.xlu2 %v8313_v25, %s6716_s2  ;;  %v2662_v32 = vsel %vm1952_vm9, %v2117_v8, %v6596_v48  ;;  %v2693_v52 = vpack.c.bf16 %v2661_v47, %v2661_v47  ;;  %v4012_v60 = vshrl.u32 %v8313_v25, 16  ;;  %v4014_v22 = vshll.u32 %v8313_v25, 16 }
 0x370   : > { %v2890_v54 = vsel %vm7771_vm12, %v2882_v27, %v2889_v5  ;;  %v3099_v26 = vsel %vm7726_vm6, %v2881_v12, %v3098_v38  ;;  %4299 = vrot.lane.b32.xlu1 %v4255_v14, %s6715_s22  ;;  %v2694_v10 = vpack.c.bf16 %v2662_v32, %v2662_v32  ;;  %v4767_v51 = vsel %vm3734_vm4, %v4765_v34, %v4766_v31  ;;  %v8346_v38 = vld [vmem:[#allocation2 + $0x3c] sm:$0xf0]  ;;  %v3105_v5 = vld [vmem:[#allocation2 + $0x90] sm:$0xf]  ;;  %v3109_v27 = vld [vmem:[#allocation2 + $0x98] sm:$0x1] }
 0x371   : > { %3100 = vst [vmem:[#allocation2 + $0x84] sm:$0xf] %v3099_v26  ;;  %v8338_v20 = vpack.c.b16 %v3432_v40, %v3432_v40  ;;  %v2893_v8 = vshrl.u32 %v2693_v52, 16  ;;  %v2896_v53 = vshll.u32 %v2693_v52, 16  ;;  %v4000_v55 = vshrl.u32 %v8209_v16, 16 }
 0x372   : > { %3101 = vst.msk [vmem:[#allocation2 + $0x88] sm:$0xf] %vm2254_vm11, %v2890_v54  ;;  %4411 = vrot.lane.b32.xlu0 %v8313_v25, %s6704_s20  ;;  %v2901_v21 = vshrl.u32 %v2694_v10, 16  ;;  %v2904_v23 = vshll.u32 %v2694_v10, 16  ;;  %v6678_v42 = vor.u32 %v6677_v59, %v6676_v56  ;;  %v4004_v63 = vrot.slane %v4002_v1, 1  ;;  %v8362_v47 = vpop.f32.mrf.mxu1 }
 0x373   : > { %v3745_v39 = vrot.slane %v8338_v20, 1  ;;  %v2895_v50 = vrot.slane %v2893_v8, 7  ;;  %v4007_v46 = vshll.u32 %v8295_v44, 16  ;;  %v2309_v12 = vsel %vm7567_vm15, 0, %v2308_v41  ;;  %v2311_v8 = vld [vmem:[#allocation2 + $0xb4] sm:$0x1] }
 0x374   : > { %v2903_v30 = vrot.slane %v2901_v21, 7  ;;  %v3744_v37 = vrot.slane %v6678_v42, 1  ;;  %v4005_v56 = vor.u32 %v4004_v63, %v4000_v55  ;;  %2310 = vst [vmem:[#allocation2 + $0xa8] sm:$0x1] %v2309_v12  ;;  %v2365_v16 = vsel %vm7559_vm13, 0, %v2364_v17  ;;  %v8381_v42 = vld [vmem:[#allocation2 + $0x3c] sm:$0xff]  }
 0x375   : > { %v2898_v1 = vor.u32 %v2896_v53, %v2895_v50  ;;  %v2899_v4 = vrot.slane %v2895_v50, 4  ;;  %2366 = vst [vmem:[#allocation2 + $0xb0] sm:$0x1] %v2365_v16  ;;  %v4009_v14 = vrot.slane %v4007_v46, 1  ;;  %v4500_v40 = vshrl.u32 %v8242_v6, 16 }
 0x376   : > { %v2906_v13 = vor.u32 %v2904_v23, %v2903_v30  ;;  %v2908_v45 = vrot.slane %v2903_v30, 4  ;;  %v6600_v48 = vpop.permute.xlu2 %6599  ;;  %v3746_v44 = vsel %vm3734_vm4, %v3744_v37, %v3745_v39  ;;  %v4504_v52 = vrot.slane %v4502_v9, 1  ;;  %v3304_v21 = vld [vmem:[#allocation2 + $0x44] sm:$0x1]  ;;  %v6680_v55 = vld [vmem:[#allocation2 + $0x3c] sm:$0xe] }
 0x377   : > { %4811 = vrot.lane.b32.xlu2 %v4767_v51, %s6708_s23  ;;  %v3106_v59 = vsel %vm7726_vm6, %v2898_v1, %v3105_v5  ;;  %v6602_v34 = vunpack.i.h.bf16 %v6600_v48  ;;  %v6601_v31 = vunpack.i.l.bf16 %v6600_v48  ;;  %v4010_v32 = vsel %vm3461_vm1, %v4005_v56, %v4009_v14  ;;  %v2367_v23 = vld [vmem:[#allocation2 + $0xbc] sm:$0x1]  ;;  %v6155_v39 = vld [vmem:[#allocation2 + $0x30] sm:$0xf0]  ;;  %v3239_v63 = vld [vmem:[#allocation2 + $0x38] sm:$0x1] }
 0x378   : > { %v2907_v54 = vsel %vm7771_vm12, %v2899_v4, %v2906_v13  ;;  %v3110_v26 = vsel %vm7567_vm15, %v2908_v45, %v3109_v27  ;;  %3789 = vrot.lane.b32.xlu1 %v3746_v44, %s6705_s21  ;;  %3107 = vst [vmem:[#allocation2 + $0x90] sm:$0xf] %v3106_v59  ;;  %v8369_v10 = vrot.slane %v4014_v22, 1  ;;  %v4507_v41 = vshll.u32 %v8265_v15, 16  ;;  %v6679_v15 = vld [vmem:[#allocation2 + $0x3c] sm:$0xf0] }
 0x379   : > { %3108 = vst.msk [vmem:[#allocation2 + $0x94] sm:$0xf] %vm2254_vm11, %v2907_v54  ;;  %v2664_v51 = vsel %vm1952_vm9, %v2119_v61, %v6602_v34  ;;  %v2663_v6 = vsel %vm1952_vm9, %v2118_v35, %v6601_v31  ;;  %v4505_v9 = vor.u32 %v4504_v52, %v4500_v40  ;;  %v3499_v57 = vshrl.u32 %v8309_v43, 16  ;;  %v6156_v30 = vld [vmem:[#allocation2 + $0x30] sm:$0xe] }
 0x37a   : > { %4171 = vrot.lane.b32.xlu0 %v4010_v32, %s6709_s24  ;;  %3111 = vst [vmem:[#allocation2 + $0x98] sm:$0x1] %v3110_v26  ;;  %v2696_v53 = vpack.c.bf16 %v2664_v51, %v2664_v51  ;;  %v2695_v22 = vpack.c.bf16 %v2663_v6, %v2663_v6  ;;  %v4509_v17 = vrot.slane %v4507_v41, 1  ;;  %v3501_v61 = vshll.u32 %v8309_v43, 16  ;;  %v3116_v4 = vld [vmem:[#allocation2 + $0xa4] sm:$0x1] }
 0x37b   : > { %v3506_v7 = vshll.u32 %v8338_v20, 16  ;;  %v2312_v35 = vsel %vm7567_vm15, 0, %v2311_v8  ;;  %v2368_v1 = vsel %vm7559_vm13, 0, %v2367_v23  ;;  %v4458_v45 = vunpack.c.l.b16 %v3304_v21  ;;  %v3112_v48 = vld [vmem:[#allocation2 + $0x9c] sm:$0xf]  ;;  %v2089_v8 = vpop.f32.mrf.mxu1 }
 0x37c   : > { %v2918_v5 = vshrl.u32 %v2696_v53, 16  ;;  %v2921_v50 = vshll.u32 %v2696_v53, 16  ;;  %v2910_v46 = vshrl.u32 %v2695_v22, 16  ;;  %v2913_v12 = vshll.u32 %v2695_v22, 16  ;;  %2313 = vst [vmem:[#allocation2 + $0xb4] sm:$0x1] %v2312_v35 }
 0x37d   : > { %v4510_v27 = vsel %vm3461_vm1, %v4505_v9, %v4509_v17  ;;  %v3503_v37 = vrot.slane %v3501_v61, 1  ;;  %v3508_v16 = vrot.slane %v3506_v7, 1  ;;  %2369 = vst [vmem:[#allocation2 + $0xbc] sm:$0x1] %v2368_v1  ;;  %v3946_v59 = vunpack.c.l.b16 %v3239_v63  ;;  %v2314_v6 = vld [vmem:[#allocation2 + $0xc0] sm:$0x1] }
 0x37e   : > { %v2920_v56 = vrot.slane %v2918_v5, 7  ;;  %v2912_v20 = vrot.slane %v2910_v46, 7  ;;  %v6157_v54 = vor.u32 %v6156_v30, %v6155_v39  ;;  %v8393_v40 = vpack.c.b16 %v4458_v45, %v4458_v45  ;;  %v6134_v7 = vld [vmem:[#allocation2 + $0x30] sm:$0xf0]  ;;  %v3305_v35 = vld [vmem:[#allocation2 + $0x50] sm:$0x1] }
 0x37f   : > { %3903 = vrot.lane.b32.xlu2 %v8344_v62, %s6716_s2  ;;  %v3504_v13 = vor.u32 %v3503_v37, %v3499_v57  ;;  %v6681_v53 = vor.u32 %v6680_v55, %v6679_v15  ;;  %v3962_v17 = vpack.c.b16 %v3946_v59, %v3946_v59  ;;  %v2370_v57 = vld [vmem:[#allocation2 + $0xc8] sm:$0x1]  ;;  %v8405_v61 = vadd.f32 %v8258_v19, %v8362_v47  ;;  %v6135_v37 = vld [vmem:[#allocation2 + $0x30] sm:$0xe] }
 0x380   : > { %4681 = vrot.lane.b32.xlu1 %v4510_v27, %s6717_s1  ;;  %v2923_v44 = vor.u32 %v2921_v50, %v2920_v56  ;;  %v2925_v14 = vrot.slane %v2920_v56, 4  ;;  %v2915_v26 = vor.u32 %v2913_v12, %v2912_v20  ;;  %v2916_v34 = vrot.slane %v2912_v20, 4 }
 0x381   : > { %v6605_v31 = vpop.permute.xlu2 %6604  ;;  %v3509_v32 = vsel %vm3461_vm1, %v3504_v13, %v3508_v16  ;;  %v4769_v22 = vrot.slane %v8393_v40, 1  ;;  %v4768_v15 = vrot.slane %v6681_v53, 1  ;;  %v4256_v5 = vrot.slane %v6157_v54, 1 }
 0x382   : > { %v3117_v52 = vsel %vm7567_vm15, %v2925_v14, %v3116_v4  ;;  %v6607_v51 = vunpack.i.h.bf16 %v6605_v31  ;;  %v6606_v41 = vunpack.i.l.bf16 %v6605_v31  ;;  %3660 = vrot.lane.b32.xlu0 %v3509_v32, %s6713_s19  ;;  %v2924_v9 = vsel %vm7771_vm12, %v2916_v34, %v2923_v44 }
 0x383   : > { %3118 = vst [vmem:[#allocation2 + $0xa4] sm:$0x1] %v3117_v52  ;;  %v3113_v21 = vsel %vm7726_vm6, %v2915_v26, %v3112_v48  ;;  %v4257_v50 = vrot.slane %v3962_v17, 1  ;;  %v4770_v47 = vsel %vm3734_vm4, %v4768_v15, %v4769_v22  ;;  %v4019_v30 = vshll.u32 %v3962_v17, 16  ;;  %v6002_v22 = vld [vmem:[%s9361_s14 + $0x28] sm:$0xff] }
 0x384   : > { %3114 = vst [vmem:[#allocation2 + $0x9c] sm:$0xf] %v3113_v21  ;;  %v2665_v55 = vsel %vm1952_vm9, %v2120_v33, %v6607_v51  ;;  %v2666_v23 = vsel %vm1952_vm9, %v2121_v11, %v6606_v41  ;;  %v2315_v24 = vsel %vm7567_vm15, 0, %v2314_v6  ;;  %v2371_v33 = vsel %vm7559_vm13, 0, %v2370_v57  ;;  %v6004_v11 = vld [vmem:[%s9361_s14 + $0x38] sm:$0xff]  ;;  %v2091_v41 = vpop.f32.mrf.mxu1 }
 0x385   : > { %3115 = vst.msk [vmem:[#allocation2 + $0xa0] sm:$0xf] %vm2254_vm11, %v2924_v9  ;;  %v2697_v39 = vpack.c.bf16 %v2665_v55, %v2665_v55  ;;  %v2698_v63 = vpack.c.bf16 %v2666_v23, %v2666_v23  ;;  %v2085_v46 = vadd.f32 %v8258_v19, %v8330_v28  ;;  %v8428_v56 = vor.u32 %v8369_v10, %v4012_v60  ;;  %v6003_v28 = vld [vmem:[%s9361_s14 + $0x30] sm:$0xff]  ;;  %v3123_v10 = vld [vmem:[#allocation2 + $0xb0] sm:$0x1] }
 0x386   : > { %2316 = vst [vmem:[#allocation2 + $0xc0] sm:$0x1] %v2315_v24  ;;  %v4258_v1 = vsel %vm3734_vm4, %v4256_v5, %v4257_v50  ;;  %v4021_v4 = vrot.slane %v4019_v30, 1  ;;  %5263 = vmatpush.bf16.msrb.mxu3 %v6004_v11  ;;  %v3433_v48 = vunpack.c.l.b16 %v3176_v58  ;;  %v2123_v25 = vmax.f32 %v8405_v61, 0.0  ;;  %v3119_v60 = vld [vmem:[#allocation2 + $0xa8] sm:$0xf] }
 0x387   : > { %v2927_v12 = vshrl.u32 %v2697_v39, 16  ;;  %v2935_v27 = vshrl.u32 %v2698_v63, 16  ;;  %4813 = vrot.lane.b32.xlu2 %v4770_v47, %s6708_s23  ;;  %v2930_v16 = vshll.u32 %v2697_v39, 16  ;;  %2372 = vst [vmem:[#allocation2 + $0xc8] sm:$0x1] %v2371_v33  ;;  %v2938_v45 = vshll.u32 %v2698_v63, 16 }
 0x388   : > { %4301 = vrot.lane.b32.xlu1 %v4258_v1, %s6715_s22  ;;  %v4022_v44 = vsel %vm3461_vm1, %v8428_v56, %v4021_v4  ;;  %v6136_v14 = vor.u32 %v6135_v37, %v6134_v7  ;;  %v4459_v59 = vunpack.c.l.b16 %v3305_v35  ;;  %v2122_v32 = vmax.f32 %v2085_v46, 0.0  ;;  %v6182_v6 = vld [vmem:[#allocation2 + $0x48] sm:$0xf0]  ;;  %v6183_v9 = vld [vmem:[#allocation2 + $0x48] sm:$0xe]  ;;  %v6001_v33 = vld [vmem:[%s9361_s14 + $0x20] sm:$0xff] }
 0x389   : > { %v2929_v20 = vrot.slane %v2927_v12, 7  ;;  %v2937_v13 = vrot.slane %v2935_v27, 7  ;;  %v8440_v52 = vadd.f32 %v8258_v19, %v2089_v8  ;;  %v3449_v53 = vpack.c.b16 %v3433_v48, %v3433_v48  ;;  %v8453_v23 = vld [vmem:[#allocation2 + $0x48] sm:$0xff]   ;;  %v3240_v46 = vld [vmem:[#allocation2 + $0x44] sm:$0x1] }
 0x38a   : > { %4173 = vrot.lane.b32.xlu0 %v4022_v44, %s6709_s24  ;;  %v8442_v21 = vpack.c.b16 %v4459_v59, %v4459_v59  ;;  %5264 = vmatpush.bf16.msrb.mxu3 %v6003_v28  ;;  %v3747_v15 = vrot.slane %v6136_v14, 1  ;;  %v8458_v50 = vadd.f32 %v8258_v19, %v2091_v41  ;;  %v6184_v7 = vor.u32 %v6183_v9, %v6182_v6  ;;  %v6646_v37 = vld [vmem:[#allocation2 + $0x3c] sm:$0xe]  ;;  %v3306_v9 = vld [vmem:[#allocation2 + $0x5c] sm:$0x1] }
 0x38b   : > { %v2932_v54 = vor.u32 %v2930_v16, %v2929_v20  ;;  %v2933_v26 = vrot.slane %v2929_v20, 4  ;;  %v2940_v34 = vor.u32 %v2938_v45, %v2937_v13  ;;  %v2942_v31 = vrot.slane %v2937_v13, 4  ;;  %v8474_v20 = vld [vmem:[#allocation2 + $0x54] sm:$0xff]  }
 0x38c   : > { %v6610_v51 = vpop.permute.xlu2 %6609  ;;  %v3748_v39 = vrot.slane %v3449_v53, 1  ;;  %v3518_v63 = vshll.u32 %v3449_v53, 16  ;;  %v4772_v19 = vrot.slane %v8442_v21, 1  ;;  %v4519_v11 = vshll.u32 %v8307_v0, 16  ;;  %v8476_v13 = vld [vmem:[#allocation2 + $0x54] sm:$0xf0] }
 0x38d   : > { %v3120_v17 = vsel %vm7726_vm6, %v2932_v54, %v3119_v60  ;;  %v2941_v57 = vsel %vm7771_vm12, %v2933_v26, %v2940_v34  ;;  %v3124_v8 = vsel %vm7567_vm15, %v2942_v31, %v3123_v10  ;;  %v6612_v61 = vunpack.i.h.bf16 %v6610_v51  ;;  %v6000_v60 = vld [vmem:[%s9361_s14 + $0x18] sm:$0xff]  ;;  %v3130_v10 = vld [vmem:[#allocation2 + $0xbc] sm:$0x1] }
 0x38e   : > { %3121 = vst [vmem:[#allocation2 + $0xa8] sm:$0xf] %v3120_v17  ;;  %v6611_v55 = vunpack.i.l.bf16 %v6610_v51  ;;  %v3749_v30 = vsel %vm3734_vm4, %v3747_v15, %v3748_v39  ;;  %v3520_v24 = vrot.slane %v3518_v63, 1  ;;  %5265 = vmatpush.bf16.msrb.mxu3 %v6002_v22  ;;  %v2124_v16 = vmax.f32 %v8440_v52, 0.0  ;;  %v3126_v54 = vld [vmem:[#allocation2 + $0xb4] sm:$0xf] }
 0x38f   : > { %3122 = vst.msk [vmem:[#allocation2 + $0xac] sm:$0xf] %vm2254_vm11, %v2941_v57  ;;  %v2668_v5 = vsel %vm1952_vm9, %v2123_v25, %v6612_v61  ;;  %3905 = vrot.lane.b32.xlu2 %v8453_v23, %s6716_s2  ;;  %v4771_v4 = vrot.slane %v6184_v7, 1  ;;  %v4521_v28 = vrot.slane %v4519_v11, 1  ;;  %v2125_v0 = vmax.f32 %v8458_v50, 0.0  ;;  %v8483_v31 = vld [vmem:[#allocation2 + $0x54] sm:$0xff]  }
 0x390   : > { %3125 = vst [vmem:[#allocation2 + $0xb0] sm:$0x1] %v3124_v8  ;;  %v2700_v35 = vpack.c.bf16 %v2668_v5, %v2668_v5  ;;  %v2667_v47 = vsel %vm1952_vm9, %v2122_v32, %v6611_v55  ;;  %3791 = vrot.lane.b32.xlu1 %v3749_v30, %s6705_s21  ;;  %v3521_v27 = vsel %vm3461_vm1, %v8428_v56, %v3520_v24  ;;  %v3947_v25 = vunpack.c.l.b16 %v3240_v46  ;;  %v6682_v32 = vld [vmem:[#allocation2 + $0x54] sm:$0xf0]  ;;  %v6683_v22 = vld [vmem:[#allocation2 + $0x54] sm:$0xe] }
 0x391   : > { %v2699_v58 = vpack.c.bf16 %v2667_v47, %v2667_v47  ;;  %v4773_v59 = vsel %vm3734_vm4, %v4771_v4, %v4772_v19  ;;  %v4522_v53 = vsel %vm3461_vm1, %v8428_v56, %v4521_v28  ;;  %v6647_v6 = vor.u32 %v6646_v37, %v8346_v38  ;;  %v8493_v55 = vld [vmem:[#allocation2 + $0x3c] sm:$0xff]   ;;  %v5999_v39 = vld [vmem:[%s9361_s14 + $0x10] sm:$0xff]  ;;  %v3177_v63 = vld [vmem:[#allocation2 + $0x44] sm:$0x1] }
 0x392   : > { %v2952_v12 = vshrl.u32 %v2700_v35, 16  ;;  %3662 = vrot.lane.b32.xlu0 %v3521_v27, %s6713_s19  ;;  %v2955_v48 = vshll.u32 %v2700_v35, 16  ;;  %5266 = vmatpush.bf16.msrb.mxu3 %v6001_v33  ;;  %v8491_v61 = vpack.c.b16 %v3947_v25, %v3947_v25  ;;  %v6685_v15 = vld [vmem:[#allocation2 + $0x3c] sm:$0xf0]  ;;  %v6686_v5 = vld [vmem:[#allocation2 + $0x3c] sm:$0xe]  ;;  %v4460_v35 = vunpack.c.l.b16 %v3306_v9 }
 0x393   : > { %v2944_v1 = vshrl.u32 %v2699_v58, 16  ;;  %v2947_v14 = vshll.u32 %v2699_v58, 16  ;;  %v4259_v24 = vrot.slane %v6647_v6, 1  ;;  %v3434_v58 = vunpack.c.l.b16 %v3177_v63  ;;  %v5998_v19 = vld [vmem:[%s9361_s14 + $0x8] sm:$0xff] }
 0x394   : > { %v2954_v45 = vrot.slane %v2952_v12, 7  ;;  %v4260_v33 = vrot.slane %v8491_v61, 1  ;;  %v4026_v12 = vshll.u32 %v8344_v62, 16  ;;  %v8513_v27 = vpack.c.b16 %v4460_v35, %v4460_v35 }
 0x395   : > { %v2946_v44 = vrot.slane %v2944_v1, 7  ;;  %v6684_v37 = vor.u32 %v6683_v22, %v6682_v32  ;;  %v3450_v25 = vpack.c.b16 %v3434_v58, %v3434_v58  ;;  %v4024_v22 = vshrl.u32 %v8344_v62, 16  ;;  %v6186_v58 = vld [vmem:[#allocation2 + $0x60] sm:$0xe] }
 0x396   : > { %v2957_v26 = vor.u32 %v2955_v48, %v2954_v45  ;;  %v2959_v34 = vrot.slane %v2954_v45, 4  ;;  %5267 = vmatpush.bf16.msrb.mxu3 %v6000_v60  ;;  %v3133_v45 = vld [vmem:[#allocation2 + $0xc0] sm:$0xf]  ;;  %v3137_v48 = vld [vmem:[#allocation2 + $0xc8] sm:$0x1]  ;;  %v6687_v60 = vor.u32 %v6686_v5, %v6685_v15  ;;  %v4028_v32 = vrot.slane %v4026_v12, 1 }
 0x397   : > { %v2949_v52 = vor.u32 %v2947_v14, %v2946_v44  ;;  %v2950_v51 = vrot.slane %v2946_v44, 4  ;;  %v6615_v41 = vpop.permute.xlu2 %6614  ;;  %4815 = vrot.lane.b32.xlu2 %v4773_v59, %s6708_s23  ;;  %v3751_v9 = vrot.slane %v3450_v25, 1  ;;  %v3241_v15 = vld [vmem:[#allocation2 + $0x50] sm:$0x1]  ;;  %v4524_v62 = vshrl.u32 %v8381_v42, 16 }
 0x398   : > { %v3131_v17 = vsel %vm7567_vm15, %v2959_v34, %v3130_v10  ;;  %v6617_v57 = vunpack.i.h.bf16 %v6615_v41  ;;  %v6616_v8 = vunpack.i.l.bf16 %v6615_v41  ;;  %4683 = vrot.lane.b32.xlu1 %v4522_v53, %s6717_s1  ;;  %v5997_v10 = vld [vmem:[%s9361_s14] sm:$0xff]  ;;  %v4775_v34 = vrot.slane %v8513_v27, 1  ;;  %v6158_v12 = vld [vmem:[#allocation2 + $0x48] sm:$0xf0] }
 0x399   : > { %3132 = vst [vmem:[#allocation2 + $0xbc] sm:$0x1] %v3131_v17  ;;  %v2958_v38 = vsel %vm7771_vm12, %v2950_v51, %v2957_v26  ;;  %v3127_v56 = vsel %vm7726_vm6, %v2949_v52, %v3126_v54  ;;  %v4774_v26 = vrot.slane %v6684_v37, 1  ;;  %v4526_v53 = vshll.u32 %v8381_v42, 16  ;;  %v6159_v37 = vld [vmem:[#allocation2 + $0x48] sm:$0xe] }
 0x39a   : > { %3128 = vst [vmem:[#allocation2 + $0xb4] sm:$0xf] %v3127_v56  ;;  %v2669_v50 = vsel %vm1952_vm9, %v2124_v16, %v6617_v57  ;;  %v2670_v7 = vsel %vm1952_vm9, %v2125_v0, %v6616_v8  ;;  %4413 = vrot.lane.b32.xlu0 %v8381_v42, %s6704_s20  ;;  %5268 = vmatpush.bf16.msrb.mxu3 %v5999_v39  ;;  %v3750_v6 = vrot.slane %v6687_v60, 1  ;;  %v4031_v17 = vshll.u32 %v8491_v61, 16  ;;  %v3307_v8 = vld [vmem:[#allocation2 + $0x68] sm:$0x1]  ;;  %v8548_v42 = vpop.permute.xlu0 %4407 }
 0x39b   : > { %3129 = vst.msk [vmem:[#allocation2 + $0xb8] sm:$0xf] %vm2254_vm11, %v2958_v38  ;;  %v2701_v47 = vpack.c.bf16 %v2669_v50, %v2669_v50  ;;  %v2702_v30 = vpack.c.bf16 %v2670_v7, %v2670_v7  ;;  %v4261_v0 = vsel %vm3734_vm4, %v4259_v24, %v4260_v33  ;;  %v4776_v18 = vsel %vm3734_vm4, %v4774_v26, %v4775_v34  ;;  %v5141_v24 = vld [vmem:[%s9361_s14 + $0x68] sm:$0xf]  ;;  %v6185_v33 = vld [vmem:[#allocation2 + $0x60] sm:$0xf0] }
 0x39c   : > { %v4029_v3 = vor.u32 %v4028_v32, %v4024_v22  ;;  %v3525_v57 = vshll.u32 %v8493_v55, 16  ;;  %v3752_v39 = vsel %vm3734_vm4, %v3750_v6, %v3751_v9  ;;  %v4033_v38 = vrot.slane %v4031_v17, 1  ;;  %v6137_v9 = vld [vmem:[#allocation2 + $0x48] sm:$0xf0] }
 0x39d   : > { %v2961_v11 = vshrl.u32 %v2701_v47, 16  ;;  %v2969_v46 = vshrl.u32 %v2702_v30, 16  ;;  %v2964_v1 = vshll.u32 %v2701_v47, 16  ;;  %v2972_v28 = vshll.u32 %v2702_v30, 16 }
 0x39e   : > { %5269 = vmatpush.bf16.msrb.mxu3 %v5998_v19  ;;  %v4528_v56 = vrot.slane %v4526_v53, 1  ;;  %v4531_v61 = vshll.u32 %v8393_v40, 16  ;;  %v4034_v63 = vsel %vm3461_vm1, %v4029_v3, %v4033_v38  ;;  %v3527_v5 = vrot.slane %v3525_v57, 1  ;;  %v8550_v40 = vld [vmem:[#allocation2 + $0x60] sm:$0xff]   ;;  %v8572_v3 = vld [vmem:[#allocation2 + $0x6c] sm:$0xff]  }
 0x39f   : > { %v2963_v16 = vrot.slane %v2961_v11, 7  ;;  %v2971_v4 = vrot.slane %v2969_v46, 7  ;;  %3907 = vrot.lane.b32.xlu2 %v8474_v20, %s6716_s2  ;;  %v4461_v50 = vunpack.c.l.b16 %v3307_v8  ;;  %v3948_v7 = vunpack.c.l.b16 %v3241_v15  ;;  %v8574_v57 = vld [vmem:[#allocation2 + $0x6c] sm:$0xf0]  ;;  %v6138_v15 = vld [vmem:[#allocation2 + $0x48] sm:$0xe] }
 0x3a0   : > { %4303 = vrot.lane.b32.xlu1 %v4261_v0, %s6715_s22  ;;  %v4529_v35 = vor.u32 %v4528_v56, %v4524_v62  ;;  %v3523_v47 = vshrl.u32 %v8493_v55, 16  ;;  %v3530_v30 = vshll.u32 %v3450_v25, 16  ;;  %v4533_v19 = vrot.slane %v4531_v61, 1  ;;  %v8576_v38 = vld [vmem:[#allocation2 + $0x6c] sm:$0xff]  }
 0x3a1   : > { %v2966_v44 = vor.u32 %v2964_v1, %v2963_v16  ;;  %v2967_v14 = vrot.slane %v2963_v16, 4  ;;  %v2974_v59 = vor.u32 %v2972_v28, %v2971_v4  ;;  %v2976_v54 = vrot.slane %v2971_v4, 4  ;;  %v3178_v1 = vld [vmem:[#allocation2 + $0x50] sm:$0x1]  ;;  %v6689_v62 = vld [vmem:[#allocation2 + $0x6c] sm:$0xe] }
 0x3a2   : > { %4415 = vrot.lane.b32.xlu0 %v8453_v23, %s6704_s20  ;;  %5270 = vmatpush.bf16.msrb.mxu3 %v5997_v10  ;;  %v3528_v11 = vor.u32 %v3527_v5, %v3523_v47  ;;  %v8552_v46 = vpack.c.b16 %v4461_v50, %v4461_v50  ;;  %v3964_v16 = vpack.c.b16 %v3948_v7, %v3948_v7  ;;  %v5199_v4 = vunpack.c.l.b16 %v5141_v24  ;;  %v3896_v10 = vpop.permute.xlu2 %3895  ;;  %v6688_v56 = vld [vmem:[#allocation2 + $0x6c] sm:$0xf0] }
 0x3a3   : > { %v3134_v52 = vsel %vm7726_vm6, %v2966_v44, %v3133_v45  ;;  %v2975_v51 = vsel %vm7771_vm12, %v2967_v14, %v2974_v59  ;;  %v3138_v41 = vsel %vm7567_vm15, %v2976_v54, %v3137_v48  ;;  %v4038_v28 = vshll.u32 %v8453_v23, 16  ;;  %v6008_v50 = vld [vmem:[%s9361_s14 + $0x58] sm:$0xff] }
 0x3a4   : > { %3135 = vst [vmem:[#allocation2 + $0xc0] sm:$0xf] %v3134_v52  ;;  %v4534_v45 = vsel %vm3461_vm1, %v4529_v35, %v4533_v19  ;;  %v3532_v48 = vrot.slane %v3530_v30, 1  ;;  %v6187_v0 = vor.u32 %v6186_v58, %v6185_v33  ;;  %vm4904_vm9 = vcmask 588800   ;;  %v6007_v33 = vld [vmem:[%s9361_s14 + $0x50] sm:$0xff] }
 0x3a5   : > { %3136 = vst.msk [vmem:[#allocation2 + $0xc4] sm:$0xf] %vm2254_vm11, %v2975_v51  ;;  %v6160_v25 = vor.u32 %v6159_v37, %v6158_v12  ;;  %v5213_v60 = vpack.c.b16 %v5199_v4, %v5199_v4  ;;  %v4778_v14 = vrot.slane %v8552_v46, 1  ;;  %v4043_v59 = vshll.u32 %v3964_v16, 16 }
 0x3a6   : > { %3139 = vst [vmem:[#allocation2 + $0xc8] sm:$0x1] %v3138_v41  ;;  %v3533_v44 = vsel %vm3461_vm1, %v3528_v11, %v3532_v48  ;;  %v3435_v54 = vunpack.c.l.b16 %v3178_v1  ;;  %v4040_v32 = vrot.slane %v4038_v28, 1  ;;  %v4777_v52 = vrot.slane %v6187_v0, 1  ;;  %v6009_v41 = vld [vmem:[%s9361_s14 + $0x60] sm:$0xff]  ;;  %v6006_v28 = vld [vmem:[%s9361_s14 + $0x48] sm:$0xff] }
 0x3a7   : > { %4817 = vrot.lane.b32.xlu2 %v4776_v18, %s6708_s23  ;;  %v5261_v34 = vsel %vm2001_vm8, %v5213_v60, 0  ;;  %v4263_v51 = vrot.slane %v3964_v16, 1  ;;  %v4036_v53 = vshrl.u32 %v8453_v23, 16  ;;  %v4906_v6 = vsel %vm4904_vm9, %v7748_v2, %v3896_v10  ;;  %v3308_v23 = vld [vmem:[#allocation2 + $0x74] sm:$0x1] }
 0x3a8   : > { %3793 = vrot.lane.b32.xlu1 %v3752_v39, %s6705_s21  ;;  %5354 = vmatpush.bf16.msrb.mxu0 %v5261_v34  ;;  %vm4969_vm11 = vcmask 982016   ;;  %v4779_v22 = vsel %vm3734_vm4, %v4777_v52, %v4778_v14  ;;  %v4262_v17 = vrot.slane %v6160_v25, 1  ;;  %v4045_v18 = vrot.slane %v4043_v59, 1  ;;  %v6649_v48 = vld [vmem:[#allocation2 + $0x54] sm:$0xe]  ;;  %v6005_v14 = vld [vmem:[%s9361_s14 + $0x40] sm:$0xff] }
 0x3a9   : > { %v3451_v39 = vpack.c.b16 %v3435_v54, %v3435_v54  ;;  %v4041_v61 = vor.u32 %v4040_v32, %v4036_v53  ;;  %v6139_v7 = vor.u32 %v6138_v15, %v6137_v9  ;;  %v4462_v30 = vunpack.c.l.b16 %v3308_v23  ;;  %v3309_v32 = vld [vmem:[#allocation2 + $0x80] sm:$0x1]  ;;  %v8617_v53 = vld [vmem:[#allocation2 + $0x54] sm:$0xff]  }
 0x3aa   : > { %4175 = vrot.lane.b32.xlu0 %v4034_v63, %s6709_s24  ;;  %v4264_v63 = vsel %vm3734_vm4, %v4262_v17, %v4263_v51  ;;  %v6690_v37 = vor.u32 %v6689_v62, %v6688_v56  ;;  %v4543_v4 = vshll.u32 %v8442_v21, 16  ;;  %v3898_v52 = vpop.permute.xlu2 %3897  ;;  %v3179_v17 = vld [vmem:[#allocation2 + $0x5c] sm:$0x1]  ;;  %v4463_v15 = vunpack.c.l.b16 %v3309_v32  ;;  %v3326_v32 = vld [vmem:[#allocation2 + $0x84] sm:$0xe] }
 0x3ab   : > { %v4046_v35 = vsel %vm3461_vm1, %v4041_v61, %v4045_v18  ;;  %v3542_v47 = vshll.u32 %v3451_v39, 16  ;;  %v3754_v24 = vrot.slane %v3451_v39, 1  ;;  %v3753_v19 = vrot.slane %v6139_v7, 1  ;;  %v6692_v18 = vld [vmem:[#allocation2 + $0x54] sm:$0xe] }
 0x3ac   : > { %5355 = vmatpush.bf16.msrb.mxu0 %v6009_v41  ;;  %v8592_v12 = vpack.c.b16 %v4462_v30, %v4462_v30  ;;  %v4780_v25 = vrot.slane %v6690_v37, 1  ;;  %v4545_v21 = vrot.slane %v4543_v4, 1  ;;  %v6650_v41 = vor.u32 %v6649_v48, %v8476_v13  ;;  %v6188_v62 = vld [vmem:[#allocation2 + $0x78] sm:$0xf0]  ;;  %v8648_v4 = vld [vmem:[#allocation2 + $0x84] sm:$0xff]  }
 0x3ad   : > { %v3544_v11 = vrot.slane %v3542_v47, 1  ;;  %v3755_v16 = vsel %vm3734_vm4, %v3753_v19, %v3754_v24  ;;  %v4050_v23 = vshll.u32 %v8474_v20, 16  ;;  %v8640_v19 = vld [vmem:[#allocation2 + $0x9c] sm:$0xff]   ;;  %v4550_v37 = vshll.u32 %v8483_v31, 16 }
 0x3ae   : > { %v4781_v60 = vrot.slane %v8592_v12, 1  ;;  %v4546_v51 = vsel %vm3461_vm1, %v4041_v61, %v4545_v21  ;;  %v4265_v39 = vrot.slane %v6650_v41, 1  ;;  %vm5227_vm6 = vcmask 719872  }
 0x3af   : > { %3909 = vrot.lane.b32.xlu2 %v8550_v40, %s6716_s2  ;;  %v3545_v0 = vsel %vm3461_vm1, %v4041_v61, %v3544_v11  ;;  %v6189_v61 = vld [vmem:[#allocation2 + $0x78] sm:$0xe]  ;;  %v8642_v11 = vld [vmem:[#allocation2 + $0x9c] sm:$0xf0]  ;;  %v4548_v41 = vshrl.u32 %v8483_v31, 16 }
 0x3b0   : > { %4685 = vrot.lane.b32.xlu1 %v4534_v45, %s6717_s1  ;;  %5356 = vmatpush.bf16.msrb.mxu0 %v6008_v50  ;;  %v3242_v45 = vld [vmem:[#allocation2 + $0x5c] sm:$0x1]  ;;  %v4782_v59 = vsel %vm3734_vm4, %v4780_v25, %v4781_v60  ;;  %v3549_v60 = vshll.u32 %v8617_v53, 16 }
 0x3b2   : > { %3664 = vrot.lane.b32.xlu0 %v3533_v44, %s6713_s19  ;;  %v3949_v44 = vunpack.c.l.b16 %v3242_v45 }
 0x3b4   : > { %v8562_v26 = vpop.permute.xlu1 %4295  ;;  %5357 = vmatpush.bf16.msrb.mxu0 %v6007_v33  ;;  %v4052_v33 = vrot.slane %v4050_v23, 1 }
 0x3b7   : > { %v4168_v8 = vpop.permute.xlu0 %4167  ;;  %4819 = vrot.lane.b32.xlu2 %v4779_v22, %s6708_s23 }
 0x3b8   : > { %v4938_v2 = vsel %vm1006_vm5, %v4906_v6, %v4168_v8  ;;  %4305 = vrot.lane.b32.xlu1 %v4264_v63, %s6715_s22  ;;  %5358 = vmatpush.bf16.msrb.mxu0 %v6006_v28  ;;  %v6691_v6 = vld [vmem:[#allocation2 + $0x54] sm:$0xf0]  ;;  %v8650_v28 = vld [vmem:[#allocation2 + $0x84] sm:$0xf0] }
 0x3b9   : > { %v4971_v5 = vsel %vm4969_vm11, %v4938_v2, %v8562_v26  ;;  %v3436_v2 = vunpack.c.l.b16 %v3179_v17  ;;  %v8627_v63 = vld [vmem:[#allocation2 + $0x78] sm:$0xff]   ;;  %v6693_v30 = vor.u32 %v6692_v18, %v6691_v6  ;;  %v3551_v17 = vrot.slane %v3549_v60, 1 }
 0x3ba   : > { %5271 = vmatmul.bf16.vlgmr.msrb.gmra.mxu3 %v4971_v5  ;;  %4177 = vrot.lane.b32.xlu0 %v4046_v35, %s6709_s24  ;;  %v8629_v5 = vpack.c.b16 %v4463_v15, %v4463_v15  ;;  %v6190_v35 = vor.u32 %v6189_v61, %v6188_v62  ;;  %v4736_v15 = vunpack.c.l.b16 %v3326_v32  ;;  %v6161_v61 = vld [vmem:[#allocation2 + $0x60] sm:$0xf0] }
 0x3bb   : > { %v3452_v47 = vpack.c.b16 %v3436_v2, %v3436_v2  ;;  %v3756_v48 = vrot.slane %v6693_v30, 1 }
 0x3bc   : > { %5359 = vmatpush.bf16.msrb.mxu0 %v6005_v14  ;;  %v4783_v45 = vrot.slane %v6190_v35, 1 }
 0x3bd   : > { %v3786_v58 = vpop.permute.xlu1 %3785 }
 0x3bf   : > { %3911 = vrot.lane.b32.xlu2 %v8572_v3, %s6716_s2 }
 0x3c0   : > { %3795 = vrot.lane.b32.xlu1 %v3755_v16, %s6705_s21  ;;  %v4048_v16 = vshrl.u32 %v8474_v20, 16  ;;  %v3243_v20 = vld [vmem:[#allocation2 + $0x68] sm:$0x1] }
 0x3c1   : > { %v3657_v1 = vpop.permute.xlu0 %3656 }
 0x3c2   : > { %3666 = vrot.lane.b32.xlu0 %v3545_v0, %s6713_s19  ;;  %v4843_v10 = vsel %vm4839_vm7, %v8063_v49, %v3657_v1  ;;  %v3965_v49 = vpack.c.b16 %v3949_v44, %v3949_v44  ;;  %v3757_v0 = vrot.slane %v3452_v47, 1  ;;  %v4053_v25 = vor.u32 %v4052_v33, %v4048_v16  ;;  %v8657_v44 = vld [vmem:[#allocation2 + $0x88] sm:$0xf] }
 0x3c3   : > { %v4875_v54 = vsel %vm979_vm2, %v4843_v10, %v3786_v58  ;;  %v4784_v58 = vrot.slane %v8629_v5, 1  ;;  %v5019_v10 = vsel %vm622_vm0, %v8562_v26, %v8548_v42  ;;  %v4552_v42 = vrot.slane %v4550_v37, 1 }
 0x3c4   : > { %v4908_v22 = vsel %vm4904_vm9, %v4875_v54, %v3898_v52  ;;  %v4266_v56 = vrot.slane %v3965_v49, 1  ;;  %v4055_v1 = vshll.u32 %v3965_v49, 16  ;;  %v3310_v54 = vld [vmem:[#allocation2 + $0x8c] sm:$0x1]  ;;  %v4808_v52 = vpop.permute.xlu2 %4807  ;;  %v4378_v18 = vunpack.c.l.b16 %v8657_v44 }
 0x3c5   : > { %v4785_v21 = vsel %vm3734_vm4, %v4783_v45, %v4784_v58  ;;  %v3180_v58 = vld [vmem:[#allocation2 + $0x68] sm:$0x1] }
 0x3c6   : > { %v4267_v7 = vsel %vm3734_vm4, %v4265_v39, %v4266_v56  ;;  %v3554_v39 = vshll.u32 %v3452_v47, 16  ;;  %v4553_v56 = vor.u32 %v4552_v42, %v4548_v41  ;;  %v4062_v47 = vshll.u32 %v8550_v40, 16  ;;  %v3311_v41 = vld [vmem:[#allocation2 + $0x98] sm:$0x1]  ;;  %v8693_v42 = vld [vmem:[#allocation2 + $0x84] sm:$0xff]  }
 0x3c7   : > { %4821 = vrot.lane.b32.xlu2 %v4782_v59, %s6708_s23  ;;  %v4057_v59 = vrot.slane %v4055_v1, 1  ;;  %v3437_v60 = vunpack.c.l.b16 %v3180_v58 }
 0x3c8   : > { %4687 = vrot.lane.b32.xlu1 %v4546_v51, %s6717_s1  ;;  %v3758_v51 = vsel %vm3734_vm4, %v3756_v48, %v3757_v0  ;;  %v3556_v33 = vrot.slane %v3554_v39, 1 }
 0x3c9   : > { %v8613_v34 = vpop.permute.xlu1 %4297  ;;  %v4058_v26 = vsel %vm3461_vm1, %v4053_v25, %v4057_v59 }
 0x3ca   : > { %4417 = vrot.lane.b32.xlu0 %v8483_v31, %s6704_s20  ;;  %v3547_v31 = vshrl.u32 %v8617_v53, 16 }
 0x3cb   : > { %v4170_v9 = vpop.permute.xlu0 %4169 }
 0x3cc   : > { %v4940_v8 = vsel %vm1006_vm5, %v4908_v22, %v4170_v9  ;;  %v4555_v22 = vshll.u32 %v8513_v27, 16  ;;  %v3552_v2 = vor.u32 %v3551_v17, %v3547_v31  ;;  %v4752_v27 = vpack.c.b16 %v4378_v18, %v4736_v15 }
 0x3cd   : > { %v4974_v13 = vsel %vm4969_vm11, %v4940_v8, %v8613_v34  ;;  %v4464_v8 = vunpack.c.l.b16 %v3310_v54  ;;  %v3900_v54 = vpop.permute.xlu2 %3899  ;;  %v4377_v15 = vunpack.c.l.b16 %v8693_v42 }
 0x3ce   : > { %5276 = vmatmul.bf16.gmra.mxu3 %v4974_v13  ;;  %v3950_v13 = vunpack.c.l.b16 %v3243_v20  ;;  %v4557_v23 = vrot.slane %v4555_v22, 1  ;;  %v3557_v16 = vsel %vm3461_vm1, %v3552_v2, %v3556_v33  ;;  %v4786_v48 = vrot.slane %v4752_v27, 1 }
 0x3cf   : > { %3913 = vrot.lane.b32.xlu2 %v8627_v63, %s6716_s2  ;;  %v8673_v62 = vpack.c.b16 %v4464_v8, %v4464_v8  ;;  %v4060_v20 = vshrl.u32 %v8550_v40, 16  ;;  %v4465_v8 = vunpack.c.l.b16 %v3311_v41  ;;  %v8716_v58 = vpack.c.b16 %v4378_v18, %v4377_v15 }
 0x3d0   : > { %4307 = vrot.lane.b32.xlu1 %v4267_v7, %s6715_s22  ;;  %v6162_v7 = vld [vmem:[#allocation2 + $0x60] sm:$0xe]  ;;  %v3966_v35 = vpack.c.b16 %v3950_v13, %v3950_v13  ;;  %v4558_v37 = vsel %vm3461_vm1, %v4553_v56, %v4557_v23 }
 0x3d1   : > { %v6163_v45 = vor.u32 %v6162_v7, %v6161_v61  ;;  %v4787_v0 = vrot.slane %v8673_v62, 1  ;;  %v6191_v7 = vld [vmem:[#allocation2 + $0x90] sm:$0xf0]  ;;  %v8712_v33 = vpack.c.b16 %v4465_v8, %v4465_v8 }
 0x3d2   : > { %v8633_v50 = vpop.permute.xlu1 %3787  ;;  %4419 = vrot.lane.b32.xlu0 %v8550_v40, %s6704_s20  ;;  %v4067_v25 = vshll.u32 %v3966_v35, 16 }
 0x3d3   : > { %v4788_v32 = vsel %vm3734_vm4, %v4786_v48, %v4787_v0  ;;  %v3244_v48 = vld [vmem:[#allocation2 + $0x74] sm:$0x1] }
 0x3d4   : > { %v8637_v24 = vpop.permute.xlu0 %3658 }
 0x3d5   : > { %v4810_v0 = vpop.permute.xlu2 %4809 }
 0x3d7   : > { %4823 = vrot.lane.b32.xlu2 %v4785_v21, %s6708_s23  ;;  %v4269_v21 = vrot.slane %v3966_v35, 1  ;;  %v6192_v35 = vld [vmem:[#allocation2 + $0x90] sm:$0xe] }
 0x3d8   : > { %3797 = vrot.lane.b32.xlu1 %v3758_v51, %s6705_s21  ;;  %v4069_v51 = vrot.slane %v4067_v25, 1 }
 0x3da   : > { %v4680_v14 = vpop.permute.xlu1 %4679  ;;  %4179 = vrot.lane.b32.xlu0 %v4058_v26, %s6709_s24  ;;  %v6140_v26 = vld [vmem:[#allocation2 + $0x60] sm:$0xf0] }
 0x3db   : > { %v5052_v49 = vsel %vm5050_vm14, %v5019_v10, %v4680_v14  ;;  %v4064_v10 = vrot.slane %v4062_v47, 1  ;;  %v6629_v14 = vld [vmem:[#allocation2 + $0x18] sm:$0xff]   ;;  %v8718_v47 = vld [vmem:[#allocation2 + $0x90] sm:$0xff]  }
 0x3dc   : > { %v5084_v6 = vsel %vm988_vm3, %v5052_v49, %v4808_v52  ;;  %v8666_v9 = vpop.permute.xlu0 %4409  ;;  %v4845_v59 = vsel %vm4839_vm7, %v6629_v14, %v8637_v24  ;;  %v4268_v52 = vrot.slane %v6163_v45, 1  ;;  %v3453_v49 = vpack.c.b16 %v3437_v60, %v3437_v60 }
 0x3dd   : > { %5950 = vmatmul.msk.bf16.vlgmr.msrb.gmra.mxu0 %vm5227_vm6, %v5084_v6  ;;  %v6141_v6 = vld [vmem:[#allocation2 + $0x60] sm:$0xe]  ;;  %v8696_v22 = vor.u32 %v4064_v10, %v4060_v20  ;;  %v4877_v40 = vsel %vm979_vm2, %v4845_v59, %v8633_v50  ;;  %v3184_v50 = vld [vmem:[#allocation2 + $0x98] sm:$0x1]  ;;  %v6193_v60 = vor.u32 %v6192_v35, %v6191_v7  ;;  %v4567_v10 = vshll.u32 %v8552_v46, 16 }
 0x3de   : > { %v4270_v24 = vsel %vm3734_vm4, %v4268_v52, %v4269_v21  ;;  %v6142_v31 = vor.u32 %v6141_v6, %v6140_v26  ;;  %v3566_v39 = vshll.u32 %v3453_v49, 16  ;;  %v4910_v2 = vsel %vm4904_vm9, %v4877_v40, %v3900_v54  ;;  %v6652_v21 = vld [vmem:[#allocation2 + $0x6c] sm:$0xe]  ;;  %v3248_v6 = vld [vmem:[#allocation2 + $0xa4] sm:$0x1]  ;;  %v8756_v35 = vld [vmem:[#allocation2 + $0x9c] sm:$0xff]  }
 0x3df   : > { %3915 = vrot.lane.b32.xlu2 %v8648_v4, %s6716_s2  ;;  %v4070_v13 = vsel %vm3461_vm1, %v8696_v22, %v4069_v51  ;;  %v3760_v27 = vrot.slane %v3453_v49, 1  ;;  %v3441_v45 = vunpack.c.l.b16 %v3184_v50  ;;  %v5021_v44 = vsel %vm622_vm0, %v8613_v34, %v8666_v9  ;;  %v6694_v50 = vld [vmem:[#allocation2 + $0x6c] sm:$0xf0] }
 0x3e0   : > { %4689 = vrot.lane.b32.xlu1 %v4558_v37, %s6717_s1  ;;  %v3759_v37 = vrot.slane %v6142_v31, 1  ;;  %v4790_v20 = vrot.slane %v8712_v33, 1  ;;  %v4598_v14 = vshll.u32 %v8716_v58, 16  ;;  %v4603_v59 = vshll.u32 %v8673_v62, 16 }
 0x3e1   : > { %v8734_v46 = vpack.c.b16 %v3441_v45, %v3441_v45  ;;  %v3951_v52 = vunpack.c.l.b16 %v3244_v48  ;;  %v4596_v9 = vshrl.u32 %v8716_v58, 16  ;;  %v4110_v49 = vshll.u32 %v8718_v47, 16  ;;  %v3902_v45 = vpop.permute.xlu2 %3901 }
 0x3e2   : > { %v8679_v30 = vpop.permute.xlu1 %4299  ;;  %3668 = vrot.lane.b32.xlu0 %v3557_v16, %s6713_s19  ;;  %v3568_v16 = vrot.slane %v3566_v39, 1  ;;  %v3761_v25 = vsel %vm3734_vm4, %v3759_v37, %v3760_v27  ;;  %v4600_v51 = vrot.slane %v4598_v14, 1  ;;  %v4789_v41 = vrot.slane %v6193_v60, 1  ;;  %v6697_v37 = vld [vmem:[#allocation2 + $0x9c] sm:$0xf0] }
 0x3e3   : > { %v4569_v26 = vrot.slane %v4567_v10, 1  ;;  %v3614_v15 = vshll.u32 %v8734_v46, 16  ;;  %v8746_v39 = vpack.c.b16 %v3951_v52, %v3951_v52  ;;  %v4074_v60 = vshll.u32 %v8572_v3, 16  ;;  %v6655_v52 = vld [vmem:[#allocation2 + $0x9c] sm:$0xe] }
 0x3e4   : > { %v8685_v1 = vpop.permute.xlu0 %4411  ;;  %v4601_v40 = vor.u32 %v4600_v51, %v4596_v9  ;;  %v4791_v8 = vsel %vm3734_vm4, %v4789_v41, %v4790_v20  ;;  %v8780_v51 = vld [vmem:[#allocation2 + $0x9c] sm:$0xff]  }
 0x3e5   : > { %v4570_v7 = vsel %vm3461_vm1, %v8696_v22, %v4569_v26 }
 0x3e7   : > { %4825 = vrot.lane.b32.xlu2 %v4788_v32, %s6708_s23  ;;  %v3569_v32 = vsel %vm3461_vm1, %v8696_v22, %v3568_v16  ;;  %v3955_v16 = vunpack.c.l.b16 %v3248_v6 }
 0x3e8   : > { %4309 = vrot.lane.b32.xlu1 %v4270_v24, %s6715_s22  ;;  %v4605_v24 = vrot.slane %v4603_v59, 1 }
 0x3e9   : > { %v8771_v20 = vpack.c.b16 %v3955_v16, %v3955_v16 }
 0x3ea   : > { %v8702_v17 = vpop.permute.xlu1 %3789  ;;  %4181 = vrot.lane.b32.xlu0 %v4070_v13, %s6709_s24  ;;  %v3181_v13 = vld [vmem:[#allocation2 + $0x74] sm:$0x1]  ;;  %v8752_v27 = vsel %vm3461_vm1, %v4601_v40, %v4605_v24  ;;  %v4076_v40 = vrot.slane %v4074_v60, 1 }
 0x3eb   : > { %v8810_v60 = vld [vmem:[#allocation2 + $0xb4] sm:$0xff]  }
 0x3ec   : > { %v4172_v56 = vpop.permute.xlu0 %4171 }
 0x3ed   : > { %v4942_v23 = vsel %vm1006_vm5, %v4910_v2, %v4172_v56  ;;  %v6653_v56 = vor.u32 %v6652_v21, %v8574_v57  ;;  %v8749_v2 = vld [vmem:[#allocation2 + $0x6c] sm:$0xff]   ;;  %v3438_v57 = vunpack.c.l.b16 %v3181_v13  ;;  %v4272_v21 = vrot.slane %v8746_v39, 1 }
 0x3ee   : > { %v4977_v61 = vsel %vm4969_vm11, %v4942_v23, %v8679_v30  ;;  %v6695_v23 = vld [vmem:[#allocation2 + $0x6c] sm:$0xe] }
 0x3ef   : > { %5281 = vmatmul.bf16.gmra.mxu3 %v4977_v61  ;;  %3917 = vrot.lane.b32.xlu2 %v8718_v47, %s6716_s2  ;;  %v4112_v61 = vrot.slane %v4110_v49, 1  ;;  %v4271_v22 = vrot.slane %v6653_v56, 1  ;;  %v8782_v49 = vld [vmem:[#allocation2 + $0x9c] sm:$0xf0]  ;;  %v6696_v41 = vor.u32 %v6695_v23, %v6694_v50  ;;  %v4072_v23 = vshrl.u32 %v8572_v3, 16 }
 0x3f0   : > { %3799 = vrot.lane.b32.xlu1 %v3761_v25, %s6705_s21  ;;  %v6698_v25 = vld [vmem:[#allocation2 + $0x9c] sm:$0xe]  ;;  %v6656_v3 = vor.u32 %v6655_v52, %v8642_v11  ;;  %v3245_v52 = vld [vmem:[#allocation2 + $0x80] sm:$0x1] }
 0x3f1   : > { %v6699_v24 = vor.u32 %v6698_v25, %v6697_v37  ;;  %v3762_v16 = vrot.slane %v6696_v41, 1 }
 0x3f2   : > { %v4682_v18 = vpop.permute.xlu1 %4681  ;;  %3670 = vrot.lane.b32.xlu0 %v3569_v32, %s6713_s19  ;;  %v3185_v32 = vld [vmem:[#allocation2 + $0xa4] sm:$0x1] }
 0x3f3   : > { %v5054_v54 = vsel %vm5050_vm14, %v5021_v44, %v4682_v18  ;;  %v4574_v18 = vshll.u32 %v8576_v38, 16  ;;  %v4283_v50 = vrot.slane %v6699_v24, 1 }
 0x3f4   : > { %v5086_v34 = vsel %vm988_vm3, %v5054_v54, %v4810_v0  ;;  %v3661_v62 = vpop.permute.xlu0 %3660  ;;  %v3616_v0 = vrot.slane %v3614_v15, 1  ;;  %v8775_v54 = vpack.c.b16 %v3438_v57, %v3438_v57  ;;  %v8788_v15 = vld [vmem:[#allocation2 + $0xa8] sm:$0xff]  }
 0x3f5   : > { %5951 = vmatmul.msk.bf16.gmra.mxu0 %vm5227_vm6, %v5086_v34  ;;  %v4847_v31 = vsel %vm4839_vm7, %v8309_v43, %v3661_v62  ;;  %v4108_v43 = vshrl.u32 %v8718_v47, 16  ;;  %v3249_v62 = vld [vmem:[#allocation2 + $0xb0] sm:$0x1]  ;;  %v4634_v57 = vshll.u32 %v8788_v15, 16 }
 0x3f6   : > { %v4879_v48 = vsel %vm979_vm2, %v4847_v31, %v8702_v17  ;;  %v4615_v17 = vshll.u32 %v8712_v33, 16  ;;  %v4273_v33 = vsel %vm3734_vm4, %v4271_v22, %v4272_v21  ;;  %v4284_v31 = vrot.slane %v8771_v20, 1 }
 0x3f7   : > { %4827 = vrot.lane.b32.xlu2 %v4791_v8, %s6708_s23  ;;  %v8768_v44 = vor.u32 %v4112_v61, %v4108_v43  ;;  %v4912_v59 = vsel %vm4904_vm9, %v4879_v48, %v3902_v45  ;;  %v3442_v8 = vunpack.c.l.b16 %v3185_v32  ;;  %v3956_v56 = vunpack.c.l.b16 %v3249_v62  ;;  %v4812_v48 = vpop.permute.xlu2 %4811 }
 0x3f8   : > { %4691 = vrot.lane.b32.xlu1 %v4570_v7, %s6717_s1  ;;  %v4617_v26 = vrot.slane %v4615_v17, 1  ;;  %v4079_v61 = vshll.u32 %v8746_v39, 16  ;;  %v3314_v7 = vld [vmem:[#allocation2 + $0xbc] sm:$0x1]  ;;  %v3763_v43 = vrot.slane %v8775_v54, 1  ;;  %v8805_v45 = vsel %vm3734_vm4, %v4283_v50, %v4284_v31 }
 0x3f9   : > { %v3617_v34 = vsel %vm3461_vm1, %v8768_v44, %v3616_v0  ;;  %v4077_v0 = vor.u32 %v4076_v40, %v4072_v23  ;;  %v8807_v25 = vpack.c.b16 %v3442_v8, %v3442_v8  ;;  %v4576_v39 = vrot.slane %v4574_v18, 1  ;;  %v3187_v8 = vld [vmem:[#allocation2 + $0xbc] sm:$0x1] }
 0x3fa   : > { %v8763_v10 = vpop.permute.xlu1 %4301  ;;  %4421 = vrot.lane.b32.xlu0 %v8576_v38, %s6704_s20  ;;  %v8792_v13 = vsel %vm3461_vm1, %v8768_v44, %v4617_v26  ;;  %v4086_v22 = vshll.u32 %v8627_v63, 16  ;;  %v8815_v17 = vpack.c.b16 %v3956_v56, %v3956_v56  ;;  %v4572_v32 = vshrl.u32 %v8576_v38, 16 }
 0x3fb   : > { %v3764_v11 = vsel %vm3734_vm4, %v3762_v16, %v3763_v43  ;;  %v4579_v18 = vshll.u32 %v8592_v12, 16  ;;  %v4636_v41 = vrot.slane %v4634_v57, 1  ;;  %v9366_v62 = vunpack.c.h.b16 %v8810_v60 }
 0x3fc   : > { %v4174_v14 = vpop.permute.xlu0 %4173  ;;  %v3775_v38 = vrot.slane %v8807_v25, 1  ;;  %v4632_v40 = vshrl.u32 %v8788_v15, 16  ;;  %v4139_v31 = vshll.u32 %v8815_v17, 16  ;;  %v3578_v50 = vshll.u32 %v8775_v54, 16 }
 0x3fd   : > { %v4944_v9 = vsel %vm1006_vm5, %v4912_v59, %v4174_v14  ;;  %v4468_v14 = vunpack.c.l.b16 %v3314_v7  ;;  %v4081_v59 = vrot.slane %v4079_v61, 1  ;;  %v4122_v23 = vshll.u32 %v8756_v35, 16 }
 0x3fe   : > { %v4980_v6 = vsel %vm4969_vm11, %v4944_v9, %v8763_v10  ;;  %v8819_v9 = vld [vmem:[#allocation2 + $0xb4] sm:$0xff]   ;;  %v3952_v61 = vunpack.c.l.b16 %v3245_v52  ;;  %v5023_v7 = vsel %vm622_vm0, %v8679_v30, %v8685_v1  ;;  %v8840_v43 = vor.u32 %v4636_v41, %v4632_v40  ;;  %v6164_v30 = vld [vmem:[#allocation2 + $0x78] sm:$0xf0] }
 0x3ff   : > { %3678 = vrot.lane.b32.xlu2 %v3617_v34, %s6713_s19  ;;  %5286 = vmatmul.bf16.gmra.mxu3 %v4980_v6  ;;  %v3573_v34 = vshll.u32 %v8749_v2, 16  ;;  %v4082_v26 = vsel %vm3461_vm1, %v4077_v0, %v4081_v59  ;;  %v4577_v6 = vor.u32 %v4576_v39, %v4572_v32  ;;  %v8830_v24 = vpack.c.b16 %v4468_v14, %v4468_v14  ;;  %v8857_v52 = vpop.permute.xlu2 %3903 }
 0x400   : > { %4311 = vrot.lane.b32.xlu1 %v4273_v33, %s6715_s22  ;;  %v3774_v33 = vrot.slane %v6656_v3, 1  ;;  %v4385_v12 = vunpack.c.l.b16 %v8819_v9  ;;  %v4141_v57 = vrot.slane %v4139_v31, 1  ;;  %v4581_v54 = vrot.slane %v4579_v18, 1 }
 0x401   : > { %v3575_v56 = vrot.slane %v3573_v34, 1  ;;  %v3571_v39 = vshrl.u32 %v8749_v2, 16  ;;  %v3444_v14 = vunpack.c.l.b16 %v3187_v8  ;;  %v3968_v40 = vpack.c.b16 %v3952_v61, %v3952_v61  ;;  %v3182_v8 = vld [vmem:[#allocation2 + $0x80] sm:$0x1] }
 0x402   : > { %v8798_v37 = vpop.permute.xlu1 %3791  ;;  %4423 = vrot.lane.b32.xlu0 %v8627_v63, %s6704_s20  ;;  %v8844_v0 = vpack.c.b16 %v9366_v62, %v4385_v12  ;;  %v8853_v1 = vsel %vm3461_vm1, %v8840_v43, %v4141_v57  ;;  %v3776_v18 = vsel %vm3734_vm4, %v3774_v33, %v3775_v38  ;;  %v4582_v31 = vsel %vm3461_vm1, %v4577_v6, %v4581_v54  ;;  %v3203_v57 = vld [vmem:[#allocation2 + $0xb4] sm:$0xe] }
 0x403   : > { %v3576_v41 = vor.u32 %v3575_v56, %v3571_v39  ;;  %v3580_v12 = vrot.slane %v3578_v50, 1  ;;  %v4127_v33 = vshll.u32 %v8771_v20, 16  ;;  %v9367_v38 = vunpack.c.h.b16 %v8819_v9  ;;  %v3313_v20 = vld [vmem:[#allocation2 + $0xb0] sm:$0x1] }
 0x404   : > { %v8813_v21 = vpop.permute.xlu0 %3662  ;;  %v4646_v34 = vshll.u32 %v8844_v0, 16  ;;  %v8867_v56 = vpack.c.b16 %v3444_v14, %v3444_v14  ;;  %v3439_v61 = vunpack.c.l.b16 %v3182_v8  ;;  %v4091_v54 = vshll.u32 %v3968_v40, 16 }
 0x405   : > { %v3581_v6 = vsel %vm3461_vm1, %v3576_v41, %v3580_v12  ;;  %v6171_v12 = vld [vmem:[#allocation2 + $0xa8] sm:$0xe] }
 0x406   : > { %v3781_v41 = vrot.slane %v8867_v56, 1 }
 0x407   : > { %4429 = vrot.lane.b32.xlu2 %v8780_v51, %s6704_s20 }
 0x408   : > { %3801 = vrot.lane.b32.xlu1 %v3764_v11, %s6705_s21  ;;  %v4651_v11 = vshll.u32 %v8830_v24, 16 }
 0x40a   : > { %v4684_v16 = vpop.permute.xlu1 %4683  ;;  %4183 = vrot.lane.b32.xlu0 %v4082_v26, %s6709_s24  ;;  %v4124_v26 = vrot.slane %v4122_v23, 1 }
 0x40b   : > { %v5056_v3 = vsel %vm5050_vm14, %v5023_v7, %v4684_v16  ;;  %v4644_v7 = vshrl.u32 %v8844_v0, 16  ;;  %v4648_v16 = vrot.slane %v4646_v34, 1  ;;  %v3717_v34 = vunpack.c.l.b16 %v3203_v57 }
 0x40c   : > { %v5088_v59 = vsel %vm988_vm3, %v5056_v3, %v4812_v48  ;;  %v8849_v32 = vpop.permute.xlu0 %4413  ;;  %v6165_v48 = vld [vmem:[#allocation2 + $0x78] sm:$0xe]  ;;  %v4120_v3 = vshrl.u32 %v8756_v35, 16  ;;  %v4093_v57 = vrot.slane %v4091_v54, 1 }
 0x40d   : > { %5952 = vmatmul.msk.bf16.gmra.mxu0 %vm5227_vm6, %v5088_v59  ;;  %v6166_v23 = vor.u32 %v6165_v48, %v6164_v30  ;;  %v4649_v39 = vor.u32 %v4648_v16, %v4644_v7  ;;  %v4653_v59 = vrot.slane %v4651_v11, 1  ;;  %v4129_v30 = vrot.slane %v4127_v33, 1 }
 0x40e   : > { %v4125_v50 = vor.u32 %v4124_v26, %v4120_v3  ;;  %v4275_v48 = vrot.slane %v3968_v40, 1  ;;  %v3733_v11 = vpack.c.b16 %v9367_v38, %v3717_v34  ;;  %v4084_v26 = vshrl.u32 %v8627_v63, 16  ;;  %v6143_v3 = vld [vmem:[#allocation2 + $0x78] sm:$0xf0]  ;;  %v4814_v34 = vpop.permute.xlu2 %4813 }
 0x40f   : > { %3809 = vrot.lane.b32.xlu2 %v3776_v18, %s6705_s21  ;;  %v4088_v18 = vrot.slane %v4086_v22, 1  ;;  %v8877_v14 = vsel %vm3461_vm1, %v4649_v39, %v4653_v59  ;;  %v4274_v22 = vrot.slane %v6166_v23, 1  ;;  %v3455_v7 = vpack.c.b16 %v3439_v61, %v3439_v61  ;;  %v6144_v39 = vld [vmem:[#allocation2 + $0x78] sm:$0xe]  ;;  %v6630_v59 = vld [vmem:[#allocation2 + $0x30] sm:$0xff]  }
 0x410   : > { %4693 = vrot.lane.b32.xlu1 %v4582_v31, %s6717_s1  ;;  %v6170_v31 = vld [vmem:[#allocation2 + $0xa8] sm:$0xf0]  ;;  %v4130_v16 = vsel %vm3461_vm1, %v4125_v50, %v4129_v30  ;;  %v4467_v33 = vunpack.c.l.b16 %v3313_v20  ;;  %v3780_v40 = vrot.slane %v3733_v11, 1  ;;  %v4287_v50 = vrot.slane %v8815_v17, 1 }
 0x411   : > { %v4089_v63 = vor.u32 %v4088_v18, %v4084_v26  ;;  %v4276_v23 = vsel %vm3734_vm4, %v4274_v22, %v4275_v48  ;;  %v6172_v38 = vor.u32 %v6171_v12, %v6170_v31  ;;  %v6145_v54 = vor.u32 %v6144_v39, %v6143_v3  ;;  %v6658_v3 = vld [vmem:[#allocation2 + $0x84] sm:$0xe] }
 0x412   : > { %v8873_v62 = vpop.permute.xlu1 %4303  ;;  %3672 = vrot.lane.b32.xlu0 %v3581_v6, %s6713_s19  ;;  %v4849_v6 = vsel %vm4839_vm7, %v6630_v59, %v8813_v21  ;;  %v8891_v61 = vsel %vm3734_vm4, %v3780_v40, %v3781_v41  ;;  %v3590_v30 = vshll.u32 %v3455_v7, 16  ;;  %v8898_v11 = vpack.c.b16 %v4467_v33, %v4467_v33 }
 0x413   : > { %v4881_v20 = vsel %vm979_vm2, %v4849_v6, %v8798_v37  ;;  %v4094_v21 = vsel %vm3461_vm1, %v4089_v63, %v4093_v57  ;;  %v4286_v48 = vrot.slane %v6172_v38, 1  ;;  %v3766_v26 = vrot.slane %v3455_v7, 1 }
 0x414   : > { %v8883_v8 = vpop.permute.xlu0 %4415  ;;  %v4914_v22 = vsel %vm4904_vm9, %v4881_v20, %v8857_v52  ;;  %v3765_v31 = vrot.slane %v6145_v54, 1  ;;  %v3592_v37 = vrot.slane %v3590_v30, 1  ;;  %v4591_v7 = vshll.u32 %v8629_v5, 16  ;;  %v3246_v52 = vld [vmem:[#allocation2 + $0x8c] sm:$0x1]  ;;  %v8922_v30 = vld [vmem:[#allocation2 + $0xb4] sm:$0xff]  }
 0x415   : > { %v4288_v17 = vsel %vm3734_vm4, %v4286_v48, %v4287_v50  ;;  %v5025_v59 = vsel %vm622_vm0, %v8763_v10, %v8849_v32  ;;  %v3953_v54 = vunpack.c.l.b16 %v3246_v52  ;;  %v8924_v48 = vld [vmem:[#allocation2 + $0xb4] sm:$0xf0]  ;;  %v3330_v32 = vld [vmem:[#allocation2 + $0xb4] sm:$0xe] }
 0x416   : > { %v3767_v38 = vsel %vm3734_vm4, %v3765_v31, %v3766_v26  ;;  %v3906_v39 = vpop.permute.xlu2 %3905  ;;  %v3593_v33 = vsel %vm3461_vm1, %v4089_v63, %v3592_v37  ;;  %v4593_v50 = vrot.slane %v4591_v7, 1  ;;  %v3199_v31 = vld [vmem:[#allocation2 + $0x84] sm:$0xe] }
 0x417   : > { %4191 = vrot.lane.b32.xlu2 %v4130_v16, %s6709_s24  ;;  %v4639_v16 = vshll.u32 %v8898_v11, 16 }
 0x418   : > { %4313 = vrot.lane.b32.xlu1 %v4276_v23, %s6715_s22  ;;  %v4594_v26 = vsel %vm3461_vm1, %v4089_v63, %v4593_v50 }
 0x419   : > { %v4641_v40 = vrot.slane %v4639_v16, 1  ;;  %v3162_v16 = vld [vmem:[#allocation2 + $0x84] sm:$0xf] }
 0x41a   : > { %v3794_v18 = vpop.permute.xlu1 %3793  ;;  %4185 = vrot.lane.b32.xlu0 %v4094_v21, %s6709_s24 }
 0x41b   : > { %v4642_v21 = vsel %vm3461_vm1, %v8840_v43, %v4641_v40 }
 0x41c   : > { %v4176_v41 = vpop.permute.xlu0 %4175 }
 0x41d   : > { %v4946_v12 = vsel %vm1006_vm5, %v4914_v22, %v4176_v41  ;;  %v3969_v41 = vpack.c.b16 %v3953_v54, %v3953_v54  ;;  %v3183_v22 = vld [vmem:[#allocation2 + $0x8c] sm:$0x1] }
 0x41e   : > { %v4983_v57 = vsel %vm4969_vm11, %v4946_v12, %v8873_v62  ;;  %v4740_v12 = vunpack.c.l.b16 %v3330_v32  ;;  %v3440_v7 = vunpack.c.l.b16 %v3183_v22 }
 0x41f   : > { %4321 = vrot.lane.b32.xlu2 %v4288_v17, %s6715_s22  ;;  %5291 = vmatmul.bf16.gmra.mxu3 %v4983_v57  ;;  %v4816_v57 = vpop.permute.xlu2 %4815  ;;  %v4103_v22 = vshll.u32 %v3969_v41, 16 }
 0x420   : > { %3803 = vrot.lane.b32.xlu1 %v3767_v38, %s6705_s21  ;;  %v4278_v38 = vrot.slane %v3969_v41, 1 }
 0x422   : > { %v4686_v6 = vpop.permute.xlu1 %4685  ;;  %3674 = vrot.lane.b32.xlu0 %v3593_v33, %s6713_s19 }
 0x423   : > { %v5058_v23 = vsel %vm5050_vm14, %v5025_v59, %v4686_v6  ;;  %v3387_v59 = vunpack.c.l.b16 %v3162_v16  ;;  %v4098_v6 = vshll.u32 %v8648_v4, 16 }
 0x424   : > { %v5090_v5 = vsel %vm988_vm3, %v5058_v23, %v4814_v34  ;;  %v3665_v20 = vpop.permute.xlu0 %3664  ;;  %v6659_v34 = vor.u32 %v6658_v3, %v8650_v28  ;;  %v3713_v28 = vunpack.c.l.b16 %v3199_v31  ;;  %v3456_v23 = vpack.c.b16 %v3440_v7, %v3440_v7 }
 0x425   : > { %5953 = vmatmul.msk.bf16.gmra.mxu0 %vm5227_vm6, %v5090_v5  ;;  %v4851_v10 = vsel %vm4839_vm7, %v8493_v55, %v3665_v20  ;;  %v3388_v55 = vunpack.c.h.b16 %v8693_v42  ;;  %v4100_v20 = vrot.slane %v4098_v6, 1 }
 0x426   : > { %v4883_v17 = vsel %vm979_vm2, %v4851_v10, %v3794_v18  ;;  %v4277_v63 = vrot.slane %v6659_v34, 1  ;;  %v9396_v18 = vunpack.c.h.b16 %v8810_v60  ;;  %v4096_v34 = vshrl.u32 %v8648_v4, 16  ;;  %v3247_v4 = vld [vmem:[#allocation2 + $0x98] sm:$0x1] }
 0x427   : > { %4703 = vrot.lane.b32.xlu2 %v4642_v21, %s6717_s1  ;;  %v4916_v3 = vsel %vm4904_vm9, %v4883_v17, %v3906_v39  ;;  %v3729_v50 = vpack.c.b16 %v3388_v55, %v3713_v28  ;;  %v4799_v39 = vrot.slane %v8830_v24, 1  ;;  %v8950_v5 = vpack.c.b16 %v3388_v55, %v3387_v59  ;;  %v8958_v17 = vpop.permute.xlu2 %3907 }
 0x428   : > { %4695 = vrot.lane.b32.xlu1 %v4594_v26, %s6717_s1  ;;  %v4756_v40 = vpack.c.b16 %v9396_v18, %v4740_v12  ;;  %v3395_v21 = vunpack.c.l.b16 %v8810_v60  ;;  %v3769_v26 = vrot.slane %v3456_v23, 1  ;;  %v4101_v12 = vor.u32 %v4100_v20, %v4096_v34 }
 0x429   : > { %v3768_v32 = vrot.slane %v3729_v50, 1  ;;  %v3597_v55 = vshll.u32 %v8950_v5, 16  ;;  %v9397_v60 = vunpack.c.h.b16 %v8819_v9  ;;  %v5027_v28 = vsel %vm622_vm0, %v8873_v62, %v8883_v8  ;;  %v6167_v8 = vld [vmem:[#allocation2 + $0x90] sm:$0xf0] }
 0x42a   : > { %v8933_v37 = vpop.permute.xlu1 %4305  ;;  %4425 = vrot.lane.b32.xlu0 %v8716_v58, %s6704_s20  ;;  %v4279_v58 = vsel %vm3734_vm4, %v4277_v63, %v4278_v38  ;;  %v4798_v54 = vrot.slane %v4756_v40, 1  ;;  %v4105_v63 = vrot.slane %v4103_v22, 1  ;;  %v3602_v18 = vshll.u32 %v3456_v23, 16 }
 0x42b   : > { %v8964_v16 = vpack.c.b16 %v9397_v60, %v3395_v21  ;;  %v3599_v38 = vrot.slane %v3597_v55, 1  ;;  %v3954_v40 = vunpack.c.l.b16 %v3247_v4  ;;  %v3650_v21 = vshll.u32 %v8867_v56, 16 }
 0x42c   : > { %v4178_v52 = vpop.permute.xlu0 %4177  ;;  %v4800_v24 = vsel %vm3734_vm4, %v4798_v54, %v4799_v39  ;;  %v4106_v41 = vsel %vm3461_vm1, %v4101_v12, %v4105_v63  ;;  %v6168_v39 = vld [vmem:[#allocation2 + $0x90] sm:$0xe]  ;;  %v3604_v20 = vrot.slane %v3602_v18, 1 }
 0x42d   : > { %v4948_v33 = vsel %vm1006_vm5, %v4916_v3, %v4178_v52  ;;  %v3645_v7 = vshll.u32 %v8964_v16, 16  ;;  %v3251_v52 = vld [vmem:[#allocation2 + $0xc8] sm:$0x1]  ;;  %v3643_v23 = vshrl.u32 %v8964_v16, 16 }
 0x42e   : > { %v4986_v42 = vsel %vm4969_vm11, %v4948_v33, %v8933_v37  ;;  %v3595_v33 = vshrl.u32 %v8950_v5, 16  ;;  %v3958_v62 = vunpack.c.l.b16 %v3251_v52 }
 0x42f   : > { %3923 = vrot.lane.b32.xlu2 %v8922_v30, %s6716_s2  ;;  %5296 = vmatmul.bf16.gmra.mxu3 %v4986_v42  ;;  %v8979_v42 = vld [vmem:[#allocation2 + $0xc0] sm:$0xff]   ;;  %v3647_v50 = vrot.slane %v3645_v7, 1  ;;  %v4818_v54 = vpop.permute.xlu2 %4817 }
 0x430   : > { %4315 = vrot.lane.b32.xlu1 %v4279_v58, %s6715_s22  ;;  %v3600_v58 = vor.u32 %v3599_v38, %v3595_v33  ;;  %v8988_v12 = vpack.c.b16 %v3958_v62, %v3958_v62  ;;  %v4658_v60 = vshll.u32 %v8979_v42, 16  ;;  %v3772_v38 = vrot.slane %v8734_v46, 1 }
 0x431   : > { %v3648_v22 = vor.u32 %v3647_v50, %v3643_v23  ;;  %v4656_v18 = vshrl.u32 %v8979_v42, 16 }
 0x432   : > { %v8953_v10 = vpop.permute.xlu1 %3795  ;;  %4427 = vrot.lane.b32.xlu0 %v8718_v47, %s6704_s20  ;;  %v3770_v47 = vsel %vm3734_vm4, %v3768_v32, %v3769_v26  ;;  %v6146_v32 = vld [vmem:[#allocation2 + $0x90] sm:$0xf0]  ;;  %v6147_v26 = vld [vmem:[#allocation2 + $0x90] sm:$0xe]  ;;  %v3605_v34 = vsel %vm3461_vm1, %v3600_v58, %v3604_v20  ;;  %v4163_v7 = vshll.u32 %v8988_v12, 16  ;;  %v4660_v52 = vrot.slane %v4658_v60, 1 }
 0x433   : > { %v6148_v63 = vor.u32 %v6147_v26, %v6146_v32  ;;  %v6661_v32 = vld [vmem:[#allocation2 + $0x9c] sm:$0xe] }
 0x434   : > { %v3667_v31 = vpop.permute.xlu0 %3666  ;;  %v4165_v58 = vrot.slane %v4163_v7, 1  ;;  %v6662_v7 = vor.u32 %v6661_v32, %v8782_v49  ;;  %v6195_v32 = vld [vmem:[#allocation2 + $0xa8] sm:$0xe] }
 0x435   : > { %v3771_v33 = vrot.slane %v6148_v63, 1 }
 0x437   : > { %4833 = vrot.lane.b32.xlu2 %v4800_v24, %s6708_s23  ;;  %v6169_v24 = vor.u32 %v6168_v39, %v6167_v8  ;;  %v3773_v46 = vsel %vm3734_vm4, %v3771_v33, %v3772_v38 }
 0x438   : > { %3805 = vrot.lane.b32.xlu1 %v3770_v47, %s6705_s21  ;;  %v3652_v47 = vrot.slane %v3650_v21, 1 }
 0x43a   : > { %v4688_v9 = vpop.permute.xlu1 %4687  ;;  %4187 = vrot.lane.b32.xlu0 %v4106_v41, %s6709_s24  ;;  %v4280_v41 = vrot.slane %v6169_v24, 1 }
 0x43b   : > { %v5060_v3 = vsel %vm5050_vm14, %v5027_v28, %v4688_v9  ;;  %v6631_v28 = vld [vmem:[#allocation2 + $0x48] sm:$0xff]  }
 0x43c   : > { %v5092_v59 = vsel %vm988_vm3, %v5060_v3, %v4816_v57  ;;  %v4418_v6 = vpop.permute.xlu0 %4417  ;;  %v3970_v57 = vpack.c.b16 %v3954_v40, %v3954_v40  ;;  %v4853_v9 = vsel %vm4839_vm7, %v6631_v28, %v3667_v31  ;;  %v3910_v40 = vpop.permute.xlu2 %3909  ;;  %v9008_v31 = vor.u32 %v4660_v52, %v4656_v18 }
 0x43d   : > { %5954 = vmatmul.msk.bf16.gmra.mxu0 %vm5227_vm6, %v5092_v59  ;;  %v4885_v59 = vsel %vm979_vm2, %v4853_v9, %v8953_v10  ;;  %v4792_v52 = vrot.slane %v6662_v7, 1  ;;  %v6149_v7 = vld [vmem:[#allocation2 + $0xa8] sm:$0xf0] }
 0x43e   : > { %v4281_v56 = vrot.slane %v3970_v57, 1  ;;  %v4115_v50 = vshll.u32 %v3970_v57, 16  ;;  %v4918_v39 = vsel %vm4904_vm9, %v4885_v59, %v8958_v17  ;;  %v4166_v20 = vsel %vm3461_vm1, %v9008_v31, %v4165_v58  ;;  %v3312_v57 = vld [vmem:[#allocation2 + $0xa4] sm:$0x1]  ;;  %v9023_v17 = vld [vmem:[%s9362_s15] ss:$0 sm:$0xff] }
 0x43f   : > { %4435 = vrot.lane.b32.xlu2 %v8979_v42, %s6704_s20 }
 0x440   : > { %4697 = vrot.lane.b32.xlu1 %v8752_v27, %s6717_s1  ;;  %v3653_v27 = vsel %vm3461_vm1, %v3648_v22, %v3652_v47  ;;  %v4282_v3 = vsel %vm3734_vm4, %v4280_v41, %v4281_v56  ;;  %v4117_v21 = vrot.slane %v4115_v50, 1  ;;  %v5272_v22 = vpop.f32.mrf.mxu3  ;;  %v4466_v47 = vunpack.c.l.b16 %v3312_v57  ;;  %v6194_v57 = vld [vmem:[#allocation2 + $0xa8] sm:$0xf0] }
 0x442   : > { %v8990_v55 = vpop.permute.xlu1 %4307  ;;  %3676 = vrot.lane.b32.xlu0 %v3605_v34, %s6713_s19  ;;  %v4118_v26 = vsel %vm3461_vm1, %v8768_v44, %v4117_v21  ;;  %v5029_v34 = vsel %vm622_vm0, %v8933_v37, %v4418_v6  ;;  %v4622_v44 = vshll.u32 %v8780_v51, 16  ;;  %v4482_v38 = vpack.c.b16 %v4466_v47, %v4466_v47 }
 0x444   : > { %v8994_v4 = vpop.permute.xlu0 %4419  ;;  %v4820_v60 = vpop.permute.xlu2 %4819  ;;  %v4624_v28 = vrot.slane %v4622_v44, 1  ;;  %v4627_v33 = vshll.u32 %v4482_v38, 16 }
 0x447   : > { %3684 = vrot.lane.b32.xlu2 %v3653_v27, %s6713_s19  ;;  %v5273_v27 = vadd.f32 %v9023_v17, %v5272_v22 }
 0x448   : > { %4317 = vrot.lane.b32.xlu1 %v4282_v3, %s6715_s22  ;;  %v4793_v3 = vrot.slane %v4482_v38, 1 }
 0x44a   : > { %v3798_v62 = vpop.permute.xlu1 %3797  ;;  %3807 = vrot.lane.b32.xlu0 %v3773_v46, %s6705_s21  ;;  %v4794_v50 = vsel %vm3734_vm4, %v4792_v52, %v4793_v3 }
 0x44c   : > { %v4180_v8 = vpop.permute.xlu0 %4179  ;;  %v9049_v49 = vpop.permute.xlu2 %3911 }
 0x44d   : > { %v4950_v23 = vsel %vm1006_vm5, %v4918_v39, %v4180_v8 }
 0x44e   : > { %v4989_v10 = vsel %vm4969_vm11, %v4950_v23, %v8990_v55 }
 0x44f   : > { %4197 = vrot.lane.b32.xlu2 %v4166_v20, %s6709_s24  ;;  %5301 = vmatmul.bf16.gmra.mxu3 %v4989_v10  ;;  %v3186_v20 = vld [vmem:[#allocation2 + $0xb0] sm:$0x1] }
 0x450   : > { %4699 = vrot.lane.b32.xlu1 %v8792_v13, %s6717_s1  ;;  %v3443_v22 = vunpack.c.l.b16 %v3186_v20 }
 0x452   : > { %v4690_v24 = vpop.permute.xlu1 %4689  ;;  %4189 = vrot.lane.b32.xlu0 %v4118_v26, %s6709_s24  ;;  %v3619_v26 = vshrl.u32 %v8640_v19, 16  ;;  %v3459_v38 = vpack.c.b16 %v3443_v22, %v3443_v22  ;;  %v4146_v22 = vshll.u32 %v8922_v30, 16 }
 0x453   : > { %v5062_v13 = vsel %vm5050_vm14, %v5029_v34, %v4690_v24  ;;  %v3626_v34 = vshll.u32 %v8807_v25, 16  ;;  %v5031_v24 = vsel %vm622_vm0, %v8990_v55, %v8994_v4  ;;  %v6150_v55 = vld [vmem:[#allocation2 + $0xa8] sm:$0xe] }
 0x454   : > { %v5094_v56 = vsel %vm988_vm3, %v5062_v13, %v4818_v54  ;;  %v3669_v63 = vpop.permute.xlu0 %3668  ;;  %v9061_v23 = vpop.permute.xlu2 %4821 }
 0x455   : > { %5955 = vmatmul.msk.bf16.gmra.mxu0 %vm5227_vm6, %v5094_v56  ;;  %v4855_v37 = vsel %vm4839_vm7, %v8617_v53, %v3669_v63  ;;  %v4620_v53 = vshrl.u32 %v8780_v51, 16  ;;  %v6196_v63 = vor.u32 %v6195_v32, %v6194_v57  ;;  %v3628_v25 = vrot.slane %v3626_v34, 1 }
 0x456   : > { %v4887_v54 = vsel %vm979_vm2, %v4855_v37, %v3798_v62  ;;  %v9057_v62 = vpop.f32.mrf.mxu3 }
 0x457   : > { %v4920_v59 = vsel %vm4904_vm9, %v4887_v54, %v3910_v40  ;;  %v4625_v46 = vor.u32 %v4624_v28, %v4620_v53  ;;  %v3621_v40 = vshll.u32 %v8640_v19, 16  ;;  %v4795_v54 = vrot.slane %v6196_v63, 1 }
 0x458   : > { %3919 = vrot.lane.b32.xlu1 %v8756_v35, %s6716_s2  ;;  %v6151_v53 = vor.u32 %v6150_v55, %v6149_v7  ;;  %v4148_v63 = vrot.slane %v4146_v22, 1 }
 0x459   : > { %v3623_v21 = vrot.slane %v3621_v40, 1 }
 0x45a   : > { %v5361_v6 = vpop.f32.mrf.mxu0  ;;  %v9043_v9 = vpop.permute.xlu1 %4309  ;;  %4319 = vrot.lane.b32.xlu0 %v8805_v45, %s6715_s22  ;;  %v4629_v45 = vrot.slane %v4627_v33, 1  ;;  %v3638_v33 = vshll.u32 %v3459_v38, 16 }
 0x45b   : > { %v9037_v41 = vadd.f32 %v5361_v6, %v5273_v27  ;;  %v3624_v56 = vor.u32 %v3623_v21, %v3619_v26  ;;  %v4796_v6 = vrot.slane %v8898_v11, 1 }
 0x45c   : > { %v4182_v18 = vpop.permute.xlu0 %4181  ;;  %v4630_v51 = vsel %vm3461_vm1, %v4625_v46, %v4629_v45  ;;  %v9081_v52 = vpop.permute.xlu2 %3913  ;;  %v3640_v46 = vrot.slane %v3638_v33, 1 }
 0x45d   : > { %v4952_v35 = vsel %vm1006_vm5, %v4920_v59, %v4182_v18  ;;  %v4797_v3 = vsel %vm3734_vm4, %v4795_v54, %v4796_v6  ;;  %v3778_v18 = vrot.slane %v3459_v38, 1  ;;  %v4144_v6 = vshrl.u32 %v8922_v30, 16 }
 0x45e   : > { %v4992_v58 = vsel %vm4969_vm11, %v4952_v35, %v9043_v9  ;;  %v5277_v27 = vpop.f32.mrf.mxu3  ;;  %v3777_v35 = vrot.slane %v6151_v53, 1  ;;  %v3641_v20 = vsel %vm3461_vm1, %v8840_v43, %v3640_v46 }
 0x45f   : > { %5306 = vmatmul.bf16.gmra.mxu3 %v4992_v58  ;;  %v5278_v4 = vadd.f32 %v9023_v17, %v5277_v27  ;;  %v6632_v58 = vld [vmem:[#allocation2 + $0x60] sm:$0xff]  }
 0x460   : > { %4829 = vrot.lane.b32.xlu1 %v4794_v50, %s6708_s23  ;;  %v3779_v45 = vsel %vm3734_vm4, %v3777_v35, %v3778_v18 }
 0x462   : > { %v3800_v8 = vpop.permute.xlu1 %3799  ;;  %4701 = vrot.lane.b32.xlu0 %v4630_v51, %s6717_s1  ;;  %v9063_v10 = vpop.f32.mrf.mxu0  ;;  %v3250_v51 = vld [vmem:[#allocation2 + $0xbc] sm:$0x1] }
 0x463   : > { %v3957_v32 = vunpack.c.l.b16 %v3250_v51  ;;  %v2373_v51 = vld [vmem:[#allocation2 + $0xd4] sm:$0x1] }
 0x464   : > { %v3671_v39 = vpop.permute.xlu0 %3670  ;;  %v9098_v57 = vpop.permute.xlu2 %4823 }
 0x465   : > { %v4857_v50 = vsel %vm4839_vm7, %v6632_v58, %v3671_v39 }
 0x466   : > { %v4889_v40 = vsel %vm979_vm2, %v4857_v50, %v3800_v8  ;;  %v3973_v8 = vpack.c.b16 %v3957_v32, %v3957_v32 }
 0x467   : > { %v4922_v39 = vsel %vm4904_vm9, %v4889_v40, %v9049_v49  ;;  %v6197_v40 = vld [vmem:[#allocation2 + $0xc0] sm:$0xf0] }
 0x468   : > { %4431 = vrot.lane.b32.xlu1 %v8788_v15, %s6704_s20  ;;  %v4151_v38 = vshll.u32 %v3973_v8, 16  ;;  %v4290_v35 = vrot.slane %v3973_v8, 1  ;;  %v6666_v8 = vld [vmem:[#allocation2 + $0xcc] sm:$0xf0] }
 0x46a   : > { %v4692_v13 = vpop.permute.xlu1 %4691  ;;  %3921 = vrot.lane.b32.xlu0 %v8788_v15, %s6716_s2  ;;  %v3629_v15 = vsel %vm3461_vm1, %v3624_v56, %v3628_v25 }
 0x46b   : > { %v5064_v47 = vsel %vm5050_vm14, %v5031_v24, %v4692_v13  ;;  %v3315_v24 = vld [vmem:[#allocation2 + $0xc8] sm:$0x1]  ;;  %v9104_v13 = vpop.f32.mrf.mxu3 }
 0x46c   : > { %v5096_v44 = vsel %vm988_vm3, %v5064_v47, %v4820_v60  ;;  %v4422_v37 = vpop.permute.xlu0 %4421  ;;  %v6664_v47 = vld [vmem:[#allocation2 + $0xb4] sm:$0xe]  ;;  %v4469_v56 = vunpack.c.l.b16 %v3315_v24 }
 0x46d   : > { %5956 = vmatmul.msk.bf16.gmra.mxu0 %vm5227_vm6, %v5096_v44  ;;  %v5033_v49 = vsel %vm622_vm0, %v9043_v9, %v4422_v37  ;;  %v4149_v9 = vor.u32 %v4148_v63, %v4144_v6  ;;  %v6665_v54 = vor.u32 %v6664_v47, %v8924_v48 }
 0x46e   : > { %v4485_v55 = vpack.c.b16 %v4469_v56, %v4469_v56 }
 0x470   : > { %3680 = vrot.lane.b32.xlu1 %v3629_v15, %s6713_s19  ;;  %v4663_v30 = vshll.u32 %v4485_v55, 16  ;;  %v4802_v22 = vrot.slane %v4485_v55, 1 }
 0x472   : > { %v5366_v28 = vpop.f32.mrf.mxu0  ;;  %v9086_v11 = vpop.permute.xlu1 %4311  ;;  %4831 = vrot.lane.b32.xlu0 %v4797_v3, %s6708_s23 }
 0x473   : > { %v9083_v60 = vadd.f32 %v5366_v28, %v5278_v4  ;;  %v9120_v4 = vpop.permute.xlu2 %3915  ;;  %v5282_v37 = vpop.f32.mrf.mxu3  ;;  %v2317_v28 = vld [vmem:[#allocation2 + $0xcc] sm:$0x1] }
 0x474   : > { %v9089_v59 = vpop.permute.xlu0 %4423  ;;  %v2318_v33 = vsel %vm7567_vm15, 0, %v2317_v28 }
 0x475   : > { %2319 = vst [vmem:[#allocation2 + $0xcc] sm:$0x1] %v2318_v33 }
 0x478   : > { %3811 = vrot.lane.b32.xlu1 %v3779_v45, %s6705_s21  ;;  %v4665_v45 = vrot.slane %v4663_v30, 1 }
 0x47a   : > { %v3802_v21 = vpop.permute.xlu1 %3801  ;;  %3682 = vrot.lane.b32.xlu0 %v3641_v20, %s6713_s19  ;;  %v9112_v27 = vpop.f32.mrf.mxu0  ;;  %v6198_v20 = vld [vmem:[#allocation2 + $0xc0] sm:$0xe]  ;;  %s5972_s19 = sshll.u32 %s9399_s28, 3 }
 0x47b   : > { %v9145_v32 = vpop.permute.xlu2 %4825  ;;  %v9152_v24 = vpop.f32.mrf.mxu3 }
 0x47c   : > { %v4184_v26 = vpop.permute.xlu0 %4183 }
 0x47d   : > { %v4954_v34 = vsel %vm1006_vm5, %v4922_v39, %v4184_v26  ;;  %v6199_v39 = vor.u32 %v6198_v20, %v6197_v40 }
 0x47e   : > { %v4995_v43 = vsel %vm4969_vm11, %v4954_v34, %v9086_v11 }
 0x47f   : > { %5311 = vmatmul.bf16.gmra.mxu3 %v4995_v43  ;;  %v3299_v43 = vld [vmem:[#allocation2 + $0xcc] sm:$0xff]   ;;  %v4801_v47 = vrot.slane %v6199_v39, 1 }
 0x480   : > { %4193 = vrot.lane.b32.xlu1 %v8853_v1, %s6709_s24  ;;  %v4668_v30 = vshrl.u32 %v3299_v43, 16 }
 0x481   : > { %v4803_v63 = vsel %vm3734_vm4, %v4801_v47, %v4802_v22 }
 0x482   : > { %v4694_v44 = vpop.permute.xlu1 %4693  ;;  %4433 = vrot.lane.b32.xlu0 %v8844_v0, %s6704_s20  ;;  %v4153_v0 = vrot.slane %v4151_v38, 1  ;;  %v5035_v38 = vsel %vm622_vm0, %v9086_v11, %v9089_v59  ;;  %v4670_v11 = vshll.u32 %v3299_v43, 16 }
 0x483   : > { %v5066_v25 = vsel %vm5050_vm14, %v5033_v49, %v4694_v44  ;;  %v6173_v49 = vld [vmem:[#allocation2 + $0xc0] sm:$0xf0]  ;;  %v6174_v44 = vld [vmem:[#allocation2 + $0xc0] sm:$0xe]  ;;  %v9156_v6 = vpop.permute.xlu2 %3917  ;;  %v5287_v59 = vpop.f32.mrf.mxu3 }
 0x484   : > { %v5098_v1 = vsel %vm988_vm3, %v5066_v25, %v9061_v23  ;;  %v3673_v7 = vpop.permute.xlu0 %3672  ;;  %v5283_v23 = vadd.f32 %v9023_v17, %v5282_v37  ;;  %v4154_v53 = vsel %vm3461_vm1, %v4149_v9, %v4153_v0  ;;  %v6667_v25 = vld [vmem:[#allocation2 + $0xcc] sm:$0xe]  ;;  %v6175_v9 = vor.u32 %v6174_v44, %v6173_v49 }
 0x485   : > { %5957 = vmatmul.msk.bf16.gmra.mxu0 %vm5227_vm6, %v5098_v1  ;;  %v4859_v15 = vsel %vm4839_vm7, %v8749_v2, %v3673_v7  ;;  %v5288_v33 = vadd.f32 %v9023_v17, %v5287_v59 }
 0x486   : > { %v4891_v3 = vsel %vm979_vm2, %v4859_v15, %v3802_v21  ;;  %v2374_v21 = vsel %vm7559_vm13, 0, %v2373_v51 }
 0x487   : > { %v4924_v58 = vsel %vm4904_vm9, %v4891_v3, %v9081_v52  ;;  %2375 = vst [vmem:[#allocation2 + $0xd4] sm:$0x1] %v2374_v21  ;;  %v4666_v52 = vsel %vm3461_vm1, %v9008_v31, %v4665_v45  ;;  %v6668_v3 = vor.u32 %v6667_v25, %v6666_v8 }
 0x488   : > { %4705 = vrot.lane.b32.xlu1 %v8877_v14, %s6717_s1  ;;  %v4289_v14 = vrot.slane %v6665_v54, 1  ;;  %v4293_v54 = vrot.slane %v8988_v12, 1 }
 0x48a   : > { %v9133_v18 = vpop.permute.xlu1 %4313  ;;  %v5371_v2 = vpop.f32.mrf.mxu0  ;;  %4195 = vrot.lane.b32.xlu0 %v4154_v53, %s6709_s24  ;;  %v4291_v26 = vsel %vm3734_vm4, %v4289_v14, %v4290_v35  ;;  %v4672_v53 = vrot.slane %v4670_v11, 1 }
 0x48b   : > { %v9136_v48 = vadd.f32 %v5371_v2, %v5283_v23  ;;  %v4292_v23 = vrot.slane %v6175_v9, 1  ;;  %v4828_v12 = vpop.permute.xlu2 %4827 }
 0x48c   : > { %v4186_v46 = vpop.permute.xlu0 %4185  ;;  %v4673_v2 = vor.u32 %v4672_v53, %v4668_v30 }
 0x48d   : > { %v4956_v50 = vsel %vm1006_vm5, %v4924_v58, %v4186_v46  ;;  %v4804_v58 = vrot.slane %v6668_v3, 1 }
 0x48e   : > { %v4998_v29 = vsel %vm4969_vm11, %v4956_v50, %v9133_v18  ;;  %v3316_v56 = vld [vmem:[#allocation2 + $0xd4] sm:$0x1] }
 0x48f   : > { %5316 = vmatmul.bf16.gmra.mxu3 %v4998_v29  ;;  %v4470_v31 = vunpack.c.l.b16 %v3316_v56 }
 0x490   : > { %4323 = vrot.lane.b32.xlu1 %v4291_v26, %s6715_s22  ;;  %v9184_v26 = vpop.f32.mrf.mxu3 }
 0x491   : > { %v4486_v0 = vpack.c.b16 %v4470_v31, %v4470_v31 }
 0x492   : > { %v3804_v34 = vpop.permute.xlu1 %3803  ;;  %4707 = vrot.lane.b32.xlu0 %v4666_v52, %s6717_s1  ;;  %v9161_v1 = vpop.f32.mrf.mxu0 }
 0x493   : > { %v4675_v28 = vshll.u32 %v4486_v0, 16  ;;  %v4805_v50 = vrot.slane %v4486_v0, 1  ;;  %v3679_v22 = vpop.permute.xlu2 %3678 }
 0x494   : > { %v3675_v36 = vpop.permute.xlu0 %3674 }
 0x495   : > { %v4806_v40 = vsel %vm3734_vm4, %v4804_v58, %v4805_v50  ;;  %v6634_v58 = vld [vmem:[#allocation2 + $0x90] sm:$0xff]  }
 0x498   : > { %4835 = vrot.lane.b32.xlu1 %v4803_v63, %s6708_s23 }
 0x49a   : > { %v4696_v7 = vpop.permute.xlu1 %4695  ;;  %3813 = vrot.lane.b32.xlu0 %v8891_v61, %s6705_s21  ;;  %v4677_v61 = vrot.slane %v4675_v28, 1 }
 0x49b   : > { %v5068_v55 = vsel %vm5050_vm14, %v5035_v38, %v4696_v7 }
 0x49c   : > { %v5100_v37 = vsel %vm988_vm3, %v5068_v55, %v9098_v57  ;;  %v4426_v15 = vpop.permute.xlu0 %4425  ;;  %v4294_v57 = vsel %vm3734_vm4, %v4292_v23, %v4293_v54  ;;  %v4678_v45 = vsel %vm3461_vm1, %v4673_v2, %v4677_v61 }
 0x49d   : > { %5958 = vmatmul.msk.bf16.gmra.mxu0 %vm5227_vm6, %v5100_v37  ;;  %4709 = vrot.lane.b32.xlu2 %v4678_v45, %s6717_s1  ;;  %s595_s1 = scalar_lea.vmem %s9365_s18, %s5972_s19 }
 0x4a0   : > { %3925 = vrot.lane.b32.xlu1 %v8979_v42, %s6716_s2  ;;  %v6633_v42 = vld [vmem:[#allocation2 + $0x78] sm:$0xff]  }
 0x4a1   : > { %v4861_v29 = vsel %vm4839_vm7, %v6633_v42, %v3675_v36 }
 0x4a2   : > { %v4316_v14 = vpop.permute.xlu1 %4315  ;;  %v5376_v35 = vpop.f32.mrf.mxu0  ;;  %4325 = vrot.lane.b32.xlu0 %v4294_v57, %s6715_s22  ;;  %v4893_v20 = vsel %vm979_vm2, %v4861_v29, %v3804_v34 }
 0x4a3   : > { %v9175_v46 = vadd.f32 %v5376_v35, %v5288_v33  ;;  %v4926_v39 = vsel %vm4904_vm9, %v4893_v20, %v9120_v4  ;;  %v5292_v63 = vpop.f32.mrf.mxu3  ;;  %v4430_v4 = vpop.permute.xlu2 %4429 }
 0x4a4   : > { %v4428_v51 = vpop.permute.xlu0 %4427  ;;  %v5293_v25 = vadd.f32 %v9023_v17, %v5292_v63 }
 0x4a8   : > { %4437 = vrot.lane.b32.xlu1 %v3299_v43, %s6704_s20  ;;  %v5037_v43 = vsel %vm622_vm0, %v9133_v18, %v4426_v15 }
 0x4aa   : > { %v3806_v21 = vpop.permute.xlu1 %3805  ;;  %4837 = vrot.lane.b32.xlu0 %v4806_v40, %s6708_s23  ;;  %v9192_v47 = vpop.f32.mrf.mxu0 }
 0x4ab   : > { %v5294_v18 = vpop.f32.mrf.mxu3  ;;  %v3810_v37 = vpop.permute.xlu2 %3809 }
 0x4ac   : > { %v4188_v52 = vpop.permute.xlu0 %4187  ;;  %v5295_v15 = vadd.f32 %v9023_v17, %v5294_v18 }
 0x4ad   : > { %v4958_v8 = vsel %vm1006_vm5, %v4926_v39, %v4188_v52 }
 0x4ae   : > { %v5001_v36 = vsel %vm4969_vm11, %v4958_v8, %v4316_v14 }
 0x4af   : > { %5321 = vmatmul.bf16.gmra.mxu3 %v5001_v36 }
 0x4b2   : > { %v4698_v34 = vpop.permute.xlu1 %4697 }
 0x4b3   : > { %v5070_v56 = vsel %vm5050_vm14, %v5037_v43, %v4698_v34 }
 0x4b4   : > { %v5102_v49 = vsel %vm988_vm3, %v5070_v56, %v9145_v32  ;;  %v3677_v44 = vpop.permute.xlu0 %3676  ;;  %v5039_v32 = vsel %vm622_vm0, %v4316_v14, %v4428_v51  ;;  %v4192_v14 = vpop.permute.xlu2 %4191 }
 0x4b5   : > { %5959 = vmatmul.msk.bf16.gmra.mxu0 %vm5227_vm6, %v5102_v49  ;;  %v4863_v9 = vsel %vm4839_vm7, %v8950_v5, %v3677_v44 }
 0x4b6   : > { %v4895_v0 = vsel %vm979_vm2, %v4863_v9, %v3806_v21  ;;  %v9219_v21 = vpop.f32.mrf.mxu3 }
 0x4b7   : > { %v4928_v3 = vsel %vm4904_vm9, %v4895_v0, %v9156_v6 }
 0x4ba   : > { %v4318_v31 = vpop.permute.xlu1 %4317  ;;  %v5381_v38 = vpop.f32.mrf.mxu0 }
 0x4bb   : > { %v5382_v7 = vadd.f32 %v5381_v38, %v5293_v25  ;;  %v5041_v51 = vsel %vm622_vm0, %v4318_v31, %v4430_v4 }
 0x4bc   : > { %v3808_v55 = vpop.permute.xlu0 %3807  ;;  %v4322_v29 = vpop.permute.xlu2 %4321 }
 0x4bd   : > { %v5449_v53 = vmax.f32 %v5382_v7, 0.0 }
 0x4be   : > { %v9226_v34 = vpop.f32.mrf.mxu3 }
 0x4c2   : > { %v4700_v54 = vpop.permute.xlu1 %4699  ;;  %v5383_v30 = vpop.f32.mrf.mxu0 }
 0x4c3   : > { %v5072_v11 = vsel %vm5050_vm14, %v5039_v32, %v4700_v54  ;;  %v5384_v59 = vadd.f32 %v5383_v30, %v5295_v15 }
 0x4c4   : > { %v5104_v28 = vsel %vm988_vm3, %v5072_v11, %v4828_v12  ;;  %v4190_v23 = vpop.permute.xlu0 %4189  ;;  %v4865_v12 = vsel %vm4839_vm7, %v6634_v58, %v3679_v22  ;;  %v4704_v43 = vpop.permute.xlu2 %4703 }
 0x4c5   : > { %v5450_v5 = vmax.f32 %v5384_v59, 0.0  ;;  %5960 = vmatmul.msk.bf16.gmra.mxu0 %vm5227_vm6, %v5104_v28  ;;  %v4960_v61 = vsel %vm1006_vm5, %v4928_v3, %v4190_v23  ;;  %v4897_v50 = vsel %vm979_vm2, %v4865_v12, %v3808_v55 }
 0x4c6   : > { %v5004_v33 = vsel %vm4969_vm11, %v4960_v61, %v4318_v31 }
 0x4c7   : > { %v9211_v57 = vpack.c.bf16 %v5450_v5, %v5449_v53  ;;  %5326 = vmatmul.bf16.gmra.mxu3 %v5004_v33 }
 0x4ca   : > { %v3920_v2 = vpop.permute.xlu1 %3919 }
 0x4cb   : > { %v4930_v6 = vsel %vm4904_vm9, %v4897_v50, %v3920_v2 }
 0x4cc   : > { %v4320_v35 = vpop.permute.xlu0 %4319  ;;  %v4962_v20 = vsel %vm1006_vm5, %v4930_v6, %v4192_v14  ;;  %v3924_v38 = vpop.permute.xlu2 %3923 }
 0x4cd   : > { %v5007_v52 = vsel %vm4969_vm11, %v4962_v20, %v4320_v35 }
 0x4d2   : > { %v4830_v45 = vpop.permute.xlu1 %4829  ;;  %v9224_v36 = vpop.f32.mrf.mxu0 }
 0x4d3   : > { %v5302_v25 = vpop.f32.mrf.mxu3 }
 0x4d4   : > { %v4702_v42 = vpop.permute.xlu0 %4701  ;;  %v4834_v30 = vpop.permute.xlu2 %4833 }
 0x4d5   : > { %v5074_v40 = vsel %vm5050_vm14, %v5041_v51, %v4702_v42 }
 0x4d6   : > { %v5106_v39 = vsel %vm988_vm3, %v5074_v40, %v4830_v45 }
 0x4d7   : > { %5331 = vmatmul.bf16.gmra.mxu3 %v5007_v52  ;;  %5961 = vmatmul.msk.bf16.gmra.mxu0 %vm5227_vm6, %v5106_v39 }
 0x4da   : > { %v4432_v22 = vpop.permute.xlu1 %4431  ;;  %v9232_v31 = vpop.f32.mrf.mxu0 }
 0x4db   : > { %v5043_v56 = vsel %vm622_vm0, %v4320_v35, %v4432_v22  ;;  %v5304_v0 = vpop.f32.mrf.mxu3 }
 0x4dc   : > { %v3922_v8 = vpop.permute.xlu0 %3921  ;;  %v5076_v44 = vsel %vm5050_vm14, %v5043_v56, %v4704_v43  ;;  %v4436_v14 = vpop.permute.xlu2 %4435  ;;  %v5305_v56 = vadd.f32 %v9023_v17, %v5304_v0 }
 0x4e2   : > { %v3681_v63 = vpop.permute.xlu1 %3680 }
 0x4e3   : > { %v4867_v55 = vsel %vm4839_vm7, %v8640_v19, %v3681_v63  ;;  %v6635_v19 = vld [vmem:[#allocation2 + $0xa8] sm:$0xff]   ;;  %v5307_v61 = vpop.f32.mrf.mxu3 }
 0x4e4   : > { %v4832_v49 = vpop.permute.xlu0 %4831  ;;  %v4899_v9 = vsel %vm979_vm2, %v4867_v55, %v3810_v37  ;;  %v5308_v40 = vadd.f32 %v9023_v17, %v5307_v61 }
 0x4e5   : > { %v5108_v4 = vsel %vm988_vm3, %v5076_v44, %v4832_v49  ;;  %v4932_v54 = vsel %vm4904_vm9, %v4899_v9, %v3922_v8 }
 0x4e7   : > { %5962 = vmatmul.msk.bf16.gmra.mxu0 %vm5227_vm6, %v5108_v4  ;;  %v5303_v4 = vadd.f32 %v9023_v17, %v5302_v25  ;;  %v5300_v25 = vadd.f32 %v9023_v17, %v9226_v34 }
 0x4ea   : > { %v3812_v7 = vpop.permute.xlu1 %3811  ;;  %v5391_v15 = vpop.f32.mrf.mxu0 }
 0x4eb   : > { %v5309_v42 = vpop.f32.mrf.mxu3 }
 0x4ec   : > { %v3683_v18 = vpop.permute.xlu0 %3682  ;;  %v5310_v20 = vadd.f32 %v9023_v17, %v5309_v42 }
 0x4ed   : > { %v4869_v5 = vsel %vm4839_vm7, %v6635_v19, %v3683_v18  ;;  %v5392_v18 = vadd.f32 %v5391_v15, %v5303_v4  ;;  %v5389_v19 = vadd.f32 %v9232_v31, %v5300_v25  ;;  %v5447_v4 = vmax.f32 %v9175_v46, 0.0 }
 0x4ee   : > { %v4901_v35 = vsel %vm979_vm2, %v4869_v5, %v3812_v7  ;;  %v5443_v25 = vmax.f32 %v9083_v60, 0.0 }
 0x4ef   : > { %v4934_v58 = vsel %vm4904_vm9, %v4901_v35, %v3924_v38 }
 0x4f2   : > { %v4194_v32 = vpop.permute.xlu1 %4193  ;;  %v5393_v23 = vpop.f32.mrf.mxu0 }
 0x4f3   : > { %v4964_v11 = vsel %vm1006_vm5, %v4932_v54, %v4194_v32  ;;  %v5394_v38 = vadd.f32 %v5393_v23, %v5305_v56  ;;  %v5453_v23 = vmax.f32 %v5392_v18, 0.0 }
 0x4f4   : > { %v5010_v59 = vsel %vm4969_vm11, %v4964_v11, %v4322_v29  ;;  %v4434_v28 = vpop.permute.xlu0 %4433 }
 0x4f5   : > { %5336 = vmatmul.bf16.gmra.mxu3 %v5010_v59  ;;  %v5045_v3 = vsel %vm622_vm0, %v4322_v29, %v4434_v28  ;;  %v3685_v29 = vpop.permute.xlu2 %3684 }
 0x4f6   : > { %v4871_v32 = vsel %vm4839_vm7, %v8964_v16, %v3685_v29  ;;  %v5298_v16 = vadd.f32 %v9023_v17, %v9219_v21 }
 0x4f8   : > { %v5387_v61 = vadd.f32 %v9224_v36, %v5298_v16 }
 0x4fa   : > { %v4706_v53 = vpop.permute.xlu1 %4705 }
 0x4fb   : > { %v5078_v37 = vsel %vm5050_vm14, %v5045_v3, %v4706_v53 }
 0x4fc   : > { %v5110_v33 = vsel %vm988_vm3, %v5078_v37, %v4834_v30  ;;  %v4196_v2 = vpop.permute.xlu0 %4195  ;;  %v5454_v30 = vmax.f32 %v5394_v38, 0.0 }
 0x4fd   : > { %5963 = vmatmul.msk.bf16.gmra.mxu0 %vm5227_vm6, %v5110_v33  ;;  %v4966_v12 = vsel %vm1006_vm5, %v4934_v58, %v4196_v2  ;;  %v4198_v54 = vpop.permute.xlu2 %4197  ;;  %v5452_v33 = vmax.f32 %v5389_v19, 0.0 }
 0x4fe   : > { %v5480_v5 = vpack.c.bf16 %v5454_v30, %v5453_v23 }
 0x500   : > { %v5518_v2 = vsel %vm622_vm0, %v5480_v5, 0 }
 0x502   : > { %v4324_v50 = vpop.permute.xlu1 %4323  ;;  %v5396_v6 = vpop.f32.mrf.mxu0 }
 0x503   : > { %v5013_v45 = vsel %vm4969_vm11, %v4966_v12, %v4324_v50  ;;  %v5047_v52 = vsel %vm622_vm0, %v4324_v50, %v4436_v14  ;;  %v5397_v39 = vadd.f32 %v5396_v6, %v5308_v40  ;;  %v5312_v11 = vpop.f32.mrf.mxu3  ;;  %v5451_v12 = vmax.f32 %v5387_v61, 0.0 }
 0x504   : > { %v4708_v51 = vpop.permute.xlu0 %4707  ;;  %v5313_v34 = vadd.f32 %v9023_v17, %v5312_v11 }
 0x505   : > { %5341 = vmatmul.bf16.gmra.mxu3 %v5013_v45  ;;  %v5080_v22 = vsel %vm5050_vm14, %v5047_v52, %v4708_v51  ;;  %v5455_v7 = vmax.f32 %v5397_v39, 0.0  ;;  %v4710_v14 = vpop.permute.xlu2 %4709  ;;  %v5479_v51 = vpack.c.bf16 %v5452_v33, %v5451_v12 }
 0x507   : > { %v5515_v29 = vsel %vm622_vm0, %v5479_v51, 0 }
 0x50a   : > { %v5398_v8 = vpop.f32.mrf.mxu0  ;;  %v4836_v43 = vpop.permute.xlu1 %4835 }
 0x50b   : > { %v5399_v63 = vadd.f32 %v5398_v8, %v5310_v20  ;;  %v5112_v49 = vsel %vm988_vm3, %v5080_v22, %v4836_v43  ;;  %v5314_v31 = vpop.f32.mrf.mxu3  ;;  %v5290_v20 = vadd.f32 %v9023_v17, %v9184_v26 }
 0x50c   : > { %v3814_v44 = vpop.permute.xlu0 %3813  ;;  %v5315_v42 = vadd.f32 %v9023_v17, %v5314_v31 }
 0x50d   : > { %v5456_v55 = vmax.f32 %v5399_v63, 0.0  ;;  %5964 = vmatmul.msk.bf16.gmra.mxu0 %vm5227_vm6, %v5112_v49  ;;  %v4903_v59 = vsel %vm979_vm2, %v4871_v32, %v3814_v44  ;;  %v5379_v39 = vadd.f32 %v9192_v47, %v5290_v20  ;;  %v5512_v49 = vsel %vm622_vm0, %v9211_v57, 0 }
 0x50e   : > { %v5285_v44 = vadd.f32 %v9023_v17, %v9152_v24  ;;  %v5280_v57 = vadd.f32 %v9023_v17, %v9104_v13  ;;  %v5445_v32 = vmax.f32 %v9136_v48, 0.0 }
 0x50f   : > { %v5481_v9 = vpack.c.bf16 %v5456_v55, %v5455_v7  ;;  %v5448_v63 = vmax.f32 %v5379_v39, 0.0 }
 0x510   : > { %v5374_v26 = vadd.f32 %v9161_v1, %v5285_v44  ;;  %v5369_v24 = vadd.f32 %v9112_v27, %v5280_v57 }
 0x511   : > { %v5521_v0 = vsel %vm622_vm0, %v5481_v9, 0  ;;  %v5477_v38 = vpack.c.bf16 %v5448_v63, %v5447_v4 }
 0x512   : > { %5547 = vmatpush.bf16.xpose.msra.mxu2 %v5521_v0  ;;  %v3926_v28 = vpop.permute.xlu1 %3925  ;;  %v5446_v47 = vmax.f32 %v5374_v26, 0.0  ;;  %v5444_v1 = vmax.f32 %v5369_v24, 0.0 }
 0x513   : > { %v4936_v3 = vsel %vm4904_vm9, %v4903_v59, %v3926_v28  ;;  %v5317_v43 = vpop.f32.mrf.mxu3  ;;  %v5509_v18 = vsel %vm622_vm0, %v5477_v38, 0  ;;  %v5275_v28 = vadd.f32 %v9023_v17, %v9057_v62  ;;  %v5441_v62 = vmax.f32 %v9037_v41, 0.0 }
 0x514   : > { %v4326_v15 = vpop.permute.xlu0 %4325  ;;  %v4968_v53 = vsel %vm1006_vm5, %v4936_v3, %v4198_v54  ;;  %v5318_v55 = vadd.f32 %v9023_v17, %v5317_v43  ;;  %v5476_v46 = vpack.c.bf16 %v5446_v47, %v5445_v32  ;;  %v5475_v27 = vpack.c.bf16 %v5444_v1, %v5443_v25 }
 0x515   : > { %v5016_v37 = vsel %vm4969_vm11, %v4968_v53, %v4326_v15  ;;  %v5364_v48 = vadd.f32 %v9063_v10, %v5275_v28 }
 0x516   : > { %5346 = vmatmul.bf16.gmra.mxu3 %v5016_v37  ;;  %v5506_v11 = vsel %vm622_vm0, %v5476_v46, 0  ;;  %v5503_v19 = vsel %vm622_vm0, %v5475_v27, 0 }
 0x517   : > { %v5442_v53 = vmax.f32 %v5364_v48, 0.0 }
 0x519   : > { %v5474_v60 = vpack.c.bf16 %v5442_v53, %v5441_v62 }
 0x51a   : > { %v5401_v35 = vpop.f32.mrf.mxu0  ;;  %5548 = vmatpush.bf16.xpose.msra.mxu2 %v5518_v2  ;;  %v4438_v58 = vpop.permute.xlu1 %4437 }
 0x51b   : > { %v5402_v50 = vadd.f32 %v5401_v35, %v5313_v34  ;;  %v5049_v21 = vsel %vm622_vm0, %v4326_v15, %v4438_v58  ;;  %v5319_v7 = vpop.f32.mrf.mxu3  ;;  %v5500_v10 = vsel %vm622_vm0, %v5474_v60, 0 }
 0x51c   : > { %v5082_v6 = vsel %vm5050_vm14, %v5049_v21, %v4710_v14  ;;  %v4838_v45 = vpop.permute.xlu0 %4837  ;;  %v5320_v0 = vadd.f32 %v9023_v17, %v5319_v7 }
 0x51d   : > { %v5114_v36 = vsel %vm988_vm3, %v5082_v6, %v4838_v45  ;;  %v5457_v22 = vmax.f32 %v5402_v50, 0.0 }
 0x51e   : > { %5965 = vmatmul.msk.bf16.gmra.mxu0 %vm5227_vm6, %v5114_v36 }
 0x522   : > { %v5403_v40 = vpop.f32.mrf.mxu0  ;;  %5549 = vmatpush.bf16.xpose.msra.mxu2 %v5515_v29 }
 0x523   : > { %v5404_v52 = vadd.f32 %v5403_v40, %v5315_v42 }
 0x525   : > { %v5458_v8 = vmax.f32 %v5404_v52, 0.0 }
 0x527   : > { %v9281_v56 = vpack.c.bf16 %v5458_v8, %v5457_v22 }
 0x52a   : > { %5550 = vmatpush.bf16.xpose.msra.mxu2 %v5512_v49 }
 0x532   : > { %v5406_v9 = vpop.f32.mrf.mxu0  ;;  %5551 = vmatpush.bf16.xpose.msra.mxu2 %v5509_v18  ;;  %v5322_v30 = vpop.f32.mrf.mxu3 }
 0x533   : > { %v5407_v54 = vadd.f32 %v5406_v9, %v5318_v55  ;;  %v5323_v16 = vadd.f32 %v9023_v17, %v5322_v30 }
 0x535   : > { %v5459_v23 = vmax.f32 %v5407_v54, 0.0 }
 0x53a   : > { %v5408_v59 = vpop.f32.mrf.mxu0  ;;  %5552 = vmatpush.bf16.xpose.msra.mxu2 %v5506_v11  ;;  %v5324_v5 = vpop.f32.mrf.mxu3 }
 0x53b   : > { %v5409_v13 = vadd.f32 %v5408_v59, %v5320_v0  ;;  %v5325_v33 = vadd.f32 %v9023_v17, %v5324_v5 }
 0x53d   : > { %v5460_v3 = vmax.f32 %v5409_v13, 0.0 }
 0x53f   : > { %v9301_v15 = vpack.c.bf16 %v5460_v3, %v5459_v23 }
 0x542   : > { %v5411_v37 = vpop.f32.mrf.mxu0  ;;  %5553 = vmatpush.bf16.xpose.msra.mxu2 %v5503_v19  ;;  %v5473_v19 = vld [vmem:[%s9363_s16] sm:$0x3] }
 0x543   : > { %v5412_v61 = vadd.f32 %v5411_v37, %v5323_v16 }
 0x545   : > { %v5461_v35 = vmax.f32 %v5412_v61, 0.0 }
 0x54a   : > { %v5413_v34 = vpop.f32.mrf.mxu0  ;;  %5554 = vmatpush.bf16.xpose.msra.mxu2 %v5500_v10  ;;  %v5327_v2 = vpop.f32.mrf.mxu3 }
 0x54b   : > { %v5414_v14 = vadd.f32 %v5413_v34, %v5325_v33  ;;  %v5328_v50 = vadd.f32 %v9023_v17, %v5327_v2 }
 0x54d   : > { %v5462_v58 = vmax.f32 %v5414_v14, 0.0 }
 0x54f   : > { %v9308_v12 = vpack.c.bf16 %v5462_v58, %v5461_v35  ;;  %v5490_v58 = vld [vmem:[%s9364_s17] sm:$0xf] }
 0x550   : > { %5493 = vperm.xlu1 %6618, %v5490_v58  }
 0x551   : > { %5966 = vmatmul.msk.bf16.vlgmr.msra.gmra.mxu2 %vm622_vm0, %v5473_v19 }
 0x552   : > { %v5329_v21 = vpop.f32.mrf.mxu3 }
 0x553   : > { %v5330_v41 = vadd.f32 %v9023_v17, %v5329_v21  ;;  %v5527_v21 = vsel %vm622_vm0, %v9301_v15, 0 }
 0x554   : > { %v5416_v31 = vpop.f32.mrf.mxu0 }
 0x555   : > { %v5417_v6 = vadd.f32 %v5416_v31, %v5328_v50  ;;  %v5530_v50 = vsel %vm622_vm0, %v9308_v12, 0  ;;  %v5524_v31 = vsel %vm622_vm0, %v9281_v56, 0 }
 0x557   : > { %v5463_v42 = vmax.f32 %v5417_v6, 0.0 }
 0x55a   : > { %v5332_v36 = vpop.f32.mrf.mxu3 }
 0x55b   : > { %v5333_v20 = vadd.f32 %v9023_v17, %v5332_v36 }
 0x55c   : > { %v5418_v45 = vpop.f32.mrf.mxu0 }
 0x55d   : > { %v5419_v51 = vadd.f32 %v5418_v45, %v5330_v41 }
 0x55f   : > { %v5464_v29 = vmax.f32 %v5419_v51, 0.0 }
 0x561   : > { %v5485_v40 = vpack.c.bf16 %v5464_v29, %v5463_v42 }
 0x562   : > { %v5334_v22 = vpop.f32.mrf.mxu3 }
 0x563   : > { %v5335_v8 = vadd.f32 %v9023_v17, %v5334_v22 }
 0x564   : > { %v5421_v52 = vpop.f32.mrf.mxu0 }
 0x565   : > { %v5422_v39 = vadd.f32 %v5421_v52, %v5333_v20 }
 0x567   : > { %v5465_v49 = vmax.f32 %v5422_v39, 0.0 }
 0x56c   : > { %v5423_v43 = vpop.f32.mrf.mxu0 }
 0x56d   : > { %v5424_v63 = vadd.f32 %v5423_v43, %v5335_v8 }
 0x56f   : > { %v5466_v44 = vmax.f32 %v5424_v63, 0.0 }
 0x571   : > { %v5486_v4 = vpack.c.bf16 %v5466_v44, %v5465_v49 }
 0x573   : > { %v5536_v35 = vsel %vm622_vm0, %v5486_v4, 0 }
 0x578   : > { %v5337_v26 = vpop.f32.mrf.mxu3 }
 0x579   : > { %v5338_v5 = vadd.f32 %v9023_v17, %v5337_v26 }
 0x57a   : > { %v5426_v38 = vpop.f32.mrf.mxu0 }
 0x57b   : > { %v5427_v60 = vadd.f32 %v5426_v38, %v5338_v5 }
 0x57d   : > { %v5467_v34 = vmax.f32 %v5427_v60, 0.0 }
 0x580   : > { %v5339_v7 = vpop.f32.mrf.mxu3 }
 0x581   : > { %v5340_v27 = vadd.f32 %v9023_v17, %v5339_v7 }
 0x582   : > { %v5428_v47 = vpop.f32.mrf.mxu0 }
 0x583   : > { %v5429_v62 = vadd.f32 %v5428_v47, %v5340_v27 }
 0x585   : > { %v5468_v33 = vmax.f32 %v5429_v62, 0.0 }
 0x587   : > { %v5487_v2 = vpack.c.bf16 %v5468_v33, %v5467_v34 }
 0x588   : > { %v5342_v55 = vpop.f32.mrf.mxu3 }
 0x589   : > { %v5343_v59 = vadd.f32 %v9023_v17, %v5342_v55  ;;  %v5539_v14 = vsel %vm622_vm0, %v5487_v2, 0 }
 0x58a   : > { %v5431_v18 = vpop.f32.mrf.mxu0 }
 0x58b   : > { %v5432_v23 = vadd.f32 %v5431_v18, %v5343_v59 }
 0x58d   : > { %v5469_v37 = vmax.f32 %v5432_v23, 0.0 }
 0x590   : > { %v5344_v9 = vpop.f32.mrf.mxu3 }
 0x591   : > { %v5345_v30 = vadd.f32 %v9023_v17, %v5344_v9 }
 0x592   : > { %v5433_v57 = vpop.f32.mrf.mxu0 }
 0x593   : > { %v5434_v25 = vadd.f32 %v5433_v57, %v5345_v30 }
 0x595   : > { %v5470_v53 = vmax.f32 %v5434_v25, 0.0 }
 0x597   : > { %v5488_v61 = vpack.c.bf16 %v5470_v53, %v5469_v37 }
 0x599   : > { %v5347_v32 = vpop.f32.mrf.mxu3  ;;  %v5542_v10 = vsel %vm622_vm0, %v5488_v61, 0 }
 0x59a   : > { %v5348_v24 = vadd.f32 %v9023_v17, %v5347_v32 }
 0x59b   : > { %v5436_v54 = vpop.f32.mrf.mxu0 }
 0x59c   : > { %v5437_v1 = vadd.f32 %v5436_v54, %v5348_v24 }
 0x59e   : > { %v5471_v13 = vmax.f32 %v5437_v1, 0.0 }
 0x5a1   : > { %v5349_v46 = vpop.f32.mrf.mxu3 }
 0x5a2   : > { %v5350_v0 = vadd.f32 %v9023_v17, %v5349_v46  ;;  %v5533_v17 = vsel %vm622_vm0, %v5485_v40, 0 }
 0x5a3   : > { %v5438_v11 = vpop.f32.mrf.mxu0 }
 0x5a4   : > { %v5439_v28 = vadd.f32 %v5438_v11, %v5350_v0 }
 0x5a6   : > { %v5472_v48 = vmax.f32 %v5439_v28, 0.0 }
 0x5a8   : > { %v5489_v3 = vpack.c.bf16 %v5472_v48, %v5471_v13 }
 0x5aa   : > { %v5545_v16 = vsel %vm622_vm0, %v5489_v3, 0 }
 0x5ab   : > { %5560 = vmatpush.bf16.xpose.msrb.mxu2 %v5545_v16 }
 0x5b3   : > { %5561 = vmatpush.bf16.xpose.msrb.mxu2 %v5542_v10 }
 0x5bb   : > { %5562 = vmatpush.bf16.xpose.msrb.mxu2 %v5539_v14 }
 0x5c2   : > { %v5494_v45 = vpop.permute.xlu1 %5493 }
 0x5c3   : > { %5563 = vmatpush.bf16.xpose.msrb.mxu2 %v5536_v35 }
 0x5cb   : > { %5564 = vmatpush.bf16.xpose.msrb.mxu2 %v5533_v17 }
 0x5d3   : > { %5565 = vmatpush.bf16.xpose.msrb.mxu2 %v5530_v50 }
 0x5d4   : > { %v5556_v6 = vpop.f32.mrf.mxu2 }
 0x5d5   : > { %v5557_v42 = vadd.f32 %v5556_v6, %v5494_v45 }
 0x5db   : > { %5566 = vmatpush.bf16.xpose.msrb.mxu2 %v5527_v21 }
 0x5dc   : > { %v5558_v41 = vpop.f32.mrf.mxu2 }
 0x5e3   : > { %5567 = vmatpush.bf16.xpose.msrb.mxu2 %v5524_v31 }
 0x5ea   : > { %5967 = vmatmul.msk.bf16.vlgmr.msrb.gmra.mxu2 %vm622_vm0, %v5473_v19 }
 0x66d   : > { %v5569_v51 = vpop.f32.mrf.mxu2 }
 0x66e   : > { %v5570_v36 = vadd.f32 %v5569_v51, %v5494_v45 }
 0x670   : > { %v5575_v12 = vrot.slane %v5570_v36, 4 }
 0x672   : > { %v5576_v15 = vsel %vm2001_vm8, %v5557_v42, %v5575_v12 }
 0x673   : > { %5578 = vst [vmem:[%s595_s1] sm:$0xff] %v5576_v15 }
 0x675   : > { %v5571_v29 = vpop.f32.mrf.mxu2 }
 0x676 PF: > { %s28_s27 = sadd.s32 1, %s6702_s27  }
 0x677   : > { %p25_p4 = scmp.ge.s32.totalorder %s28_s27, 4  }
 0x679   :  { %27 = sbr.rel (!%p25_p4) target bundleno = 4 (0x4), region = 139 }

</bundles_post_ra>
